<compile_context>
chip_gen: v7x
topology: tpu7x:2x2x1
jax: 0.10.0
libtpu: 0.0.40
codegen_flags: <defaults>
</compile_context>

<pallas_src>
import jax
import jax.numpy as jnp
from jax.experimental import pallas as pl
from jax.experimental.pallas import tpu as pltpu

LEAKY_SLOPE = 0.01   # nn.LeakyReLU default negative_slope
BN_EPS = 1e-5
LANE = 128


def _round_up(x, m):
    return (x + m - 1) // m * m


def fused_res_conv_kernel(xcol_ref, w1_ref, b1_ref, w2_ref, b2_ref,
                          o_ref, pad2, y1_sc, acc):
    """conv1(3x3,p=1)+BN+LReLU -> conv2(3x3,p=1)+BN+LReLU + residual.

    xcol_ref: (1, H*W, 9*Cin) bf16  wrapper-side im2col of x (taps on K)
    w1_ref  : (9*Cin, Cp)     bf16  conv1 weights, BN scale folded, (ky,kx,ci) rows
    w2_ref  : (9, Cp, Cp)     bf16  conv2 weights per tap, BN scale folded
    b*_ref  : (1, Cp)         f32   fused conv-bias + BN bias
    o_ref   : (1, H*W, Cout)  f32   only the real channels are written back
    pad2    : (H+2, W+2, Cp)  bf16  spatially padded x1 (conv2 input)
    y1_sc   : (H*W, Cp)       f32   explicit home for x1 (residual)
    acc     : (H*W, Cp)       f32   conv2 accumulator
    """
    H = pad2.shape[0] - 2
    W = pad2.shape[1] - 2
    Cp = pad2.shape[2]
    Cout = o_ref.shape[2]
    HW = H * W

    # Keep only the 1-px halo of pad2 at zero; the interior is fully
    # overwritten every grid step, so the full buffer is never cleared.
    zrow = jnp.zeros((1, W + 2, Cp), dtype=pad2.dtype)
    zcol = jnp.zeros((H + 2, 1, Cp), dtype=pad2.dtype)
    pad2[0:1, :, :] = zrow
    pad2[H + 1:H + 2, :, :] = zrow
    pad2[:, 0:1, :] = zcol
    pad2[:, W + 1:W + 2, :] = zcol

    # ---- block 1: conv3x3(pad=1) + BN + LeakyReLU (one MXU contraction) ----
    y1 = jnp.dot(xcol_ref[0], w1_ref[...], preferred_element_type=jnp.float32)
    y1 = y1 + b1_ref[...]
    y1 = jnp.maximum(y1, LEAKY_SLOPE * y1)            # LeakyReLU
    y1_sc[...] = y1                                   # f32 home for residual
    pad2[1:H + 1, 1:W + 1, :] = y1.reshape(H, W, Cp).astype(pad2.dtype)

    # ---- block 2: conv3x3(pad=1) as 9 accumulating MXU dots ----------------
    for ky in range(3):
        for kx in range(3):
            lhs = pad2[ky:ky + H, kx:kx + W, :].reshape(HW, Cp)
            tap = jnp.dot(lhs, w2_ref[3 * ky + kx],
                          preferred_element_type=jnp.float32)
            if ky == 0 and kx == 0:
                acc[...] = tap
            else:
                acc[...] += tap

    y2 = acc[...] + b2_ref[...]
    y2 = jnp.maximum(y2, LEAKY_SLOPE * y2)            # LeakyReLU
    y2 = y2 + y1_sc[...]                              # residual add

    # Masked store of only the real channels (Cout << 128 in the demo).
    o_ref[...] = y2[:, :Cout].reshape(1, HW, Cout).astype(o_ref.dtype)


def _fuse_bn(conv_bias, gamma, beta, running_mean, running_var):
    inv_std = 1.0 / jnp.sqrt(running_var + BN_EPS)
    scale = gamma * inv_std
    bias = (conv_bias - running_mean) * scale + beta
    return scale, bias


def start_conv_forward(x_nchw, params):
    """start_conv.forward (eval mode). NCHW in / NCHW out (module contract).

    In a real model keep activations NHWC end-to-end and drop both wrapper
    transposes; the input transpose here fuses into the wrapper im2col.
    """
    N, Cin, H, W = x_nchw.shape
    Cout = params["w1"].shape[-1]
    Cp = _round_up(Cout, LANE)
    HW = H * W

    # ---- fold BN (eval: running stats) into conv weights / bias ------------
    s1, t1 = _fuse_bn(params["b1"], params["g1"], params["beta1"],
                      params["rm1"], params["rv1"])
    s2, t2 = _fuse_bn(params["b2"], params["g2"], params["beta2"],
                      params["rm2"], params["rv2"])

    # Weights are HWIO here; real PyTorch Conv2d weights (OIHW) must be
    # permuted with w.transpose(2, 3, 1, 0) before this point.
    w1 = params["w1"] * s1                                 # scale folded
    w2 = params["w2"] * s2
    w1 = jnp.pad(w1, ((0, 0), (0, 0), (0, 0), (0, Cp - Cout)))
    w1 = w1.reshape(9 * Cin, Cp).astype(jnp.bfloat16)      # rows = (ky,kx,ci)
    w2 = jnp.pad(w2, ((0, 0), (0, 0), (0, Cp - Cout), (0, Cp - Cout)))
    w2 = w2.reshape(9, Cp, Cp).astype(jnp.bfloat16)        # per-tap RHS
    b1 = jnp.pad(t1, (0, Cp - Cout)).reshape(1, Cp).astype(jnp.float32)
    b2 = jnp.pad(t2, (0, Cp - Cout)).reshape(1, Cp).astype(jnp.float32)

    # ---- conv1 im2col in the wrapper (fuses with the NCHW->NHWC transpose
    #      and the HBM->VMEM input DMA): (N, H*W, 9*Cin) bf16 ----------------
    x = jnp.transpose(x_nchw, (0, 2, 3, 1)).astype(jnp.float32)
    xp = jnp.pad(x, ((0, 0), (1, 1), (1, 1), (0, 0)))
    cols = [xp[:, ky:ky + H, kx:kx + W, :]
            for ky in range(3) for kx in range(3)]
    xcol = jnp.concatenate(cols, axis=-1).reshape(N, HW, 9 * Cin)
    xcol = xcol.astype(jnp.bfloat16)

    out = pl.pallas_call(
        fused_res_conv_kernel,
        out_shape=jax.ShapeDtypeStruct((N, HW, Cout), jnp.float32),
        grid_spec=pltpu.PrefetchScalarGridSpec(
            num_scalar_prefetch=0,
            grid=(N,),
            in_specs=[
                pl.BlockSpec((1, HW, 9 * Cin), lambda n: (n, 0, 0)),
                pl.BlockSpec((9 * Cin, Cp), lambda n: (0, 0)),
                pl.BlockSpec((1, Cp), lambda n: (0, 0)),
                pl.BlockSpec((9, Cp, Cp), lambda n: (0, 0, 0)),
                pl.BlockSpec((1, Cp), lambda n: (0, 0)),
            ],
            out_specs=pl.BlockSpec((1, HW, Cout), lambda n: (n, 0, 0)),
            scratch_shapes=[
                pltpu.VMEM((H + 2, W + 2, Cp), jnp.bfloat16),  # padded x1
                pltpu.VMEM((HW, Cp), jnp.float32),             # y1 (residual)
                pltpu.VMEM((HW, Cp), jnp.float32),             # conv2 acc
            ],
        ),
        compiler_params=pltpu.CompilerParams(
            dimension_semantics=("parallel",),
            vmem_limit_bytes=64 * 1024 * 1024,
        ),
    )(xcol, w1, b1, w2, b2)

    out = out.reshape(N, H, W, Cout)
    return jnp.transpose(out, (0, 3, 1, 2))  # NHWC -> NCHW (module contract)


def _reference_forward(x_nchw, params):
    """Pure-JAX/XLA reference (f32) for a loose-tolerance sanity check."""
    x = jnp.transpose(x_nchw, (0, 2, 3, 1))

    def block(h, w, b, g, beta, rm, rv):
        y = jax.lax.conv_general_dilated(
            h, w, window_strides=(1, 1), padding=((1, 1), (1, 1)),
            dimension_numbers=("NHWC", "HWIO", "NHWC"))
        y = y + b
        y = (y - rm) / jnp.sqrt(rv + BN_EPS) * g + beta
        return jnp.where(y > 0, y, LEAKY_SLOPE * y)

    x1 = block(x, params["w1"], params["b1"], params["g1"], params["beta1"],
               params["rm1"], params["rv1"])
    x2 = block(x1, params["w2"], params["b2"], params["g2"], params["beta2"],
               params["rm2"], params["rv2"]) + x1
    return jnp.transpose(x2, (0, 3, 1, 2))


def init_params(key, in_channels, out_channels):
    """Deterministic synthetic parameters for res_conv(in, out). HWIO weights."""
    ks = jax.random.split(key, 8)
    p = {}
    p["w1"] = jax.random.normal(ks[0], (3, 3, in_channels, out_channels),
                                jnp.float32) * 0.1
    p["b1"] = jax.random.normal(ks[1], (out_channels,), jnp.float32) * 0.05
    p["g1"] = 1.0 + 0.1 * jax.random.normal(ks[2], (out_channels,), jnp.float32)
    p["beta1"] = 0.05 * jax.random.normal(ks[3], (out_channels,), jnp.float32)
    p["rm1"] = jnp.zeros((out_channels,), jnp.float32)
    p["rv1"] = jnp.ones((out_channels,), jnp.float32)
    p["w2"] = jax.random.normal(ks[4], (3, 3, out_channels, out_channels),
                                jnp.float32) * 0.1
    p["b2"] = jax.random.normal(ks[5], (out_channels,), jnp.float32) * 0.05
    p["g2"] = 1.0 + 0.1 * jax.random.normal(ks[6], (out_channels,), jnp.float32)
    p["beta2"] = 0.05 * jax.random.normal(ks[7], (out_channels,), jnp.float32)
    p["rm2"] = jnp.zeros((out_channels,), jnp.float32)
    p["rv2"] = jnp.ones((out_channels,), jnp.float32)
    return p


if __name__ == "__main__":
    key = jax.random.PRNGKey(0)
    k_x, k_p = jax.random.split(key)

    N, Cin, H, W = 2, 4, 16, 16
    Cout = 8
    x = jax.random.normal(k_x, (N, Cin, H, W), jnp.float32)
    params = init_params(k_p, Cin, Cout)

    out = jax.jit(start_conv_forward)(x, params)
    out = jax.block_until_ready(out)
    assert out.shape == (N, Cout, H, W), out.shape

    # Loose-tolerance check vs f32 XLA reference (bf16 MXU inputs, f32 accum).
    ref = jax.block_until_ready(_reference_forward(x, params))
    max_err = float(jnp.max(jnp.abs(out - ref)))
    assert max_err < 0.3, f"max abs error {max_err}"

    print("KERNEL_OK")
</pallas_src>

<mosaic_0001>
module attributes {stable_mosaic.version = 11 : i64} {
  func.func @fused_res_conv_kernel(%arg0: i32, %arg1: memref<1x256x36xbf16, #tpu.memory_space<vmem>>, %arg2: memref<36x128xbf16, #tpu.memory_space<vmem>>, %arg3: memref<1x128xf32, #tpu.memory_space<vmem>>, %arg4: memref<9x128x128xbf16, #tpu.memory_space<vmem>>, %arg5: memref<1x128xf32, #tpu.memory_space<vmem>>, %arg6: memref<1x256x8xf32, #tpu.memory_space<vmem>>, %arg7: memref<18x18x128xbf16, #tpu.memory_space<vmem>>, %arg8: memref<256x128xf32, #tpu.memory_space<vmem>>, %arg9: memref<256x128xf32, #tpu.memory_space<vmem>>) attributes {dimension_semantics = [#tpu.dimension_semantics<parallel>], iteration_bounds = array<i64: 2>, scalar_prefetch = 0 : i64, scratch_operands = 3 : i64, tpu.core_type = #tpu.core_type<tc>, window_params = [{transform_indices = @transform_0, window_bounds = array<i64: 1, 256, 36>}, {pipeline_mode = #tpu.pipeline_mode<synchronous>, transform_indices = @transform_1, window_bounds = array<i64: 36, 128>}, {pipeline_mode = #tpu.pipeline_mode<synchronous>, transform_indices = @transform_2, window_bounds = array<i64: 1, 128>}, {pipeline_mode = #tpu.pipeline_mode<synchronous>, transform_indices = @transform_3, window_bounds = array<i64: 9, 128, 128>}, {pipeline_mode = #tpu.pipeline_mode<synchronous>, transform_indices = @transform_4, window_bounds = array<i64: 1, 128>}, {transform_indices = @transform_5, window_bounds = array<i64: 1, 256, 8>}]} {
    %cst = arith.constant 0.000000e+00 : bf16
    %0 = vector.broadcast %cst : bf16 to vector<1x18x128xbf16>
    %cst_0 = arith.constant 0.000000e+00 : bf16
    %1 = vector.broadcast %cst_0 : bf16 to vector<18x1x128xbf16>
    %c0 = arith.constant 0 : index
    %c0_1 = arith.constant 0 : index
    %c0_2 = arith.constant 0 : index
    %2 = vector.load %arg7[%c0, %c0_1, %c0_2] : memref<18x18x128xbf16, #tpu.memory_space<vmem>>, vector<1x18x128xbf16>
    tpu.vector_store %arg7[%c0, %c0_1, %c0_2], %0 {strides = array<i32>} : memref<18x18x128xbf16, #tpu.memory_space<vmem>>, vector<1x18x128xbf16>,
    %c17 = arith.constant 17 : index
    %c0_3 = arith.constant 0 : index
    %c0_4 = arith.constant 0 : index
    %3 = vector.load %arg7[%c17, %c0_3, %c0_4] : memref<18x18x128xbf16, #tpu.memory_space<vmem>>, vector<1x18x128xbf16>
    tpu.vector_store %arg7[%c17, %c0_3, %c0_4], %0 {strides = array<i32>} : memref<18x18x128xbf16, #tpu.memory_space<vmem>>, vector<1x18x128xbf16>,
    %c0_5 = arith.constant 0 : index
    %c0_6 = arith.constant 0 : index
    %c0_7 = arith.constant 0 : index
    %4 = vector.load %arg7[%c0_5, %c0_6, %c0_7] : memref<18x18x128xbf16, #tpu.memory_space<vmem>>, vector<18x1x128xbf16>
    tpu.vector_store %arg7[%c0_5, %c0_6, %c0_7], %1 {strides = array<i32>} : memref<18x18x128xbf16, #tpu.memory_space<vmem>>, vector<18x1x128xbf16>,
    %c0_8 = arith.constant 0 : index
    %c17_9 = arith.constant 17 : index
    %c0_10 = arith.constant 0 : index
    %5 = vector.load %arg7[%c0_8, %c17_9, %c0_10] : memref<18x18x128xbf16, #tpu.memory_space<vmem>>, vector<18x1x128xbf16>
    tpu.vector_store %arg7[%c0_8, %c17_9, %c0_10], %1 {strides = array<i32>} : memref<18x18x128xbf16, #tpu.memory_space<vmem>>, vector<18x1x128xbf16>,
    %c0_11 = arith.constant 0 : index
    %c0_12 = arith.constant 0 : index
    %c0_13 = arith.constant 0 : index
    %6 = vector.load %arg1[%c0_11, %c0_12, %c0_13] : memref<1x256x36xbf16, #tpu.memory_space<vmem>>, vector<1x256x36xbf16>
    %7 = vector.shape_cast %6 : vector<1x256x36xbf16> to vector<256x36xbf16>
    %c0_14 = arith.constant 0 : index
    %c0_15 = arith.constant 0 : index
    %8 = vector.load %arg2[%c0_14, %c0_15] : memref<36x128xbf16, #tpu.memory_space<vmem>>, vector<36x128xbf16>
    %cst_16 = arith.constant dense<0.000000e+00> : vector<256x128xf32>
    %9 = tpu.matmul %7, %8, %cst_16 {dimension_numbers = #tpu.dot_dimension_numbers<[1], [0], [0], [1], [0, 0, 1, 1], [], []>} : vector<256x36xbf16>, vector<36x128xbf16>, vector<256x128xf32> -> vector<256x128xf32>
    %c0_17 = arith.constant 0 : index
    %c0_18 = arith.constant 0 : index
    %10 = vector.load %arg3[%c0_17, %c0_18] : memref<1x128xf32, #tpu.memory_space<vmem>>, vector<1x128xf32>
    %11 = vector.broadcast %10 : vector<1x128xf32> to vector<256x128xf32>
    %12 = arith.addf %9, %11 : vector<256x128xf32>
    %cst_19 = arith.constant 0.00999999977 : f32
    %13 = vector.broadcast %cst_19 : f32 to vector<256x128xf32>
    %14 = arith.mulf %13, %12 : vector<256x128xf32>
    %15 = arith.maximumf %12, %14 : vector<256x128xf32>
    %c0_20 = arith.constant 0 : index
    %c0_21 = arith.constant 0 : index
    %16 = vector.load %arg8[%c0_20, %c0_21] : memref<256x128xf32, #tpu.memory_space<vmem>>, vector<256x128xf32>
    tpu.vector_store %arg8[%c0_20, %c0_21], %15 {strides = array<i32>} : memref<256x128xf32, #tpu.memory_space<vmem>>, vector<256x128xf32>,
    %17 = vector.shape_cast %15 : vector<256x128xf32> to vector<16x16x128xf32>
    %18 = arith.truncf %17 : vector<16x16x128xf32> to vector<16x16x128xbf16>
    %c1 = arith.constant 1 : index
    %c1_22 = arith.constant 1 : index
    %c0_23 = arith.constant 0 : index
    %19 = vector.load %arg7[%c1, %c1_22, %c0_23] : memref<18x18x128xbf16, #tpu.memory_space<vmem>>, vector<16x16x128xbf16>
    tpu.vector_store %arg7[%c1, %c1_22, %c0_23], %18 {strides = array<i32>} : memref<18x18x128xbf16, #tpu.memory_space<vmem>>, vector<16x16x128xbf16>,
    %c0_24 = arith.constant 0 : index
    %c0_25 = arith.constant 0 : index
    %c0_26 = arith.constant 0 : index
    %20 = vector.load %arg7[%c0_24, %c0_25, %c0_26] : memref<18x18x128xbf16, #tpu.memory_space<vmem>>, vector<16x16x128xbf16>
    %21 = vector.shape_cast %20 : vector<16x16x128xbf16> to vector<256x128xbf16>
    %c0_27 = arith.constant 0 : index
    %c0_28 = arith.constant 0 : index
    %c0_29 = arith.constant 0 : index
    %22 = vector.load %arg4[%c0_27, %c0_28, %c0_29] : memref<9x128x128xbf16, #tpu.memory_space<vmem>>, vector<1x128x128xbf16>
    %23 = vector.shape_cast %22 : vector<1x128x128xbf16> to vector<128x128xbf16>
    %cst_30 = arith.constant dense<0.000000e+00> : vector<256x128xf32>
    %24 = tpu.matmul %21, %23, %cst_30 {dimension_numbers = #tpu.dot_dimension_numbers<[1], [0], [0], [1], [0, 0, 1, 1], [], []>} : vector<256x128xbf16>, vector<128x128xbf16>, vector<256x128xf32> -> vector<256x128xf32>
    %c0_31 = arith.constant 0 : index
    %c0_32 = arith.constant 0 : index
    %25 = vector.load %arg9[%c0_31, %c0_32] : memref<256x128xf32, #tpu.memory_space<vmem>>, vector<256x128xf32>
    tpu.vector_store %arg9[%c0_31, %c0_32], %24 {strides = array<i32>} : memref<256x128xf32, #tpu.memory_space<vmem>>, vector<256x128xf32>,
    %c0_33 = arith.constant 0 : index
    %c1_34 = arith.constant 1 : index
    %c0_35 = arith.constant 0 : index
    %26 = vector.load %arg7[%c0_33, %c1_34, %c0_35] : memref<18x18x128xbf16, #tpu.memory_space<vmem>>, vector<16x16x128xbf16>
    %27 = vector.shape_cast %26 : vector<16x16x128xbf16> to vector<256x128xbf16>
    %c1_36 = arith.constant 1 : index
    %c0_37 = arith.constant 0 : index
    %c0_38 = arith.constant 0 : index
    %28 = vector.load %arg4[%c1_36, %c0_37, %c0_38] : memref<9x128x128xbf16, #tpu.memory_space<vmem>>, vector<1x128x128xbf16>
    %29 = vector.shape_cast %28 : vector<1x128x128xbf16> to vector<128x128xbf16>
    %cst_39 = arith.constant dense<0.000000e+00> : vector<256x128xf32>
    %30 = tpu.matmul %27, %29, %cst_39 {dimension_numbers = #tpu.dot_dimension_numbers<[1], [0], [0], [1], [0, 0, 1, 1], [], []>} : vector<256x128xbf16>, vector<128x128xbf16>, vector<256x128xf32> -> vector<256x128xf32>
    %c0_40 = arith.constant 0 : index
    %c0_41 = arith.constant 0 : index
    %31 = vector.load %arg9[%c0_40, %c0_41] : memref<256x128xf32, #tpu.memory_space<vmem>>, vector<256x128xf32>
    %32 = arith.addf %31, %30 : vector<256x128xf32>
    %c0_42 = arith.constant 0 : index
    %c0_43 = arith.constant 0 : index
    %33 = vector.load %arg9[%c0_42, %c0_43] : memref<256x128xf32, #tpu.memory_space<vmem>>, vector<256x128xf32>
    tpu.vector_store %arg9[%c0_42, %c0_43], %32 {strides = array<i32>} : memref<256x128xf32, #tpu.memory_space<vmem>>, vector<256x128xf32>,
    %c0_44 = arith.constant 0 : index
    %c2 = arith.constant 2 : index
    %c0_45 = arith.constant 0 : index
    %34 = vector.load %arg7[%c0_44, %c2, %c0_45] : memref<18x18x128xbf16, #tpu.memory_space<vmem>>, vector<16x16x128xbf16>
    %35 = vector.shape_cast %34 : vector<16x16x128xbf16> to vector<256x128xbf16>
    %c2_46 = arith.constant 2 : index
    %c0_47 = arith.constant 0 : index
    %c0_48 = arith.constant 0 : index
    %36 = vector.load %arg4[%c2_46, %c0_47, %c0_48] : memref<9x128x128xbf16, #tpu.memory_space<vmem>>, vector<1x128x128xbf16>
    %37 = vector.shape_cast %36 : vector<1x128x128xbf16> to vector<128x128xbf16>
    %cst_49 = arith.constant dense<0.000000e+00> : vector<256x128xf32>
    %38 = tpu.matmul %35, %37, %cst_49 {dimension_numbers = #tpu.dot_dimension_numbers<[1], [0], [0], [1], [0, 0, 1, 1], [], []>} : vector<256x128xbf16>, vector<128x128xbf16>, vector<256x128xf32> -> vector<256x128xf32>
    %c0_50 = arith.constant 0 : index
    %c0_51 = arith.constant 0 : index
    %39 = vector.load %arg9[%c0_50, %c0_51] : memref<256x128xf32, #tpu.memory_space<vmem>>, vector<256x128xf32>
    %40 = arith.addf %39, %38 : vector<256x128xf32>
    %c0_52 = arith.constant 0 : index
    %c0_53 = arith.constant 0 : index
    %41 = vector.load %arg9[%c0_52, %c0_53] : memref<256x128xf32, #tpu.memory_space<vmem>>, vector<256x128xf32>
    tpu.vector_store %arg9[%c0_52, %c0_53], %40 {strides = array<i32>} : memref<256x128xf32, #tpu.memory_space<vmem>>, vector<256x128xf32>,
    %c1_54 = arith.constant 1 : index
    %c0_55 = arith.constant 0 : index
    %c0_56 = arith.constant 0 : index
    %42 = vector.load %arg7[%c1_54, %c0_55, %c0_56] : memref<18x18x128xbf16, #tpu.memory_space<vmem>>, vector<16x16x128xbf16>
    %43 = vector.shape_cast %42 : vector<16x16x128xbf16> to vector<256x128xbf16>
    %c3 = arith.constant 3 : index
    %c0_57 = arith.constant 0 : index
    %c0_58 = arith.constant 0 : index
    %44 = vector.load %arg4[%c3, %c0_57, %c0_58] : memref<9x128x128xbf16, #tpu.memory_space<vmem>>, vector<1x128x128xbf16>
    %45 = vector.shape_cast %44 : vector<1x128x128xbf16> to vector<128x128xbf16>
    %cst_59 = arith.constant dense<0.000000e+00> : vector<256x128xf32>
    %46 = tpu.matmul %43, %45, %cst_59 {dimension_numbers = #tpu.dot_dimension_numbers<[1], [0], [0], [1], [0, 0, 1, 1], [], []>} : vector<256x128xbf16>, vector<128x128xbf16>, vector<256x128xf32> -> vector<256x128xf32>
    %c0_60 = arith.constant 0 : index
    %c0_61 = arith.constant 0 : index
    %47 = vector.load %arg9[%c0_60, %c0_61] : memref<256x128xf32, #tpu.memory_space<vmem>>, vector<256x128xf32>
    %48 = arith.addf %47, %46 : vector<256x128xf32>
    %c0_62 = arith.constant 0 : index
    %c0_63 = arith.constant 0 : index
    %49 = vector.load %arg9[%c0_62, %c0_63] : memref<256x128xf32, #tpu.memory_space<vmem>>, vector<256x128xf32>
    tpu.vector_store %arg9[%c0_62, %c0_63], %48 {strides = array<i32>} : memref<256x128xf32, #tpu.memory_space<vmem>>, vector<256x128xf32>,
    %c1_64 = arith.constant 1 : index
    %c1_65 = arith.constant 1 : index
    %c0_66 = arith.constant 0 : index
    %50 = vector.load %arg7[%c1_64, %c1_65, %c0_66] : memref<18x18x128xbf16, #tpu.memory_space<vmem>>, vector<16x16x128xbf16>
    %51 = vector.shape_cast %50 : vector<16x16x128xbf16> to vector<256x128xbf16>
    %c4 = arith.constant 4 : index
    %c0_67 = arith.constant 0 : index
    %c0_68 = arith.constant 0 : index
    %52 = vector.load %arg4[%c4, %c0_67, %c0_68] : memref<9x128x128xbf16, #tpu.memory_space<vmem>>, vector<1x128x128xbf16>
    %53 = vector.shape_cast %52 : vector<1x128x128xbf16> to vector<128x128xbf16>
    %cst_69 = arith.constant dense<0.000000e+00> : vector<256x128xf32>
    %54 = tpu.matmul %51, %53, %cst_69 {dimension_numbers = #tpu.dot_dimension_numbers<[1], [0], [0], [1], [0, 0, 1, 1], [], []>} : vector<256x128xbf16>, vector<128x128xbf16>, vector<256x128xf32> -> vector<256x128xf32>
    %c0_70 = arith.constant 0 : index
    %c0_71 = arith.constant 0 : index
    %55 = vector.load %arg9[%c0_70, %c0_71] : memref<256x128xf32, #tpu.memory_space<vmem>>, vector<256x128xf32>
    %56 = arith.addf %55, %54 : vector<256x128xf32>
    %c0_72 = arith.constant 0 : index
    %c0_73 = arith.constant 0 : index
    %57 = vector.load %arg9[%c0_72, %c0_73] : memref<256x128xf32, #tpu.memory_space<vmem>>, vector<256x128xf32>
    tpu.vector_store %arg9[%c0_72, %c0_73], %56 {strides = array<i32>} : memref<256x128xf32, #tpu.memory_space<vmem>>, vector<256x128xf32>,
    %c1_74 = arith.constant 1 : index
    %c2_75 = arith.constant 2 : index
    %c0_76 = arith.constant 0 : index
    %58 = vector.load %arg7[%c1_74, %c2_75, %c0_76] : memref<18x18x128xbf16, #tpu.memory_space<vmem>>, vector<16x16x128xbf16>
    %59 = vector.shape_cast %58 : vector<16x16x128xbf16> to vector<256x128xbf16>
    %c5 = arith.constant 5 : index
    %c0_77 = arith.constant 0 : index
    %c0_78 = arith.constant 0 : index
    %60 = vector.load %arg4[%c5, %c0_77, %c0_78] : memref<9x128x128xbf16, #tpu.memory_space<vmem>>, vector<1x128x128xbf16>
    %61 = vector.shape_cast %60 : vector<1x128x128xbf16> to vector<128x128xbf16>
    %cst_79 = arith.constant dense<0.000000e+00> : vector<256x128xf32>
    %62 = tpu.matmul %59, %61, %cst_79 {dimension_numbers = #tpu.dot_dimension_numbers<[1], [0], [0], [1], [0, 0, 1, 1], [], []>} : vector<256x128xbf16>, vector<128x128xbf16>, vector<256x128xf32> -> vector<256x128xf32>
    %c0_80 = arith.constant 0 : index
    %c0_81 = arith.constant 0 : index
    %63 = vector.load %arg9[%c0_80, %c0_81] : memref<256x128xf32, #tpu.memory_space<vmem>>, vector<256x128xf32>
    %64 = arith.addf %63, %62 : vector<256x128xf32>
    %c0_82 = arith.constant 0 : index
    %c0_83 = arith.constant 0 : index
    %65 = vector.load %arg9[%c0_82, %c0_83] : memref<256x128xf32, #tpu.memory_space<vmem>>, vector<256x128xf32>
    tpu.vector_store %arg9[%c0_82, %c0_83], %64 {strides = array<i32>} : memref<256x128xf32, #tpu.memory_space<vmem>>, vector<256x128xf32>,
    %c2_84 = arith.constant 2 : index
    %c0_85 = arith.constant 0 : index
    %c0_86 = arith.constant 0 : index
    %66 = vector.load %arg7[%c2_84, %c0_85, %c0_86] : memref<18x18x128xbf16, #tpu.memory_space<vmem>>, vector<16x16x128xbf16>
    %67 = vector.shape_cast %66 : vector<16x16x128xbf16> to vector<256x128xbf16>
    %c6 = arith.constant 6 : index
    %c0_87 = arith.constant 0 : index
    %c0_88 = arith.constant 0 : index
    %68 = vector.load %arg4[%c6, %c0_87, %c0_88] : memref<9x128x128xbf16, #tpu.memory_space<vmem>>, vector<1x128x128xbf16>
    %69 = vector.shape_cast %68 : vector<1x128x128xbf16> to vector<128x128xbf16>
    %cst_89 = arith.constant dense<0.000000e+00> : vector<256x128xf32>
    %70 = tpu.matmul %67, %69, %cst_89 {dimension_numbers = #tpu.dot_dimension_numbers<[1], [0], [0], [1], [0, 0, 1, 1], [], []>} : vector<256x128xbf16>, vector<128x128xbf16>, vector<256x128xf32> -> vector<256x128xf32>
    %c0_90 = arith.constant 0 : index
    %c0_91 = arith.constant 0 : index
    %71 = vector.load %arg9[%c0_90, %c0_91] : memref<256x128xf32, #tpu.memory_space<vmem>>, vector<256x128xf32>
    %72 = arith.addf %71, %70 : vector<256x128xf32>
    %c0_92 = arith.constant 0 : index
    %c0_93 = arith.constant 0 : index
    %73 = vector.load %arg9[%c0_92, %c0_93] : memref<256x128xf32, #tpu.memory_space<vmem>>, vector<256x128xf32>
    tpu.vector_store %arg9[%c0_92, %c0_93], %72 {strides = array<i32>} : memref<256x128xf32, #tpu.memory_space<vmem>>, vector<256x128xf32>,
    %c2_94 = arith.constant 2 : index
    %c1_95 = arith.constant 1 : index
    %c0_96 = arith.constant 0 : index
    %74 = vector.load %arg7[%c2_94, %c1_95, %c0_96] : memref<18x18x128xbf16, #tpu.memory_space<vmem>>, vector<16x16x128xbf16>
    %75 = vector.shape_cast %74 : vector<16x16x128xbf16> to vector<256x128xbf16>
    %c7 = arith.constant 7 : index
    %c0_97 = arith.constant 0 : index
    %c0_98 = arith.constant 0 : index
    %76 = vector.load %arg4[%c7, %c0_97, %c0_98] : memref<9x128x128xbf16, #tpu.memory_space<vmem>>, vector<1x128x128xbf16>
    %77 = vector.shape_cast %76 : vector<1x128x128xbf16> to vector<128x128xbf16>
    %cst_99 = arith.constant dense<0.000000e+00> : vector<256x128xf32>
    %78 = tpu.matmul %75, %77, %cst_99 {dimension_numbers = #tpu.dot_dimension_numbers<[1], [0], [0], [1], [0, 0, 1, 1], [], []>} : vector<256x128xbf16>, vector<128x128xbf16>, vector<256x128xf32> -> vector<256x128xf32>
    %c0_100 = arith.constant 0 : index
    %c0_101 = arith.constant 0 : index
    %79 = vector.load %arg9[%c0_100, %c0_101] : memref<256x128xf32, #tpu.memory_space<vmem>>, vector<256x128xf32>
    %80 = arith.addf %79, %78 : vector<256x128xf32>
    %c0_102 = arith.constant 0 : index
    %c0_103 = arith.constant 0 : index
    %81 = vector.load %arg9[%c0_102, %c0_103] : memref<256x128xf32, #tpu.memory_space<vmem>>, vector<256x128xf32>
    tpu.vector_store %arg9[%c0_102, %c0_103], %80 {strides = array<i32>} : memref<256x128xf32, #tpu.memory_space<vmem>>, vector<256x128xf32>,
    %c2_104 = arith.constant 2 : index
    %c2_105 = arith.constant 2 : index
    %c0_106 = arith.constant 0 : index
    %82 = vector.load %arg7[%c2_104, %c2_105, %c0_106] : memref<18x18x128xbf16, #tpu.memory_space<vmem>>, vector<16x16x128xbf16>
    %83 = vector.shape_cast %82 : vector<16x16x128xbf16> to vector<256x128xbf16>
    %c8 = arith.constant 8 : index
    %c0_107 = arith.constant 0 : index
    %c0_108 = arith.constant 0 : index
    %84 = vector.load %arg4[%c8, %c0_107, %c0_108] : memref<9x128x128xbf16, #tpu.memory_space<vmem>>, vector<1x128x128xbf16>
    %85 = vector.shape_cast %84 : vector<1x128x128xbf16> to vector<128x128xbf16>
    %cst_109 = arith.constant dense<0.000000e+00> : vector<256x128xf32>
    %86 = tpu.matmul %83, %85, %cst_109 {dimension_numbers = #tpu.dot_dimension_numbers<[1], [0], [0], [1], [0, 0, 1, 1], [], []>} : vector<256x128xbf16>, vector<128x128xbf16>, vector<256x128xf32> -> vector<256x128xf32>
    %c0_110 = arith.constant 0 : index
    %c0_111 = arith.constant 0 : index
    %87 = vector.load %arg9[%c0_110, %c0_111] : memref<256x128xf32, #tpu.memory_space<vmem>>, vector<256x128xf32>
    %88 = arith.addf %87, %86 : vector<256x128xf32>
    %c0_112 = arith.constant 0 : index
    %c0_113 = arith.constant 0 : index
    %89 = vector.load %arg9[%c0_112, %c0_113] : memref<256x128xf32, #tpu.memory_space<vmem>>, vector<256x128xf32>
    tpu.vector_store %arg9[%c0_112, %c0_113], %88 {strides = array<i32>} : memref<256x128xf32, #tpu.memory_space<vmem>>, vector<256x128xf32>,
    %c0_114 = arith.constant 0 : index
    %c0_115 = arith.constant 0 : index
    %90 = vector.load %arg9[%c0_114, %c0_115] : memref<256x128xf32, #tpu.memory_space<vmem>>, vector<256x128xf32>
    %c0_116 = arith.constant 0 : index
    %c0_117 = arith.constant 0 : index
    %91 = vector.load %arg5[%c0_116, %c0_117] : memref<1x128xf32, #tpu.memory_space<vmem>>, vector<1x128xf32>
    %92 = vector.broadcast %91 : vector<1x128xf32> to vector<256x128xf32>
    %93 = arith.addf %90, %92 : vector<256x128xf32>
    %cst_118 = arith.constant 0.00999999977 : f32
    %94 = vector.broadcast %cst_118 : f32 to vector<256x128xf32>
    %95 = arith.mulf %94, %93 : vector<256x128xf32>
    %96 = arith.maximumf %93, %95 : vector<256x128xf32>
    %c0_119 = arith.constant 0 : index
    %c0_120 = arith.constant 0 : index
    %97 = vector.load %arg8[%c0_119, %c0_120] : memref<256x128xf32, #tpu.memory_space<vmem>>, vector<256x128xf32>
    %98 = arith.addf %96, %97 : vector<256x128xf32>
    %99 = vector.extract_strided_slice %98 {offsets = [0, 0], sizes = [256, 8], strides = [1, 1]} : vector<256x128xf32> to vector<256x8xf32>
    %100 = vector.shape_cast %99 : vector<256x8xf32> to vector<1x256x8xf32>
    %c0_121 = arith.constant 0 : index
    %c0_122 = arith.constant 0 : index
    %c0_123 = arith.constant 0 : index
    %101 = vector.load %arg6[%c0_121, %c0_122, %c0_123] : memref<1x256x8xf32, #tpu.memory_space<vmem>>, vector<1x256x8xf32>
    tpu.vector_store %arg6[%c0_121, %c0_122, %c0_123], %100 {strides = array<i32>} : memref<1x256x8xf32, #tpu.memory_space<vmem>>, vector<1x256x8xf32>,
    return
  }
  func.func @transform_0(%arg0: i32) -> (i32, i32, i32) {
    %c0_i32 = arith.constant 0 : i32
    %c0_i32_0 = arith.constant 0 : i32
    %c0_i32_1 = arith.constant 0 : i32
    return %arg0, %c0_i32, %c0_i32_0 : i32, i32, i32
  }
  func.func @transform_1(%arg0: i32) -> (i32, i32) {
    %c0_i32 = arith.constant 0 : i32
    %c0_i32_0 = arith.constant 0 : i32
    %c0_i32_1 = arith.constant 0 : i32
    return %c0_i32, %c0_i32_0 : i32, i32
  }
  func.func @transform_2(%arg0: i32) -> (i32, i32) {
    %c0_i32 = arith.constant 0 : i32
    %c0_i32_0 = arith.constant 0 : i32
    %c0_i32_1 = arith.constant 0 : i32
    return %c0_i32, %c0_i32_0 : i32, i32
  }
  func.func @transform_3(%arg0: i32) -> (i32, i32, i32) {
    %c0_i32 = arith.constant 0 : i32
    %c0_i32_0 = arith.constant 0 : i32
    %c0_i32_1 = arith.constant 0 : i32
    %c0_i32_2 = arith.constant 0 : i32
    return %c0_i32, %c0_i32_0, %c0_i32_1 : i32, i32, i32
  }
  func.func @transform_4(%arg0: i32) -> (i32, i32) {
    %c0_i32 = arith.constant 0 : i32
    %c0_i32_0 = arith.constant 0 : i32
    %c0_i32_1 = arith.constant 0 : i32
    return %c0_i32, %c0_i32_0 : i32, i32
  }
  func.func @transform_5(%arg0: i32) -> (i32, i32, i32) {
    %c0_i32 = arith.constant 0 : i32
    %c0_i32_0 = arith.constant 0 : i32
    %c0_i32_1 = arith.constant 0 : i32
    return %arg0, %c0_i32, %c0_i32_0 : i32, i32, i32
  }
}

</mosaic_0001>

<bundles_post_ra>
// kernel: start_conv_forward.1
= control target key start
LH: loop header
LB: loop body
LE: loop exit
PB: predicated region body
PF: predicated region fallthrough
CT: control target
= control target key end

     0   :  { %10 = vsyncpa [#allocation6], 0  ;;  %s10684_s0 = inlined_call_operand.hbm [shape: bf16[2,256,36], index: 0, kind: input, shape index: {}]   ;;  %s10685_s1 = inlined_call_operand.hbm [shape: bf16[36,128], index: 1, kind: input, shape index: {}]   ;;  %s10686_s2 = inlined_call_operand.hbm [shape: f32[1,128], index: 2, kind: input, shape index: {}]   ;;  %s10687_s3 = inlined_call_operand.hbm [shape: bf16[9,128,128], index: 3, kind: input, shape index: {}]   ;;  %s10688_s4 = inlined_call_operand.hbm [shape: f32[1,128], index: 4, kind: input, shape index: {}]   ;;  %s10689_s5 = inlined_call_operand.hbm [shape: f32[2,256,8], index: 5, kind: output, shape index: {}]  }
   0x1   :  { %12 = vsyncpa [#allocation6 + $0x1], 0 }
   0x2   :  { %13 = vsyncpa [#allocation9], 0 }
   0x3   :  { %14 = vsyncpa [#allocation12], 0 }
   0x4   :  { %15 = vsyncpa [#allocation7], 0 }
   0x5   :  { %17 = vsyncpa [#allocation7 + $0x1], 0  ;;  %s9152_s18 = smov 0   ;;  %s9154_s19 = smov 0  }
   0x6   :  { %s9156_s20 = smov 0   ;;  %s9158_s21 = smov 0  }
   0x7 LB: > { %s9173_s22 = sadd.s32 4294967295, %s9109_s21   ;;  %s7285_s23 = sadd.s32 4294967294, %s9109_s21   ;;  %s9109_s21 = sphi %s9158_s21, %s10776_s21   ;;  %s9105_s20 = sphi %s9156_s20, %s10775_s20   ;;  %s9101_s19 = sphi %s9154_s19, %s10774_s19   ;;  %s9097_s18 = sphi %s9152_s18, %s10773_s18  }
   0x8   : > { %p43_p0 = scmp.ne.s32.totalorder %s9101_s19, %s9097_s18  ;;  %p10690_p1 = scmp.eq.s32.totalorder %s9173_s22, 0 }
   0x9   : > { %p157_p3 = scmp.eq.s32.totalorder %s7285_s23, 1  ;;  %p7286_p5 = scmp.ge.s32.totalorder %s9109_s21, 1 }
   0xa   : > { %p9182_p4 = por %p10690_p1, %p43_p0  ;;  %p164_p7 = scmp.lt.s32.totalorder %s9109_s21, 3 }
   0xb   : > { %p9187_p6 = por %p157_p3, %p43_p0  ;;  %s9111_s27 = smov [#allocation8]  }
   0xc   : > { %s10708_s24 = scalar_select %p9182_p4, 1, 0 }
   0xd   : > { %s10709_s25 = scalar_select %p9187_p6, 1, 0 }
   0xe   : > { %p9192_p8 = pnand %p7286_p5, %p164_p7  ;;  %s176_s28 = sshll.u32 %s9111_s27, 4  ;;  %s9196_s28 = int_to_ptr.vmem [resolvable:$true] %s176_s28 }
   0xf   : > { %s9112_s30 = smov [#allocation11]   ;;  %s9113_s7 = smov [#allocation10]  }
  0x10   : > { %s10710_s26 = scalar_select %p9192_p8, 1, 0 }
  0x11   : > { %p8672_p9 = pneg %p9192_p8  ;;  %s200_s6 = sshll.u32 %s9112_s30, 4  ;;  %s9207_s6 = int_to_ptr.vmem [resolvable:$true] %s200_s6 }
  0x12   : > { %s9209_s8 = sshll.u32 %s9113_s7, 4  ;;  %s8893_s11 = scalar_lea.hbm %s10685_s1, 320  ;;  %s191_s8 = int_to_ptr.vmem [resolvable:$true] %s9209_s8 }
  0x13   : > { %p9203_p11 = pnand %p8672_p9, %p10690_p1  ;;  %p8894_p12 = scmp.ne.s32.totalorder %s10685_s1, %s8893_s11 }
  0x14   : > { %p8900_p5 = scmp.lt.u32.totalorder %s8893_s11, %s10685_s1 }
  0x15   : > { %p9219_p13 = pneg %p9203_p11 }
  0x17   : > { %p8896_p0 = pnand %p9219_p13, %p8894_p12 }
  0x19   : > { %p8897_p3 = pneg %p8896_p0 }
  0x1b   : > { %p8902_p7 = pnand %p8900_p5, %p8897_p3 }
  0x1d   : > { %8905 = shalt.err (!%p8902_p7)
}
  0x1e   : > { %s8906_s17 = scalar_lea.vmem %s9196_s28, 320  ;;  %p8914_p2 = scmp.lt.s32.totalorder %s9196_s28, %s9196_s28 }
  0x1f   : > { %p8907_p9 = scmp.ne.s32.totalorder %s9196_s28, %s8906_s17  ;;  %p8915_p6 = scmp.lt.s32.totalorder %s8906_s17, %s8906_s17 }
  0x21   : > { %p8909_p10 = pnand %p8907_p9, %p9219_p13  ;;  %p8916_p12 = por %p8915_p6, %p8914_p2 }
  0x23   : > { %p8910_p1 = pneg %p8909_p10 }
  0x25   : > { %p8917_p0 = pnand %p8916_p12, %p8910_p1 }
  0x27   : > { %8920 = shalt.err (!%p8917_p0)
}
  0x28   : > { %s9114_s23 = smov 64   ;;  %s9115_s27 = smov 4  }
  0x29   : > { %8675 = dma.hbm_to_vmem [thread:$0]  (!%p9203_p11), %s10685_s1, 320, %s9196_s28, [#allocation9], %s9114_s23, %s9114_s23, %s9115_s27  }
  0x2a   : > { %s8921_s11 = scalar_lea.hbm %s10687_s3, 9216 }
  0x2b   : > { %p8922_p1 = scmp.ne.s32.totalorder %s10687_s3, %s8921_s11  ;;  %p8928_p10 = scmp.lt.u32.totalorder %s8921_s11, %s10687_s3 }
  0x2d   : > { %p8924_p2 = pnand %p8922_p1, %p9219_p13 }
  0x2f   : > { %p8925_p6 = pneg %p8924_p2 }
  0x31   : > { %p8930_p3 = pnand %p8928_p10, %p8925_p6 }
  0x33   : > { %8933 = shalt.err (!%p8930_p3)
}
  0x34   : > { %s8934_s28 = scalar_lea.vmem %s9207_s6, 9216  ;;  %p8942_p12 = scmp.lt.s32.totalorder %s9207_s6, %s9207_s6 }
  0x35   : > { %p8935_p5 = scmp.ne.s32.totalorder %s9207_s6, %s8934_s28  ;;  %p8943_p0 = scmp.lt.s32.totalorder %s8934_s28, %s8934_s28 }
  0x37   : > { %p8937_p7 = pnand %p8935_p5, %p9219_p13  ;;  %p8944_p1 = por %p8943_p0, %p8942_p12 }
  0x39   : > { %p8938_p9 = pneg %p8937_p7 }
  0x3b   : > { %p8945_p2 = pnand %p8944_p1, %p8938_p9 }
  0x3d   : > { %8948 = shalt.err (!%p8945_p2)
}
  0x3e   : > { %8681 = dma.hbm_to_vmem [thread:$0]  (!%p9203_p11), %s10687_s3, 9216, %s9207_s6, [#allocation12], %s9114_s23, %s9114_s23, %s9115_s27  }
  0x3f   : > { %s8949_s10 = scalar_lea.hbm %s10686_s2, 16 }
  0x40   : > { %p8950_p6 = scmp.ne.s32.totalorder %s10686_s2, %s8949_s10  ;;  %p8956_p5 = scmp.lt.u32.totalorder %s8949_s10, %s10686_s2 }
  0x42   : > { %p8952_p10 = pnand %p8950_p6, %p9219_p13 }
  0x44   : > { %p8953_p3 = pneg %p8952_p10 }
  0x46   : > { %p8958_p7 = pnand %p8956_p5, %p8953_p3 }
  0x48   : > { %8961 = shalt.err (!%p8958_p7)
}
  0x49   : > { %s8962_s16 = scalar_lea.vmem %s191_s8, 16  ;;  %s8969_s6 = scalar_lea.vmem %s191_s8, 32 }
  0x4a   : > { %p8963_p9 = scmp.ne.s32.totalorder %s191_s8, %s8962_s16  ;;  %p8970_p1 = scmp.lt.s32.totalorder %s191_s8, %s191_s8 }
  0x4b   : > { %p8971_p2 = scmp.lt.s32.totalorder %s8969_s6, %s8962_s16 }
  0x4c   : > { %p8965_p12 = pnand %p8963_p9, %p9219_p13 }
  0x4d   : > { %p8972_p4 = por %p8971_p2, %p8970_p1 }
  0x4e   : > { %p8966_p0 = pneg %p8965_p12 }
  0x50   : > { %p8973_p8 = pnand %p8972_p4, %p8966_p0 }
  0x52   : > { %8976 = shalt.err (!%p8973_p8)
}
  0x53   : > { %8678 = dma.hbm_to_vmem [thread:$0]  (!%p9203_p11), %s10686_s2, 16, %s191_s8, [#allocation9]  }
  0x54   : > { %s9116_s30 = smov [#allocation13]   ;;  %s8977_s11 = scalar_lea.hbm %s10688_s4, 16 }
  0x55   : > { %s214_s7 = sshll.u32 %s9116_s30, 4  ;;  %p8978_p6 = scmp.ne.s32.totalorder %s10688_s4, %s8977_s11  ;;  %s215_s7 = int_to_ptr.vmem [resolvable:$true] %s214_s7 }
  0x56   : > { %p8984_p10 = scmp.lt.u32.totalorder %s8977_s11, %s10688_s4 }
  0x57   : > { %p8980_p4 = pnand %p8978_p6, %p9219_p13 }
  0x59   : > { %p8981_p8 = pneg %p8980_p4 }
  0x5b   : > { %p8986_p3 = pnand %p8984_p10, %p8981_p8 }
  0x5d   : > { %8989 = shalt.err (!%p8986_p3)
}
  0x5e   : > { %s8990_s8 = scalar_lea.vmem %s215_s7, 16  ;;  %s8997_s6 = scalar_lea.vmem %s215_s7, 32 }
  0x5f   : > { %p8991_p5 = scmp.ne.s32.totalorder %s215_s7, %s8990_s8  ;;  %p8998_p12 = scmp.lt.s32.totalorder %s215_s7, %s215_s7 }
  0x60   : > { %p8999_p0 = scmp.lt.s32.totalorder %s8997_s6, %s8990_s8 }
  0x61   : > { %p8993_p7 = pnand %p8991_p5, %p9219_p13 }
  0x62   : > { %p9000_p1 = por %p8999_p0, %p8998_p12 }
  0x63   : > { %p8994_p9 = pneg %p8993_p7 }
  0x65   : > { %p9001_p2 = pnand %p9000_p1, %p8994_p9 }
  0x67   : > { %9004 = shalt.err (!%p9001_p2)
}
  0x68   : > { %8684 = dma.hbm_to_vmem [thread:$0]  (!%p9203_p11), %s10688_s4, 16, %s215_s7, [#allocation12]  }
  0x69   : > { %s9307_s14 = sadd.s32 1, %s9109_s21   ;;  %s30_s30 = sadd.s32 1, %s9105_s20 }
  0x6a   : > { %s27_s29 = ssub.s32 %s9109_s21, %s9307_s14  ;;  %p37_p13 = scmp.ne.s32.totalorder %s9105_s20, %s9101_s19 }
  0x6b   : > { %p28_p6 = scmp.eq.s32.totalorder %s27_s29, 0  ;;  %p38_p4 = scmp.eq.s32.totalorder %s9109_s21, 0 }
  0x6c   : > { %p10713_p8 = scmp.eq.s32.totalorder %s9173_s22, 1  ;;  %p8697_p3 = scmp.lt.s32.totalorder %s9109_s21, 2 }
  0x6d   : > { %s9323_s10 = scalar_select %p28_p6, %s9105_s20, %s30_s30  }
  0x6e   : > { %p9317_p10 = por %p10713_p8, %p37_p13  ;;  %p39_p5 = por %p38_p4, %p37_p13 }
  0x6f   : > { %s225_s11 = sand.u32 1, %s9105_s20   ;;  %s7640_s7 = sshll.u32 %s9109_s21, 11 }
  0x70   : > { %s7292_s12 = sshll.u32 %s225_s11, 7  ;;  %s9330_s16 = scalar_lea.hbm %s10684_s0, %s7640_s7 }
  0x71   : > { %s229_s8 = scalar_lea.vmem [#allocation5], %s7292_s12  ;;  %p9334_p11 = pnand %p8697_p3, %p39_p5 }
  0x72   : > { %s236_s6 = sshll.u32 %s229_s8, 4  ;;  %s9338_s17 = scalar_lea.sflag [#allocation6], %s225_s11  ;;  %s9332_s6 = int_to_ptr.vmem [resolvable:$true] %s236_s6 }
  0x73   : > { %s9005_s30 = scalar_lea.hbm %s9330_s16, 2048  ;;  %p9007_p9 = pneg %p9334_p11 }
  0x74   : > { %p9006_p7 = scmp.ne.s32.totalorder %s9330_s16, %s9005_s30  ;;  %s9010_s7 = scalar_lea.hbm %s10684_s0, 4096 }
  0x75   : > { %p9011_p1 = scmp.lt.u32.totalorder %s9330_s16, %s10684_s0  ;;  %p9012_p2 = scmp.lt.u32.totalorder %s9010_s7, %s9005_s30 }
  0x76   : > { %p9008_p12 = pnand %p9007_p9, %p9006_p7  ;;  %p9014_p6 = scmp.lt.u32.totalorder %s9005_s30, %s9330_s16 }
  0x77   : > { %p9013_p13 = por %p9012_p2, %p9011_p1 }
  0x78   : > { %p9009_p0 = pneg %p9008_p12 }
  0x79   : > { %p9015_p4 = por %p9014_p6, %p9013_p13 }
  0x7b   : > { %p9016_p8 = pnand %p9015_p4, %p9009_p0 }
  0x7d   : > { %9019 = shalt.err (!%p9016_p8)
}
  0x7e   : > { %s9020_s11 = scalar_lea.vmem %s9332_s6, 2048  ;;  %s9117_s8 = smov [#allocation5]  }
  0x7f   : > { %p9021_p3 = scmp.ne.s32.totalorder %s9332_s6, %s9020_s11  ;;  %s9025_s29 = sshll.u32 %s9117_s8, 4  ;;  %s9026_s29 = int_to_ptr.vmem [resolvable:$false] %s9025_s29 }
  0x80   : > { %s9027_s12 = scalar_lea.vmem %s9026_s29, 4096  ;;  %p9028_p12 = scmp.lt.s32.totalorder %s9332_s6, %s9026_s29 }
  0x81   : > { %p9023_p5 = pnand %p9021_p3, %p9007_p9  ;;  %p9029_p1 = scmp.lt.s32.totalorder %s9027_s12, %s9020_s11 }
  0x83   : > { %p9024_p7 = pneg %p9023_p5  ;;  %p9030_p2 = por %p9029_p1, %p9028_p12 }
  0x85   : > { %p9031_p13 = pnand %p9030_p2, %p9024_p7 }
  0x87   : > { %9034 = shalt.err (!%p9031_p13)
}
  0x88   : > { %8688 = dma.hbm_to_vmem [thread:$0]  (!%p9334_p11), %s9330_s16, 2048, %s9332_s6, %s9338_s17, %s9114_s23, %s9114_s23, %s9115_s27  }
  0x89   : > { %p10716_p9 = scmp.ne.s32.totalorder %s10710_s26, 0 }
  0x8b   : > { %248 = sbr.rel (%p10716_p9) target bundleno = 1069 (0x42d), region = 40 }
  0x92   : > { %s9372_s30 = sand.u32 1, %s9101_s19   ;;  %p10717_p0 = scmp.ne.s32.totalorder %s10708_s24, 0 }
  0x93   : > { %s7296_s7 = sshll.u32 %s9372_s30, 7  ;;  %s251_s13 = scalar_lea.sflag [#allocation6], %s9372_s30 }
  0x94   : > { %s9376_s15 = scalar_lea.vmem [#allocation5], %s7296_s7 }
  0x95   : > { %9080 = dma.done.wait (%p10717_p0), %s251_s13, 2048  }
  0x96   : > { %9082 = vsyncadd (%p10717_p0), %s251_s13, 4294965248  ;;  %p10718_p11 = scmp.eq.s32.totalorder %s9173_s22, 0 }
  0x98   : > { %9084 = dma.done.wait (%p10718_p11), [#allocation9], 336   ;;  %p10719_p6 = pmov %p10718_p11 }
  0x9a   : > { %9086 = vsyncadd (%p10719_p6), [#allocation9], 4294966960  ;;  %p10720_p4 = pmov %p10719_p6 }
  0x9c   : > { %9088 = dma.done.wait (%p10720_p4), [#allocation12], 9232   ;;  %p10721_p8 = pmov %p10720_p4 }
  0x9d   : > { %v8744_v0 = vld [vmem:[#allocation8] sm:$0xff]   ;;  %v8745_v1 = vld [vmem:[#allocation8 + $0x8] sm:$0xff]   ;;  %vm557_vm0 = vcmask 293888   ;;  %v8746_v2 = vld [vmem:[#allocation8 + $0x10] ss:$0 sps:$4 sm:$0x33]  }
  0x9e   : > { %9090 = vsyncadd (%p10721_p8), [#allocation12], 4294958064  ;;  %7909 = vmatprep.subr.bf16.mxu0 %v8744_v0  ;;  %v8747_v3 = vld [vmem:[%s9376_s15] sm:$0xff]   ;;  %vm606_vm1 = vcmask 1041408   ;;  %v8748_v5 = vld [vmem:[%s9376_s15 + $0x8] sm:$0xff]   ;;  %vm305_vm2 = vcmask 1040384  }
  0x9f   : > { %7910 = vmatpush3.bf16.msra.mxu0 %v8744_v0  ;;  %7915 = vmatprep.mubr.msk.bf16.mxu0 %vm557_vm0, %v8747_v3  ;;  %v608_v4 = vsel %vm606_vm1, %v8746_v2, 0  ;;  %v8749_v6 = vld [vmem:[%s9376_s15 + $0x10] sm:$0xff]   ;;  %vm306_vm3 = vsmask.f32 256  ;;  %v8750_v8 = vld [vmem:[%s9376_s15 + $0x18] sm:$0xff]   ;;  %v8751_v9 = vld [vmem:[%s9376_s15 + $0x20] sm:$0xff]  }
  0xa0   : > { %7911 = vmatprep.subr.bf16.mxu0 %v8745_v1  ;;  %vm9398_vm4 = vmand %vm305_vm2, %vm306_vm3  ;;  %v8763_v10 = vld [vmem:[#allocation11] sm:$0xff]   ;;  %v314_v11 = vld [vmem:[#allocation2 + $0x18] sm:$0x1]  ;;  %vm362_vm5 = vsmask.f32 7938  ;;  %v9118_v41 = vmov 0  }
  0xa1   : > { %v315_v12 = vsel %vm9398_vm4, 0, %v314_v11  ;;  %v8752_v13 = vld [vmem:[%s9376_s15 + $0x28] sm:$0xff]   ;;  %v8753_v14 = vld [vmem:[%s9376_s15 + $0x30] sm:$0xff]   ;;  %v8754_v15 = vld [vmem:[%s9376_s15 + $0x38] sm:$0xff]   ;;  %298 = vst [vmem:[#allocation2] sm:$0xf] %v9118_v41 }
  0xa2   : > { %316 = vst [vmem:[#allocation2 + $0x18] sm:$0x1] %v315_v12  ;;  %v8755_v16 = vld [vmem:[%s9376_s15 + $0x40] sm:$0xff]   ;;  %v8756_v17 = vld [vmem:[%s9376_s15 + $0x48] sm:$0xff]   ;;  %v8757_v18 = vld [vmem:[%s9376_s15 + $0x50] sm:$0xff]   ;;  %vm1286_vm7 = vcmask 1043456  }
  0xa3   : > { %7912 = vmatpush3.bf16.msra.mxu0 %v8745_v1  ;;  %v8758_v19 = vld [vmem:[%s9376_s15 + $0x58] sm:$0xff]   ;;  %v8759_v20 = vld [vmem:[%s9376_s15 + $0x60] sm:$0xff]   ;;  %v8760_v21 = vld [vmem:[%s9376_s15 + $0x68] sm:$0xff]   ;;  %299 = vst [vmem:[#allocation2 + $0x4] sm:$0xf] %v9118_v41  ;;  %vm2702_vm14 = vcmask 1042432  }
  0xa4   : > { %8651 = vmatprep.subr.msk.bf16.mxu0 %vm606_vm1, %v8746_v2  ;;  %v8761_v22 = vld [vmem:[%s9376_s15 + $0x70] sm:$0xff]   ;;  %v8762_v23 = vld [vmem:[%s9376_s15 + $0x78] sm:$0xff]   ;;  %v8765_v25 = vld [vmem:[#allocation11 + $0x10] sm:$0xff]   ;;  %300 = vst [vmem:[#allocation2 + $0x8] sm:$0x1] %v9118_v41  ;;  %vm2703_vm15 = vcmask 1046532  }
  0xa5   : > { %v8764_v24 = vld [vmem:[#allocation11 + $0x8] sm:$0xff]   ;;  %vm9432_vm6 = vmand %vm305_vm2, %vm362_vm5  ;;  %v311_v27 = vld [vmem:[#allocation2 + $0xc] sm:$0x1]  ;;  %302 = vst [vmem:[#allocation2 + $0xcc] sm:$0xf] %v9118_v41  ;;  %s7301_s24 = sshll.u32 %s9372_s30, 8 }
  0xa6   : > { %v8766_v28 = vld [vmem:[#allocation11 + $0x18] sm:$0xff]   ;;  %v312_v29 = vsel %vm9398_vm4, 0, %v311_v27  ;;  %v370_v30 = vld [vmem:[#allocation2 + $0x20] sm:$0x1]  ;;  %v367_v32 = vld [vmem:[#allocation2 + $0x14] sm:$0x1] }
  0xa7   : > { %7914 = vmatpush3.bf16.msra.mxu0 %v608_v4  ;;  %313 = vst [vmem:[#allocation2 + $0xc] sm:$0x1] %v312_v29  ;;  %v371_v31 = vsel %vm9432_vm6, 0, %v370_v30  ;;  %v368_v33 = vsel %vm9432_vm6, 0, %v367_v32  ;;  %v320_v34 = vld [vmem:[#allocation2 + $0x30] sm:$0x1]  ;;  %vm9529_vm9 = vmand %vm1286_vm7, %vm362_vm5 }
  0xa8   : > { %7947 = vmatprep.subr.bf16.mxu0 %v8763_v10  ;;  %372 = vst [vmem:[#allocation2 + $0x20] sm:$0x1] %v371_v31  ;;  %369 = vst [vmem:[#allocation2 + $0x14] sm:$0x1] %v368_v33  ;;  %v321_v35 = vsel %vm9398_vm4, 0, %v320_v34  ;;  %v8767_v40 = vld [vmem:[#allocation11 + $0x20] sm:$0xff]  }
  0xa9   : > { %v317_v36 = vld [vmem:[#allocation2 + $0x24] sm:$0x1]  ;;  %322 = vst [vmem:[#allocation2 + $0x30] sm:$0x1] %v321_v35  ;;  %v376_v38 = vld [vmem:[#allocation2 + $0x38] sm:$0x1] }
  0xaa   : > { %7916 = vmatmul.mubr.msk.bf16.vlgmr.msra.gmra.mrb[0].mxu0 %vm557_vm0, %v8748_v5  ;;  %v318_v37 = vsel %vm9398_vm4, 0, %v317_v36  ;;  %v377_v39 = vsel %vm9432_vm6, 0, %v376_v38  ;;  %303 = vst [vmem:[#allocation2 + $0xd0] sm:$0xf] %v9118_v41  ;;  %304 = vst [vmem:[#allocation2 + $0xd4] sm:$0x1] %v9118_v41 }
  0xab   : > { %7919 = vmatprep.mubr.msk.bf16.mxu0 %vm557_vm0, %v8749_v6  ;;  %7948 = vmatpush3.bf16.msra.mxu0 %v8763_v10  ;;  %319 = vst [vmem:[#allocation2 + $0x24] sm:$0x1] %v318_v37  ;;  %378 = vst [vmem:[#allocation2 + $0x38] sm:$0x1] %v377_v39  ;;  %v8768_v42 = vld [vmem:[#allocation11 + $0x100] sm:$0xff]   ;;  %v8769_v43 = vld [vmem:[#allocation11 + $0x28] sm:$0xff]  }
  0xac   : > { %7949 = vmatprep.subr.bf16.mxu0 %v8764_v24  ;;  %8379 = vmatprep.subr.bf16.mxu1 %v8768_v42  ;;  %v373_v44 = vld [vmem:[#allocation2 + $0x2c] sm:$0x1]  ;;  %v8770_v46 = vld [vmem:[#allocation11 + $0x108] sm:$0xff]   ;;  %v8771_v47 = vld [vmem:[#allocation11 + $0x30] sm:$0xff]   ;;  %vm963_vm8 = vsmask.f32 4368 }
  0xad   : > { %8387 = vmatpush3.bf16.msra.mxu1 %v8768_v42  ;;  %v374_v45 = vsel %vm9432_vm6, 0, %v373_v44  ;;  %v308_v48 = vld [vmem:[#allocation2] sm:$0x1]  ;;  %v326_v50 = vld [vmem:[#allocation2 + $0x48] sm:$0x1]  ;;  %v8778_v3 = vld [vmem:[#allocation11 + $0x120] sm:$0xff]  }
  0xae   : > { %375 = vst [vmem:[#allocation2 + $0x2c] sm:$0x1] %v374_v45  ;;  %8380 = vmatprep.subr.bf16.mxu1 %v8770_v46  ;;  %v309_v49 = vsel %vm9398_vm4, 0, %v308_v48  ;;  %v8772_v51 = vld [vmem:[#allocation11 + $0x110] sm:$0xff]   ;;  %v327_v52 = vsel %vm9398_vm4, 0, %v326_v50  ;;  %v8773_v54 = vld [vmem:[#allocation11 + $0x38] sm:$0xff]   ;;  %vm9537_vm10 = vmor %vm306_vm3, %vm963_vm8 }
  0xaf   : > { %7950 = vmatpush3.bf16.msra.mxu0 %v8764_v24  ;;  %310 = vst [vmem:[#allocation2] sm:$0x1] %v309_v49  ;;  %v323_v53 = vld [vmem:[#allocation2 + $0x3c] sm:$0x1]  ;;  %328 = vst [vmem:[#allocation2 + $0x48] sm:$0x1] %v327_v52 }
  0xb0   : > { %7951 = vmatprep.subr.bf16.mxu0 %v8765_v25  ;;  %v324_v55 = vsel %vm9398_vm4, 0, %v323_v53  ;;  %v382_v56 = vld [vmem:[#allocation2 + $0x50] sm:$0x1]  ;;  %v379_v58 = vld [vmem:[#allocation2 + $0x44] sm:$0x1]  ;;  %v8774_v60 = vld [vmem:[#allocation11 + $0x118] sm:$0xff]  }
  0xb1   : > { %8388 = vmatpush3.bf16.msra.mxu1 %v8770_v46  ;;  %325 = vst [vmem:[#allocation2 + $0x3c] sm:$0x1] %v324_v55  ;;  %v383_v57 = vsel %vm9432_vm6, 0, %v382_v56  ;;  %v380_v59 = vsel %vm9432_vm6, 0, %v379_v58  ;;  %v332_v62 = vld [vmem:[#allocation2 + $0x60] sm:$0x1] }
  0xb2   : > { %7920 = vmatmul.mubr.msk.bf16.gmra.mrb[4].mxu0 %vm557_vm0, %v8750_v8  ;;  %8381 = vmatprep.subr.bf16.mxu1 %v8772_v51  ;;  %384 = vst [vmem:[#allocation2 + $0x50] sm:$0x1] %v383_v57  ;;  %381 = vst [vmem:[#allocation2 + $0x44] sm:$0x1] %v380_v59  ;;  %v333_v63 = vsel %vm9398_vm4, 0, %v332_v62  ;;  %v8779_v8 = vld [vmem:[#allocation11 + $0x128] sm:$0xff]  }
  0xb3   : > { %7923 = vmatprep.mubr.msk.bf16.mxu0 %vm557_vm0, %v8751_v9  ;;  %7952 = vmatpush3.bf16.msra.mxu0 %v8765_v25  ;;  %v329_v0 = vld [vmem:[#allocation2 + $0x54] sm:$0x1]  ;;  %334 = vst [vmem:[#allocation2 + $0x60] sm:$0x1] %v333_v63  ;;  %v388_v2 = vld [vmem:[#allocation2 + $0x68] sm:$0x1] }
  0xb4   : > { %7953 = vmatprep.subr.bf16.mxu0 %v8766_v28  ;;  %v330_v1 = vsel %vm9398_vm4, 0, %v329_v0  ;;  %v389_v4 = vsel %vm9432_vm6, 0, %v388_v2  ;;  %v385_v5 = vld [vmem:[#allocation2 + $0x5c] sm:$0x1]  ;;  %v338_v9 = vld [vmem:[#allocation2 + $0x78] sm:$0x1] }
  0xb5   : > { %8389 = vmatpush3.bf16.msra.mxu1 %v8772_v51  ;;  %331 = vst [vmem:[#allocation2 + $0x54] sm:$0x1] %v330_v1  ;;  %390 = vst [vmem:[#allocation2 + $0x68] sm:$0x1] %v389_v4  ;;  %v386_v6 = vsel %vm9432_vm6, 0, %v385_v5  ;;  %v339_v10 = vsel %vm9398_vm4, 0, %v338_v9 }
  0xb6   : > { %v8775_v61 = vld [vmem:[#allocation2] sm:$0xff]   ;;  %8382 = vmatprep.subr.bf16.mxu1 %v8774_v60  ;;  %387 = vst [vmem:[#allocation2 + $0x5c] sm:$0x1] %v386_v6  ;;  %v335_v11 = vld [vmem:[#allocation2 + $0x6c] sm:$0x1]  ;;  %v9498_v44 = vld [vmem:[#allocation11 + $0x40] sm:$0xff]  }
  0xb7   : > { %7954 = vmatpush3.bf16.msra.mxu0 %v8766_v28  ;;  %340 = vst [vmem:[#allocation2 + $0x78] sm:$0x1] %v339_v10  ;;  %v336_v12 = vsel %vm9398_vm4, 0, %v335_v11  ;;  %v397_v25 = vld [vmem:[#allocation2 + $0x8c] sm:$0x1]  ;;  %v8786_v28 = vld [vmem:[#allocation11 + $0x140] sm:$0xff]  }
  0xb8   : > { %7955 = vmatprep.subr.bf16.mxu0 %v8767_v40  ;;  %337 = vst [vmem:[#allocation2 + $0x6c] sm:$0x1] %v336_v12  ;;  %v398_v27 = vsel %vm9432_vm6, 0, %v397_v25  ;;  %v350_v29 = vld [vmem:[#allocation2 + $0xa8] sm:$0x1]  ;;  %vm7127_vm1 = vcmask 64512  }
  0xb9   : > { %8390 = vmatpush3.bf16.msra.mxu1 %v8774_v60  ;;  %399 = vst [vmem:[#allocation2 + $0x8c] sm:$0x1] %v398_v27  ;;  %v351_v30 = vsel %vm9398_vm4, 0, %v350_v29  ;;  %v347_v31 = vld [vmem:[#allocation2 + $0x9c] sm:$0x1]  ;;  %s10483_s26 = scalar_lea.vmem [#allocation14], %s7301_s24 }
  0xba   : > { %7924 = vmatmul.mubr.msk.bf16.gmra.mrb[8].mxu0 %vm557_vm0, %v8752_v13  ;;  %8383 = vmatprep.subr.bf16.mxu1 %v8778_v3  ;;  %v394_v13 = vld [vmem:[#allocation2 + $0x80] sm:$0x1]  ;;  %352 = vst [vmem:[#allocation2 + $0xa8] sm:$0x1] %v351_v30  ;;  %v348_v32 = vsel %vm9398_vm4, 0, %v347_v31  ;;  %s7673_s23 = sshll.u32 %s9173_s22, 12 }
  0xbb   : > { %7927 = vmatprep.mubr.msk.bf16.mxu0 %vm557_vm0, %v8753_v14  ;;  %7956 = vmatpush3.bf16.msra.mxu0 %v8767_v40  ;;  %v395_v14 = vsel %vm9432_vm6, 0, %v394_v13  ;;  %v406_v33 = vld [vmem:[#allocation2 + $0xb0] sm:$0x1]  ;;  %v403_v34 = vld [vmem:[#allocation2 + $0xa4] sm:$0x1]  ;;  %s7174_s27 = sshll.u32 %s10483_s26, 4  ;;  %s10631_s28 = scalar_lea.hbm %s10689_s5, %s7673_s23  ;;  %s10633_s27 = int_to_ptr.vmem [resolvable:$true] %s7174_s27 }
  0xbc   : > { %7957 = vmatprep.subr.bf16.mxu0 %v8769_v43  ;;  %396 = vst [vmem:[#allocation2 + $0x80] sm:$0x1] %v395_v14  ;;  %349 = vst [vmem:[#allocation2 + $0x9c] sm:$0x1] %v348_v32  ;;  %v407_v35 = vsel %vm9432_vm6, 0, %v406_v33  ;;  %v404_v36 = vsel %vm9432_vm6, 0, %v403_v34 }
  0xbd   : > { %8391 = vmatpush3.bf16.msra.mxu1 %v8778_v3  ;;  %408 = vst [vmem:[#allocation2 + $0xb0] sm:$0x1] %v407_v35  ;;  %405 = vst [vmem:[#allocation2 + $0xa4] sm:$0x1] %v404_v36  ;;  %v356_v37 = vld [vmem:[#allocation2 + $0xc0] sm:$0x1] }
  0xbe   : > { %8384 = vmatprep.subr.bf16.mxu1 %v8779_v8  ;;  %v357_v38 = vsel %vm9398_vm4, 0, %v356_v37  ;;  %v353_v39 = vld [vmem:[#allocation2 + $0xb4] sm:$0x1]  ;;  %v412_v41 = vld [vmem:[#allocation2 + $0xc8] sm:$0x1]  ;;  %s7161_s22 = scalar_lea.sflag [#allocation7], %s9372_s30 }
  0xbf   : > { %7958 = vmatpush3.bf16.msra.mxu0 %v8769_v43  ;;  %358 = vst [vmem:[#allocation2 + $0xc0] sm:$0x1] %v357_v38  ;;  %v354_v40 = vsel %vm9398_vm4, 0, %v353_v39  ;;  %v413_v42 = vsel %vm9432_vm6, 0, %v412_v41  ;;  %v409_v43 = vld [vmem:[#allocation2 + $0xbc] sm:$0x1] }
  0xc0   : > { %7959 = vmatprep.subr.bf16.mxu0 %v8771_v47  ;;  %355 = vst [vmem:[#allocation2 + $0xb4] sm:$0x1] %v354_v40  ;;  %414 = vst [vmem:[#allocation2 + $0xc8] sm:$0x1] %v413_v42  ;;  %v410_v45 = vsel %vm9432_vm6, 0, %v409_v43  ;;  %s9035_s17 = scalar_lea.vmem %s10633_s27, 4096 }
  0xc1   : > { %8392 = vmatpush3.bf16.msra.mxu1 %v8779_v8  ;;  %411 = vst [vmem:[#allocation2 + $0xbc] sm:$0x1] %v410_v45  ;;  %v9503_v46 = vld [vmem:[#allocation10] ss:$0 sm:$0xff]  ;;  %v1295_v8 = vld [vmem:[#allocation2 + $0x18] sm:$0xf]  ;;  %p9036_p3 = scmp.ne.s32.totalorder %s10633_s27, %s9035_s17 }
  0xc2   : > { %7928 = vmatmul.mubr.msk.bf16.gmra.mrb[12].mxu0 %vm557_vm0, %v8754_v15  ;;  %v8782_v15 = vld [vmem:[#allocation11 + $0x130] sm:$0xff]   ;;  %v1288_v27 = vld [vmem:[#allocation2 + $0xc] sm:$0xf]  ;;  %v1292_v39 = vld [vmem:[#allocation2 + $0x14] sm:$0x1]  ;;  %s9119_s11 = smov [#allocation14]  }
  0xc3   : > { %7931 = vmatprep.mubr.msk.bf16.mxu0 %vm557_vm0, %v8755_v16  ;;  %7960 = vmatpush3.bf16.msra.mxu0 %v8771_v47  ;;  %v391_v16 = vld [vmem:[#allocation2 + $0x74] sm:$0x1]  ;;  %v1299_v33 = vld [vmem:[#allocation2 + $0x20] sm:$0x1]  ;;  %vm1833_vm11 = vsmask.f32 3328  ;;  %p9037_p5 = pnand %p9036_p3, %p9317_p10 }
  0xc4   : > { %7961 = vmatprep.subr.bf16.mxu0 %v8773_v54  ;;  %8385 = vmatprep.subr.bf16.mxu1 %v8782_v15  ;;  %vm1834_vm12 = vsmask.f32 7440  ;;  %s9039_s8 = sshll.u32 %s9119_s11, 4  ;;  %s9040_s8 = int_to_ptr.vmem [resolvable:$false] %s9039_s8 }
  0xc5   : > { %8393 = vmatpush3.bf16.msra.mxu1 %v8782_v15  ;;  %vm9782_vm13 = vmor %vm1833_vm11, %vm1834_vm12  ;;  %p9038_p7 = pneg %p9037_p5  ;;  %s9041_s29 = scalar_lea.vmem %s9040_s8, 8192 }
  0xc6   : > { %p9042_p12 = scmp.lt.s32.totalorder %s10633_s27, %s9040_s8  ;;  %p9043_p1 = scmp.lt.s32.totalorder %s9041_s29, %s9035_s17 }
  0xc7   : > { %7962 = vmatpush3.bf16.msra.mxu0 %v8773_v54 }
  0xc8   : > { %7995 = vmatprep.subr.bf16.mxu0 %v9498_v44  ;;  %p9044_p2 = por %p9043_p1, %p9042_p12 }
  0xca   : > { %7932 = vmatmul.mubr.msk.bf16.gmra.mrb[16].mxu0 %vm557_vm0, %v8756_v17  ;;  %v392_v17 = vsel %vm9432_vm6, 0, %v391_v16  ;;  %p9045_p13 = pnand %p9044_p2, %p9038_p7 }
  0xcb   : > { %7935 = vmatprep.mubr.msk.bf16.mxu0 %vm557_vm0, %v8757_v18  ;;  %393 = vst [vmem:[#allocation2 + $0x74] sm:$0x1] %v392_v17  ;;  %v8783_v18 = vld [vmem:[#allocation11 + $0x138] sm:$0xff]  }
  0xcc   : > { %8386 = vmatprep.subr.bf16.mxu1 %v8783_v18 }
  0xcd   : > { %8394 = vmatpush3.bf16.msra.mxu1 %v8783_v18 }
  0xce   : > { %8187 = vmatprep.subr.bf16.mxu1 %v8786_v28 }
  0xd2   : > { %7936 = vmatmul.mubr.msk.bf16.gmra.mrb[20].mxu0 %vm557_vm0, %v8758_v19  ;;  %v344_v19 = vld [vmem:[#allocation2 + $0x90] sm:$0x1] }
  0xd3   : > { %7939 = vmatprep.mubr.msk.bf16.mxu0 %vm557_vm0, %v8759_v20  ;;  %v345_v20 = vsel %vm9398_vm4, 0, %v344_v19 }
  0xd4   : > { %346 = vst [vmem:[#allocation2 + $0x90] sm:$0x1] %v345_v20 }
  0xda   : > { %7940 = vmatmul.mubr.msk.bf16.gmra.mrb[24].mxu0 %vm557_vm0, %v8760_v21  ;;  %v341_v21 = vld [vmem:[#allocation2 + $0x84] sm:$0x1] }
  0xdb   : > { %7943 = vmatprep.mubr.msk.bf16.mxu0 %vm557_vm0, %v8761_v22  ;;  %v342_v22 = vsel %vm9398_vm4, 0, %v341_v21 }
  0xdc   : > { %343 = vst [vmem:[#allocation2 + $0x84] sm:$0x1] %v342_v22 }
  0xe2   : > { %7944 = vmatmul.mubr.msk.bf16.gmra.mrb[28].mxu0 %vm557_vm0, %v8762_v23  ;;  %v400_v23 = vld [vmem:[#allocation2 + $0x98] sm:$0x1]  ;;  %vm9932_vm0 = vmor %vm2702_vm14, %vm2703_vm15 }
  0xe3   : > { %7963 = vmatprep.mubr.bf16.mxu0 %v8775_v61  ;;  %v401_v24 = vsel %vm9432_vm6, 0, %v400_v23 }
  0xe4   : > { %402 = vst [vmem:[#allocation2 + $0x98] sm:$0x1] %v401_v24 }
 0x17d   : > { %v7917_v47 = vpop.f32.mrb[0].mxu0 }
 0x17e   : > { %v653_v48 = vadd.f32 %v7917_v47, %v9503_v46  ;;  %v644_v49 = vpop.f32.mrb[1].mxu0 }
 0x17f   : > { %v645_v50 = vadd.f32 %v9503_v46, %v644_v49  ;;  %v7918_v51 = vpop.f32.mrb[2].mxu0 }
 0x180   : > { %v773_v52 = vmul.f32 0.01, %v653_v48  ;;  %v656_v53 = vadd.f32 %v7918_v51, %v9503_v46  ;;  %v647_v54 = vpop.f32.mrb[3].mxu0 }
 0x181   : > { %v771_v55 = vmul.f32 0.01, %v645_v50  ;;  %v648_v56 = vadd.f32 %v9503_v46, %v647_v54 }
 0x182   : > { %v9509_v57 = vmax.f32 %v653_v48, %v773_v52  ;;  %v774_v58 = vmul.f32 0.01, %v656_v53 }
 0x183   : > { %v9511_v59 = vmax.f32 %v645_v50, %v771_v55  ;;  %v772_v60 = vmul.f32 0.01, %v648_v56 }
 0x184   : > { %v7643_v61 = vpack.c.bf16 %v9509_v57, %v9509_v57  ;;  %v9515_v62 = vmax.f32 %v656_v53, %v774_v58 }
 0x185   : > { %v7641_v63 = vpack.c.bf16 %v9511_v59, %v9511_v59  ;;  %v9519_v0 = vmax.f32 %v648_v56, %v772_v60  ;;  %v7921_v1 = vpop.f32.mrb[4].mxu0 }
 0x186   : > { %v983_v2 = vshrl.u32 %v7643_v61, 16  ;;  %v986_v3 = vshll.u32 %v7643_v61, 16  ;;  %v7644_v4 = vpack.c.bf16 %v9515_v62, %v9515_v62  ;;  %v669_v5 = vadd.f32 %v7921_v1, %v9503_v46  ;;  %v660_v6 = vpop.f32.mrb[5].mxu0 }
 0x187   : > { %v966_v9 = vshrl.u32 %v7641_v63, 16  ;;  %v969_v10 = vshll.u32 %v7641_v63, 16  ;;  %v7642_v11 = vpack.c.bf16 %v9519_v0, %v9519_v0  ;;  %v661_v12 = vadd.f32 %v9503_v46, %v660_v6  ;;  %v7922_v13 = vpop.f32.mrb[6].mxu0 }
 0x188   : > { %v985_v14 = vrot.slane %v983_v2, 7  ;;  %v991_v15 = vshrl.u32 %v7644_v4, 16  ;;  %v994_v16 = vshll.u32 %v7644_v4, 16  ;;  %v777_v17 = vmul.f32 0.01, %v669_v5  ;;  %v663_v18 = vpop.f32.mrb[7].mxu0 }
 0x189   : > { %v968_v20 = vrot.slane %v966_v9, 7  ;;  %v974_v21 = vshrl.u32 %v7642_v11, 16  ;;  %v977_v22 = vshll.u32 %v7642_v11, 16  ;;  %v775_v23 = vmul.f32 0.01, %v661_v12 }
 0x18a   : > { %v988_v24 = vor.u32 %v986_v3, %v985_v14  ;;  %v989_v25 = vrot.slane %v985_v14, 4  ;;  %v993_v28 = vrot.slane %v991_v15, 7  ;;  %v9533_v29 = vmax.f32 %v669_v5, %v777_v17  ;;  %v1309_v3 = vld [vmem:[#allocation2 + $0x30] sm:$0xf]  ;;  %v1302_v5 = vld [vmem:[#allocation2 + $0x24] sm:$0xf] }
 0x18b   : > { %v971_v30 = vor.u32 %v969_v10, %v968_v20  ;;  %v972_v31 = vrot.slane %v968_v20, 4  ;;  %v976_v34 = vrot.slane %v974_v21, 7  ;;  %v9541_v35 = vmax.f32 %v661_v12, %v775_v23 }
 0x18c   : > { %v1296_v36 = vsel %vm9529_vm9, %v988_v24, %v1295_v8  ;;  %v996_v37 = vor.u32 %v994_v16, %v993_v28  ;;  %v998_v38 = vrot.slane %v993_v28, 4  ;;  %v7647_v40 = vpack.c.bf16 %v9533_v29, %v9533_v29 }
 0x18d   : > { %1297 = vst [vmem:[#allocation2 + $0x18] sm:$0xf] %v1296_v36  ;;  %v1289_v41 = vsel %vm9529_vm9, %v971_v30, %v1288_v27  ;;  %v979_v42 = vor.u32 %v977_v22, %v976_v34  ;;  %v981_v43 = vrot.slane %v976_v34, 4  ;;  %v7645_v45 = vpack.c.bf16 %v9541_v35, %v9541_v35  ;;  %v7925_v47 = vpop.f32.mrb[8].mxu0 }
 0x18e   : > { %1290 = vst [vmem:[#allocation2 + $0xc] sm:$0xf] %v1289_v41  ;;  %v997_v48 = vsel %vm9537_vm10, %v989_v25, %v996_v37  ;;  %v1300_v49 = vsel %vm9398_vm4, %v998_v38, %v1299_v33  ;;  %v1017_v50 = vshrl.u32 %v7647_v40, 16  ;;  %v1020_v51 = vshll.u32 %v7647_v40, 16  ;;  %v676_v52 = vpop.f32.mrb[9].mxu0 }
 0x18f   : > { %1298 = vst [vmem:[#allocation2 + $0x1c] sm:$0xf] %v997_v48  ;;  %1301 = vst [vmem:[#allocation2 + $0x20] sm:$0x1] %v1300_v49  ;;  %v980_v53 = vsel %vm9537_vm10, %v972_v31, %v979_v42  ;;  %v1293_v54 = vsel %vm9398_vm4, %v981_v43, %v1292_v39  ;;  %v1000_v55 = vshrl.u32 %v7645_v45, 16  ;;  %v1003_v56 = vshll.u32 %v7645_v45, 16 }
 0x190   : > { %v7926_v58 = vpop.f32.mrb[10].mxu0  ;;  %1291 = vst [vmem:[#allocation2 + $0x10] sm:$0xf] %v980_v53  ;;  %1294 = vst [vmem:[#allocation2 + $0x14] sm:$0x1] %v1293_v54  ;;  %v9559_v60 = vrot.slane %v1017_v50, 7  ;;  %v672_v61 = vadd.f32 %v7922_v13, %v9503_v46  ;;  %v664_v63 = vadd.f32 %v9503_v46, %v663_v18  ;;  %v685_v1 = vadd.f32 %v7925_v47, %v9503_v46 }
 0x191   : > { %v679_v2 = vpop.f32.mrb[11].mxu0  ;;  %v9564_v4 = vrot.slane %v1000_v55, 7  ;;  %v677_v6 = vadd.f32 %v9503_v46, %v676_v52  ;;  %v688_v8 = vadd.f32 %v7926_v58, %v9503_v46  ;;  %v8794_v43 = vld [vmem:[#allocation11 + $0x48] sm:$0xff]   ;;  %v1306_v53 = vld [vmem:[#allocation2 + $0x2c] sm:$0x1] }
 0x192   : > { %v680_v9 = vadd.f32 %v9503_v46, %v679_v2  ;;  %v1022_v10 = vor.u32 %v1020_v51, %v9559_v60  ;;  %v1023_v11 = vrot.slane %v9559_v60, 4  ;;  %v778_v12 = vmul.f32 0.01, %v672_v61  ;;  %v1313_v52 = vld [vmem:[#allocation2 + $0x38] sm:$0x1] }
 0x193   : > { %v776_v13 = vmul.f32 0.01, %v664_v63  ;;  %v1005_v14 = vor.u32 %v1003_v56, %v9564_v4  ;;  %v1006_v15 = vrot.slane %v9564_v4, 4  ;;  %v781_v16 = vmul.f32 0.01, %v685_v1 }
 0x194   : > { %v779_v17 = vmul.f32 0.01, %v677_v6  ;;  %v1310_v18 = vsel %vm9529_vm9, %v1022_v10, %v1309_v3  ;;  %v9575_v20 = vmax.f32 %v672_v61, %v778_v12  ;;  %v782_v22 = vmul.f32 0.01, %v688_v8 }
 0x195   : > { %v9577_v21 = vmax.f32 %v664_v63, %v776_v13  ;;  %1311 = vst [vmem:[#allocation2 + $0x30] sm:$0xf] %v1310_v18  ;;  %v1303_v23 = vsel %vm9529_vm9, %v1005_v14, %v1302_v5  ;;  %v9581_v24 = vmax.f32 %v685_v1, %v781_v16  ;;  %v780_v27 = vmul.f32 0.01, %v680_v9  ;;  %v7929_v28 = vpop.f32.mrb[12].mxu0  ;;  %v8797_v5 = vld [vmem:[#allocation11 + $0x50] sm:$0xff]  }
 0x196   : > { %v9583_v25 = vmax.f32 %v677_v6, %v779_v17  ;;  %1304 = vst [vmem:[#allocation2 + $0x24] sm:$0xf] %v1303_v23  ;;  %v7648_v30 = vpack.c.bf16 %v9575_v20, %v9575_v20  ;;  %v9589_v33 = vmax.f32 %v688_v8, %v782_v22  ;;  %v9592_v34 = vadd.f32 %v7929_v28, %v9503_v46  ;;  %v692_v36 = vpop.f32.mrb[13].mxu0  ;;  %v8777_v51 = vld [vmem:[#allocation2 + $0x18] sm:$0xff]   ;;  %v1323_v1 = vld [vmem:[#allocation2 + $0x48] sm:$0xf] }
 0x197   : > { %v7646_v31 = vpack.c.bf16 %v9577_v21, %v9577_v21  ;;  %v7651_v37 = vpack.c.bf16 %v9581_v24, %v9581_v24  ;;  %v9598_v39 = vmax.f32 %v680_v9, %v780_v27  ;;  %v693_v40 = vadd.f32 %v9503_v46, %v692_v36  ;;  %v9601_v41 = vpop.f32.mrb[14].mxu0  ;;  %v8776_v42 = vld [vmem:[#allocation2 + $0xc] sm:$0xff]   ;;  %v1316_v17 = vld [vmem:[#allocation2 + $0x3c] sm:$0xf] }
 0x198   : > { %v7649_v38 = vpack.c.bf16 %v9583_v25, %v9583_v25  ;;  %v1025_v45 = vshrl.u32 %v7648_v30, 16  ;;  %v1028_v47 = vshll.u32 %v7648_v30, 16  ;;  %v695_v50 = vpop.f32.mrb[15].mxu0  ;;  %7964 = vmatmul.mubr.bf16.vlgmr.msra.gmra.mrb[32].mxu0 %v8776_v42  ;;  %v7652_v2 = vpack.c.bf16 %v9589_v33, %v9589_v33 }
 0x199   : > { %v1008_v48 = vshrl.u32 %v7646_v31, 16  ;;  %v1011_v49 = vshll.u32 %v7646_v31, 16  ;;  %v1051_v54 = vshrl.u32 %v7651_v37, 16  ;;  %v1054_v55 = vshll.u32 %v7651_v37, 16  ;;  %7967 = vmatprep.mubr.bf16.mxu0 %v8777_v51  ;;  %7996 = vmatpush3.bf16.msra.mxu0 %v9498_v44 }
 0x19a   : > { %v1034_v56 = vshrl.u32 %v7649_v38, 16  ;;  %v1037_v58 = vshll.u32 %v7649_v38, 16  ;;  %v1027_v61 = vrot.slane %v1025_v45, 7  ;;  %v7650_v3 = vpack.c.bf16 %v9598_v39, %v9598_v39  ;;  %7997 = vmatprep.subr.bf16.mxu0 %v8794_v43 }
 0x19b   : > { %v1010_v63 = vrot.slane %v1008_v48, 7  ;;  %v1053_v6 = vrot.slane %v1051_v54, 7  ;;  %v785_v9 = vmul.f32 0.01, %v9592_v34  ;;  %v783_v10 = vmul.f32 0.01, %v693_v40 }
 0x19c   : > { %v9608_v8 = vrot.slane %v1034_v56, 7  ;;  %v1030_v12 = vor.u32 %v1028_v47, %v1027_v61  ;;  %v1032_v13 = vrot.slane %v1027_v61, 4  ;;  %v1059_v38 = vshrl.u32 %v7652_v2, 16 }
 0x19d   : > { %v1013_v14 = vor.u32 %v1011_v49, %v1010_v63  ;;  %v1015_v16 = vrot.slane %v1010_v63, 4  ;;  %v1056_v18 = vor.u32 %v1054_v55, %v1053_v6  ;;  %v1057_v22 = vrot.slane %v1053_v6, 4  ;;  %v7933_v44 = vpop.f32.mrb[16].mxu0  ;;  %7998 = vmatpush3.bf16.msra.mxu0 %v8794_v43 }
 0x19e   : > { %v1039_v23 = vor.u32 %v1037_v58, %v9608_v8  ;;  %v1040_v27 = vrot.slane %v9608_v8, 4  ;;  %v1031_v28 = vsel %vm9537_vm10, %v1023_v11, %v1030_v12  ;;  %v1314_v30 = vsel %vm9398_vm4, %v1032_v13, %v1313_v52  ;;  %v708_v37 = vpop.f32.mrb[17].mxu0  ;;  %7999 = vmatprep.subr.bf16.mxu0 %v8797_v5  ;;  %v1327_v52 = vld [vmem:[#allocation2 + $0x50] sm:$0x1]  ;;  %v1320_v58 = vld [vmem:[#allocation2 + $0x44] sm:$0x1] }
 0x19f   : > { %v1014_v31 = vsel %vm9537_vm10, %v1006_v15, %v1013_v14  ;;  %v1307_v36 = vsel %vm9398_vm4, %v1015_v16, %v1306_v53  ;;  %1312 = vst [vmem:[#allocation2 + $0x34] sm:$0xf] %v1031_v28  ;;  %1315 = vst [vmem:[#allocation2 + $0x38] sm:$0x1] %v1314_v30  ;;  %v1324_v60 = vsel %vm9529_vm9, %v1056_v18, %v1323_v1  ;;  %v1062_v4 = vshll.u32 %v7652_v2, 16  ;;  %v7934_v42 = vpop.f32.mrb[18].mxu0 }
 0x1a0   : > { %1305 = vst [vmem:[#allocation2 + $0x28] sm:$0xf] %v1014_v31  ;;  %1308 = vst [vmem:[#allocation2 + $0x2c] sm:$0x1] %v1307_v36  ;;  %v1317_v11 = vsel %vm9529_vm9, %v1039_v23, %v1316_v17  ;;  %v8799_v15 = vld [vmem:[#allocation11 + $0x58] sm:$0xff]   ;;  %v1042_v45 = vshrl.u32 %v7650_v3, 16  ;;  %v9630_v43 = vmax.f32 %v9592_v34, %v785_v9  ;;  %v9632_v48 = vmax.f32 %v693_v40, %v783_v10 }
 0x1a1   : > { %1325 = vst [vmem:[#allocation2 + $0x48] sm:$0xf] %v1324_v60  ;;  %1318 = vst [vmem:[#allocation2 + $0x3c] sm:$0xf] %v1317_v11  ;;  %v1045_v47 = vshll.u32 %v7650_v3, 16  ;;  %v9634_v49 = vpop.f32.mrb[19].mxu0  ;;  %v704_v53 = vadd.f32 %v9601_v41, %v9503_v46  ;;  %v696_v54 = vadd.f32 %v9503_v46, %v695_v50  ;;  %v717_v55 = vadd.f32 %v7933_v44, %v9503_v46 }
 0x1a2   : > { %v1061_v51 = vrot.slane %v1059_v38, 7  ;;  %v1044_v56 = vrot.slane %v1042_v45, 7  ;;  %v7655_v61 = vpack.c.bf16 %v9630_v43, %v9630_v43  ;;  %v7653_v34 = vpack.c.bf16 %v9632_v48, %v9632_v48  ;;  %8000 = vmatpush3.bf16.msra.mxu0 %v8797_v5  ;;  %v8802_v41 = vld [vmem:[#allocation11 + $0x60] sm:$0xff]   ;;  %v1337_v13 = vld [vmem:[#allocation2 + $0x60] sm:$0xf]  ;;  %v8804_v17 = vld [vmem:[#allocation11 + $0x68] sm:$0xff]  }
 0x1a3   : > { %v709_v40 = vadd.f32 %v9503_v46, %v708_v37  ;;  %v786_v2 = vmul.f32 0.01, %v704_v53  ;;  %v784_v3 = vmul.f32 0.01, %v696_v54  ;;  %8001 = vmatprep.subr.bf16.mxu0 %v8799_v15  ;;  %v1330_v28 = vld [vmem:[#allocation2 + $0x54] sm:$0xf]  ;;  %v720_v45 = vadd.f32 %v7934_v42, %v9503_v46 }
 0x1a4   : > { %v1064_v63 = vor.u32 %v1062_v4, %v1061_v51  ;;  %v1066_v1 = vrot.slane %v1061_v51, 4  ;;  %v1047_v50 = vor.u32 %v1045_v47, %v1044_v56  ;;  %v1049_v6 = vrot.slane %v1044_v56, 4 }
 0x1a5   : > { %v1085_v8 = vshrl.u32 %v7655_v61, 16  ;;  %v1088_v9 = vshll.u32 %v7655_v61, 16  ;;  %v1068_v14 = vshrl.u32 %v7653_v34, 16  ;;  %v1071_v16 = vshll.u32 %v7653_v34, 16  ;;  %v7937_v5 = vpop.f32.mrb[20].mxu0 }
 0x1a6   : > { %v1065_v10 = vsel %vm9537_vm10, %v1057_v22, %v1064_v63  ;;  %v1328_v12 = vsel %vm9398_vm4, %v1066_v1, %v1327_v52  ;;  %v1048_v18 = vsel %vm9537_vm10, %v1040_v27, %v1047_v50  ;;  %v1321_v23 = vsel %vm9398_vm4, %v1049_v6, %v1320_v58  ;;  %8002 = vmatpush3.bf16.msra.mxu0 %v8799_v15  ;;  %v8781_v11 = vld [vmem:[#allocation2 + $0x30] sm:$0xff]   ;;  %v9666_v15 = vpop.f32.mrb[21].mxu0  ;;  %v1341_v1 = vld [vmem:[#allocation2 + $0x68] sm:$0x1]  ;;  %v8807_v50 = vld [vmem:[#allocation11 + $0x70] sm:$0xff]  }
 0x1a7   : > { %1326 = vst [vmem:[#allocation2 + $0x4c] sm:$0xf] %v1065_v10  ;;  %1329 = vst [vmem:[#allocation2 + $0x50] sm:$0x1] %v1328_v12  ;;  %v9653_v44 = vrot.slane %v1085_v8, 7  ;;  %v9655_v22 = vmax.f32 %v704_v53, %v786_v2  ;;  %v8780_v30 = vld [vmem:[#allocation2 + $0x24] sm:$0xff]   ;;  %v9659_v36 = vmax.f32 %v696_v54, %v784_v3  ;;  %8003 = vmatprep.subr.bf16.mxu0 %v8802_v41 }
 0x1a8   : > { %1319 = vst [vmem:[#allocation2 + $0x40] sm:$0xf] %v1048_v18  ;;  %1322 = vst [vmem:[#allocation2 + $0x44] sm:$0x1] %v1321_v23  ;;  %v9657_v31 = vrot.slane %v1068_v14, 7  ;;  %7968 = vmatmul.mubr.bf16.gmra.mrb[36].mxu0 %v8780_v30  ;;  %v9674_v54 = vpop.f32.mrb[22].mxu0  ;;  %v733_v14 = vadd.f32 %v7937_v5, %v9503_v46 }
 0x1a9   : > { %v789_v37 = vmul.f32 0.01, %v717_v55  ;;  %v787_v60 = vmul.f32 0.01, %v709_v40  ;;  %v1090_v27 = vor.u32 %v1088_v9, %v9653_v44  ;;  %v1091_v38 = vrot.slane %v9653_v44, 4  ;;  %7971 = vmatprep.mubr.bf16.mxu0 %v8781_v11  ;;  %v9680_v34 = vpop.f32.mrb[23].mxu0 }
 0x1aa   : > { %v7656_v4 = vpack.c.bf16 %v9655_v22, %v9655_v22  ;;  %v1073_v47 = vor.u32 %v1071_v16, %v9657_v31  ;;  %v1074_v51 = vrot.slane %v9657_v31, 4  ;;  %v7654_v52 = vpack.c.bf16 %v9659_v36, %v9659_v36  ;;  %8004 = vmatpush3.bf16.msra.mxu0 %v8802_v41  ;;  %v1334_v8 = vld [vmem:[#allocation2 + $0x5c] sm:$0x1] }
 0x1ab   : > { %v9672_v53 = vmax.f32 %v717_v55, %v789_v37  ;;  %v1338_v56 = vsel %vm9529_vm9, %v1090_v27, %v1337_v13  ;;  %v9678_v61 = vmax.f32 %v709_v40, %v787_v60  ;;  %8005 = vmatprep.subr.bf16.mxu0 %v8804_v17  ;;  %v790_v9 = vmul.f32 0.01, %v720_v45 }
 0x1ac   : > { %v1093_v58 = vshrl.u32 %v7656_v4, 16  ;;  %v1096_v42 = vshll.u32 %v7656_v4, 16  ;;  %1339 = vst [vmem:[#allocation2 + $0x60] sm:$0xf] %v1338_v56  ;;  %v1331_v63 = vsel %vm9529_vm9, %v1073_v47, %v1330_v28  ;;  %v1076_v55 = vshrl.u32 %v7654_v52, 16 }
 0x1ad   : > { %v1079_v2 = vshll.u32 %v7654_v52, 16  ;;  %v7659_v3 = vpack.c.bf16 %v9672_v53, %v9672_v53  ;;  %1332 = vst [vmem:[#allocation2 + $0x54] sm:$0xf] %v1331_v63  ;;  %v7657_v40 = vpack.c.bf16 %v9678_v61, %v9678_v61  ;;  %v712_v41 = vadd.f32 %v9503_v46, %v9634_v49  ;;  %v9695_v27 = vpop.f32.mrb[24].mxu0  ;;  %v8809_v49 = vld [vmem:[#allocation11 + $0x78] sm:$0xff]  }
 0x1ae   : > { %v1095_v6 = vrot.slane %v1093_v58, 7  ;;  %v1078_v10 = vrot.slane %v1076_v55, 7  ;;  %8006 = vmatpush3.bf16.msra.mxu0 %v8804_v17  ;;  %v9693_v60 = vmax.f32 %v720_v45, %v790_v9  ;;  %v8785_v11 = vld [vmem:[#allocation2 + $0x48] sm:$0xff]   ;;  %v1351_v47 = vld [vmem:[#allocation2 + $0x78] sm:$0xf]  ;;  %v9703_v56 = vpop.f32.mrb[25].mxu0  ;;  %v725_v9 = vadd.f32 %v9503_v46, %v9666_v15 }
 0x1af   : > { %v1119_v12 = vshrl.u32 %v7659_v3, 16  ;;  %v1122_v13 = vshll.u32 %v7659_v3, 16  ;;  %v1102_v23 = vshrl.u32 %v7657_v40, 16  ;;  %v1105_v44 = vshll.u32 %v7657_v40, 16  ;;  %v8784_v28 = vld [vmem:[#allocation2 + $0x3c] sm:$0xff]   ;;  %8007 = vmatprep.subr.bf16.mxu0 %v8807_v50 }
 0x1b0   : > { %v1098_v16 = vor.u32 %v1096_v42, %v1095_v6  ;;  %v1100_v18 = vrot.slane %v1095_v6, 4  ;;  %v1081_v30 = vor.u32 %v1079_v2, %v1078_v10  ;;  %v1083_v31 = vrot.slane %v1078_v10, 4  ;;  %10730 = vst [vmem:[#allocation19_spill] sm:$0xff] %v9693_v60  ;;  %7972 = vmatmul.mubr.bf16.gmra.mrb[40].mxu0 %v8784_v28  ;;  %v1344_v63 = vld [vmem:[#allocation2 + $0x6c] sm:$0xf] }
 0x1b1   : > { %v9691_v37 = vrot.slane %v1119_v12, 7  ;;  %v9701_v52 = vrot.slane %v1102_v23, 7  ;;  %v788_v17 = vmul.f32 0.01, %v712_v41  ;;  %7975 = vmatprep.mubr.bf16.mxu0 %v8785_v11  ;;  %v793_v40 = vmul.f32 0.01, %v733_v14 }
 0x1b2   : > { %v1099_v5 = vsel %vm9537_vm10, %v1091_v38, %v1098_v16  ;;  %v1342_v4 = vsel %vm9398_vm4, %v1100_v18, %v1341_v1  ;;  %v1082_v45 = vsel %vm9537_vm10, %v1074_v51, %v1081_v30  ;;  %v1335_v58 = vsel %vm9398_vm4, %v1083_v31, %v1334_v8  ;;  %v9711_v1 = vpop.f32.mrb[26].mxu0  ;;  %8008 = vmatpush3.bf16.msra.mxu0 %v8807_v50  ;;  %v9727_v12 = vld [vmem:[#allocation2 + $0x24] sm:$0xf]  ;;  %v1355_v18 = vld [vmem:[#allocation2 + $0x80] sm:$0x1] }
 0x1b3   : > { %1340 = vst [vmem:[#allocation2 + $0x64] sm:$0xf] %v1099_v5  ;;  %1343 = vst [vmem:[#allocation2 + $0x68] sm:$0x1] %v1342_v4  ;;  %v1124_v38 = vor.u32 %v1122_v13, %v9691_v37  ;;  %v1125_v42 = vrot.slane %v9691_v37, 4  ;;  %v1107_v55 = vor.u32 %v1105_v44, %v9701_v52  ;;  %v1108_v2 = vrot.slane %v9701_v52, 4  ;;  %8009 = vmatprep.subr.bf16.mxu0 %v8809_v49 }
 0x1b4   : > { %1333 = vst [vmem:[#allocation2 + $0x58] sm:$0xf] %v1082_v45  ;;  %1336 = vst [vmem:[#allocation2 + $0x5c] sm:$0x1] %v1335_v58  ;;  %v7660_v51 = vpack.c.bf16 %v9693_v60, %v9693_v60  ;;  %v9717_v3 = vmax.f32 %v712_v41, %v788_v17  ;;  %v9719_v6 = vpop.f32.mrb[27].mxu0  ;;  %v736_v10 = vadd.f32 %v9674_v54, %v9503_v46  ;;  %v3750_v11 = vshrl.u32 %v9727_v12, 16 }
 0x1b5   : > { %v1352_v8 = vsel %vm9529_vm9, %v1124_v38, %v1351_v47  ;;  %v1345_v41 = vsel %vm9529_vm9, %v1107_v55, %v1344_v63  ;;  %v9733_v23 = vmax.f32 %v733_v14, %v793_v40  ;;  %v791_v15 = vmul.f32 0.01, %v725_v9  ;;  %v9737_v28 = vpop.f32.mrb[28].mxu0  ;;  %v1348_v4 = vld [vmem:[#allocation2 + $0x74] sm:$0x1]  ;;  %v8867_v60 = vld [vmem:[#allocation11 + $0x208] sm:$0xff]  }
 0x1b6   : > { %10731 = vst [vmem:[#allocation20_spill] sm:$0xff] %v9717_v3  ;;  %1353 = vst [vmem:[#allocation2 + $0x78] sm:$0xf] %v1352_v8  ;;  %v1127_v13 = vshrl.u32 %v7660_v51, 16  ;;  %v1130_v16 = vshll.u32 %v7660_v51, 16  ;;  %v7658_v50 = vpack.c.bf16 %v9717_v3, %v9717_v3  ;;  %v728_v54 = vadd.f32 %v9503_v46, %v9680_v34  ;;  %v9740_v5 = vpop.f32.mrb[29].mxu0  ;;  %8010 = vmatpush3.bf16.msra.mxu0 %v8809_v49 }
 0x1b7   : > { %1346 = vst [vmem:[#allocation2 + $0x6c] sm:$0xf] %v1345_v41  ;;  %10732 = vst [vmem:[#allocation21_spill] sm:$0xff] %v9733_v23  ;;  %v794_v44 = vmul.f32 0.01, %v736_v10  ;;  %v7663_v14 = vpack.c.bf16 %v9733_v23, %v9733_v23  ;;  %v9744_v47 = vmax.f32 %v725_v9, %v791_v15  ;;  %v9748_v34 = vpop.f32.mrb[30].mxu0 }
 0x1b8   : > { %v1129_v30 = vrot.slane %v1127_v13, 7  ;;  %v1110_v31 = vshrl.u32 %v7658_v50, 16  ;;  %v1113_v37 = vshll.u32 %v7658_v50, 16  ;;  %v792_v17 = vmul.f32 0.01, %v728_v54  ;;  %v9756_v9 = vpop.f32.mrb[31].mxu0 }
 0x1b9   : > { %10733 = vst [vmem:[#allocation22_spill] sm:$0xff] %v9744_v47  ;;  %v9746_v52 = vmax.f32 %v736_v10, %v794_v44  ;;  %v9750_v63 = vrot.slane %v3750_v11, 4  ;;  %v1153_v55 = vshrl.u32 %v7663_v14, 16  ;;  %v1156_v51 = vshll.u32 %v7663_v14, 16  ;;  %v3660_v50 = vld [vmem:[#allocation2 + $0x28] sm:$0xf] }
 0x1ba   : > { %v1132_v45 = vor.u32 %v1130_v16, %v1129_v30  ;;  %v1134_v58 = vrot.slane %v1129_v30, 4  ;;  %v1112_v38 = vrot.slane %v1110_v31, 7  ;;  %v7661_v49 = vpack.c.bf16 %v9744_v47, %v9744_v47  ;;  %v8789_v15 = vld [vmem:[#allocation2 + $0x60] sm:$0xff]   ;;  %v8858_v47 = vld [vmem:[#allocation2 + $0x18] sm:$0xff]  }
 0x1bb   : > { %10734 = vst [vmem:[#allocation23_spill] sm:$0xff] %v9746_v52  ;;  %v7664_v8 = vpack.c.bf16 %v9746_v52, %v9746_v52  ;;  %v8787_v40 = vld [vmem:[#allocation2 + $0x54] sm:$0xff]   ;;  %v1155_v44 = vrot.slane %v1153_v55, 7 }
 0x1bc   : > { %v1133_v10 = vsel %vm9537_vm10, %v1125_v42, %v1132_v45  ;;  %v1356_v41 = vsel %vm9398_vm4, %v1134_v58, %v1355_v18  ;;  %v1115_v13 = vor.u32 %v1113_v37, %v1112_v38  ;;  %v1117_v16 = vrot.slane %v1112_v38, 4  ;;  %7976 = vmatmul.mubr.bf16.gmra.mrb[44].mxu0 %v8787_v40  ;;  %v1365_v18 = vld [vmem:[#allocation2 + $0x90] sm:$0xf] }
 0x1bd   : > { %1354 = vst [vmem:[#allocation2 + $0x7c] sm:$0xf] %v1133_v10  ;;  %1357 = vst [vmem:[#allocation2 + $0x80] sm:$0x1] %v1356_v41  ;;  %v1136_v30 = vshrl.u32 %v7661_v49, 16  ;;  %v1139_v31 = vshll.u32 %v7661_v49, 16  ;;  %v9766_v45 = vmax.f32 %v728_v54, %v792_v17  ;;  %7979 = vmatprep.mubr.bf16.mxu0 %v8789_v15  ;;  %v1158_v58 = vor.u32 %v1156_v51, %v1155_v44 }
 0x1be   : > { %v1161_v11 = vshrl.u32 %v7664_v8, 16  ;;  %v1116_v14 = vsel %vm9537_vm10, %v1108_v2, %v1115_v13  ;;  %v1349_v42 = vsel %vm9398_vm4, %v1117_v16, %v1348_v4  ;;  %v1164_v37 = vshll.u32 %v7664_v8, 16  ;;  %v1358_v10 = vld [vmem:[#allocation2 + $0x84] sm:$0xf]  ;;  %v1369_v41 = vld [vmem:[#allocation2 + $0x98] sm:$0x1] }
 0x1bf   : > { %10735 = vst [vmem:[#allocation24_spill] sm:$0xff] %v9766_v45  ;;  %1347 = vst [vmem:[#allocation2 + $0x70] sm:$0xf] %v1116_v14  ;;  %v1159_v38 = vrot.slane %v1155_v44, 4  ;;  %v1138_v55 = vrot.slane %v1136_v30, 7  ;;  %v7662_v40 = vpack.c.bf16 %v9766_v45, %v9766_v45  ;;  %v3753_v2 = vshll.u32 %v9727_v12, 16 }
 0x1c0   : > { %1350 = vst [vmem:[#allocation2 + $0x74] sm:$0x1] %v1349_v42  ;;  %v1163_v49 = vrot.slane %v1161_v11, 7  ;;  %v3759_v13 = vshll.u32 %v3660_v50, 16  ;;  %v3763_v4 = vshrl.u32 %v3660_v50, 16  ;;  %v1366_v54 = vsel %vm9529_vm9, %v1158_v58, %v1365_v18 }
 0x1c1   : > { %v1141_v17 = vor.u32 %v1139_v31, %v1138_v55  ;;  %v1142_v8 = vrot.slane %v1138_v55, 4  ;;  %v3661_v15 = vld [vmem:[#allocation2 + $0x2c] sm:$0x1]  ;;  %v3662_v51 = vld [vmem:[#allocation2 + $0x30] sm:$0xf]  ;;  %v1144_v30 = vshrl.u32 %v7662_v40, 16 }
 0x1c2   : > { %v1166_v16 = vor.u32 %v1164_v37, %v1163_v49  ;;  %1367 = vst [vmem:[#allocation2 + $0x90] sm:$0xf] %v1366_v54  ;;  %v1168_v44 = vrot.slane %v1163_v49, 4  ;;  %v1147_v11 = vshll.u32 %v7662_v40, 16  ;;  %v3755_v14 = vrot.slane %v3753_v2, 5 }
 0x1c3   : > { %v3663_v42 = vld [vmem:[#allocation2 + $0x34] sm:$0xf]  ;;  %v1359_v45 = vsel %vm9529_vm9, %v1141_v17, %v1358_v10  ;;  %v3761_v50 = vrot.slane %v3759_v13, 5  ;;  %v3765_v52 = vrot.slane %v3763_v4, 4  ;;  %v1146_v18 = vrot.slane %v1144_v30, 7 }
 0x1c4   : > { %v1167_v12 = vsel %vm9537_vm10, %v1159_v38, %v1166_v16  ;;  %1360 = vst [vmem:[#allocation2 + $0x84] sm:$0xf] %v1359_v45  ;;  %v1370_v31 = vsel %vm9398_vm4, %v1168_v44, %v1369_v41  ;;  %v1362_v37 = vld [vmem:[#allocation2 + $0x8c] sm:$0x1]  ;;  %v3756_v58 = vor.u32 %v3755_v14, %v9750_v63  ;;  %v3769_v55 = vshll.u32 %v3661_v15, 16 }
 0x1c5   : > { %1368 = vst [vmem:[#allocation2 + $0x94] sm:$0xf] %v1167_v12  ;;  %1371 = vst [vmem:[#allocation2 + $0x98] sm:$0x1] %v1370_v31  ;;  %v3766_v49 = vor.u32 %v3765_v52, %v3761_v50  ;;  %v3664_v40 = vld [vmem:[#allocation2 + $0x38] sm:$0x1]  ;;  %v1149_v17 = vor.u32 %v1147_v11, %v1146_v18 }
 0x1c6   : > { %v3774_v2 = vshrl.u32 %v3662_v51, 16  ;;  %v3777_v10 = vshll.u32 %v3662_v51, 16  ;;  %v3783_v54 = vshll.u32 %v3663_v42, 16  ;;  %v1151_v38 = vrot.slane %v1146_v18, 4  ;;  %v8791_v45 = vld [vmem:[#allocation2 + $0x6c] sm:$0xff]   ;;  %v8793_v52 = vld [vmem:[#allocation2 + $0x78] sm:$0xff]  }
 0x1c7   : > { %v3757_v13 = vrot.slane %v3756_v58, 4  ;;  %v3771_v4 = vrot.slane %v3769_v55, 5  ;;  %v3767_v16 = vrot.slane %v3766_v49, 4  ;;  %v1150_v51 = vsel %vm9537_vm10, %v1142_v8, %v1149_v17  ;;  %7980 = vmatmul.mubr.bf16.gmra.mrb[48].mxu0 %v8791_v45  ;;  %v3665_v55 = vld [vmem:[#allocation2 + $0x3c] sm:$0xf] }
 0x1c8   : > { %v3776_v63 = vrot.slane %v3774_v2, 4  ;;  %v3779_v15 = vrot.slane %v3777_v10, 5  ;;  %v3785_v44 = vrot.slane %v3783_v54, 5  ;;  %v1363_v30 = vsel %vm9398_vm4, %v1151_v38, %v1362_v37  ;;  %1361 = vst [vmem:[#allocation2 + $0x88] sm:$0xf] %v1150_v51  ;;  %7983 = vmatprep.mubr.bf16.mxu0 %v8793_v52 }
 0x1c9   : > { %v3762_v11 = vsel %vm9782_vm13, %v3757_v13, %v3761_v50  ;;  %v3787_v14 = vshrl.u32 %v3663_v42, 16  ;;  %1364 = vst [vmem:[#allocation2 + $0x8c] sm:$0x1] %v1363_v30  ;;  %v3772_v12 = vsel %vm9782_vm13, %v3767_v16, %v3771_v4  ;;  %v3793_v18 = vshll.u32 %v3664_v40, 16  ;;  %v3666_v50 = vld [vmem:[#allocation2 + $0x40] sm:$0xf] }
 0x1ca   : > { %v3780_v31 = vor.u32 %v3779_v15, %v3776_v63  ;;  %v749_v58 = vadd.f32 %v9695_v27, %v9503_v46  ;;  %v7484_v8 = vcombine.low %v3762_v11, %v3772_v12  ;;  %v741_v37 = vadd.f32 %v9503_v46, %v9703_v56  ;;  %v3680_v32 = vld [vmem:[#allocation2 + $0x78] sm:$0xf] }
 0x1cb   : > { %v3789_v49 = vrot.slane %v3787_v14, 4  ;;  %v752_v42 = vadd.f32 %v9711_v1, %v9503_v46  ;;  %v3795_v10 = vrot.slane %v3793_v18, 5  ;;  %v744_v40 = vadd.f32 %v9503_v46, %v9719_v6 }
 0x1cc   : > { %v3781_v2 = vrot.slane %v3780_v31, 4  ;;  %v797_v54 = vmul.f32 0.01, %v749_v58  ;;  %8159 = vmatprep.mubr.bf16.mxu1 %v7484_v8  ;;  %v795_v27 = vmul.f32 0.01, %v741_v37  ;;  %v3798_v13 = vshrl.u32 %v3665_v55, 16 }
 0x1cd   : > { %v3790_v17 = vor.u32 %v3789_v49, %v3785_v44  ;;  %v798_v38 = vmul.f32 0.01, %v752_v42  ;;  %v796_v56 = vmul.f32 0.01, %v744_v40  ;;  %v3801_v16 = vshll.u32 %v3665_v55, 16  ;;  %v8788_v49 = vld [vmem:[#allocation11 + $0x148] sm:$0xff]  }
 0x1ce   : > { %v3786_v4 = vsel %vm9782_vm13, %v3781_v2, %v3785_v44  ;;  %v9804_v45 = vmax.f32 %v749_v58, %v797_v54  ;;  %v9806_v63 = vmax.f32 %v741_v37, %v795_v27  ;;  %v3800_v52 = vrot.slane %v3798_v13, 4  ;;  %v8798_v37 = vld [vmem:[#allocation2 + $0x90] sm:$0xff]   ;;  %v1372_v27 = vld [vmem:[#allocation2 + $0x9c] sm:$0xf] }
 0x1cf   : > { %v3791_v1 = vrot.slane %v3790_v17, 4  ;;  %v9808_v15 = vmax.f32 %v752_v42, %v798_v38  ;;  %v9812_v6 = vmax.f32 %v744_v40, %v796_v56  ;;  %v3803_v51 = vrot.slane %v3801_v16, 5  ;;  %v8796_v31 = vld [vmem:[#allocation2 + $0x84] sm:$0xff]   ;;  %v8883_v56 = vld [vmem:[#allocation11 + $0x140] sm:$0xff]  }
 0x1d0   : > { %10738 = vst [vmem:[#allocation25_spill] sm:$0xff] %v9804_v45  ;;  %10739 = vst [vmem:[#allocation26_spill] sm:$0xff] %v9806_v63  ;;  %v7667_v46 = vpack.c.bf16 %v9804_v45, %v9804_v45  ;;  %v3807_v30 = vshll.u32 %v3666_v50, 16  ;;  %v7665_v11 = vpack.c.bf16 %v9806_v63, %v9806_v63  ;;  %v3811_v12 = vshrl.u32 %v3666_v50, 16  ;;  %v1379_v42 = vld [vmem:[#allocation2 + $0xa8] sm:$0xf]  ;;  %7984 = vmatmul.mubr.bf16.gmra.mrb[52].mxu0 %v8796_v31 }
 0x1d1   : > { %10740 = vst [vmem:[#allocation27_spill] sm:$0xff] %v9808_v15  ;;  %10741 = vst [vmem:[#allocation28_spill] sm:$0xff] %v9812_v6  ;;  %v3796_v44 = vsel %vm9782_vm13, %v3791_v1, %v3795_v10  ;;  %v7668_v14 = vpack.c.bf16 %v9808_v15, %v9808_v15  ;;  %v7666_v8 = vpack.c.bf16 %v9812_v6, %v9812_v6  ;;  %7987 = vmatprep.mubr.bf16.mxu0 %v8798_v37  ;;  %v1376_v31 = vld [vmem:[#allocation2 + $0xa4] sm:$0x1] }
 0x1d2   : > { %v7485_v18 = vcombine.low %v3786_v4, %v3796_v44  ;;  %v1187_v58 = vshrl.u32 %v7667_v46, 16  ;;  %v1190_v55 = vshll.u32 %v7667_v46, 16  ;;  %v1170_v2 = vshrl.u32 %v7665_v11, 16  ;;  %v9822_v4 = vld [vmem:[#allocation11 + $0x80] sm:$0xff]   ;;  %v3667_v63 = vld [vmem:[#allocation2 + $0x44] sm:$0x1] }
 0x1d3   : > { %v1173_v54 = vshll.u32 %v7665_v11, 16  ;;  %v1195_v10 = vshrl.u32 %v7668_v14, 16  ;;  %v1198_v40 = vshll.u32 %v7668_v14, 16  ;;  %v1178_v38 = vshrl.u32 %v7666_v8, 16  ;;  %v1383_v46 = vld [vmem:[#allocation2 + $0xb0] sm:$0x1]  ;;  %8043 = vmatprep.subr.bf16.mxu0 %v9822_v4 }
 0x1d4   : > { %8160 = vmatmul.mubr.bf16.vlgmr.msra.gmra.mrb[0].mxu1 %v7485_v18  ;;  %v1189_v17 = vrot.slane %v1187_v58, 7  ;;  %v1181_v50 = vshll.u32 %v7666_v8, 16  ;;  %v3804_v13 = vor.u32 %v3803_v51, %v3800_v52  ;;  %v1172_v16 = vrot.slane %v1170_v2, 7  ;;  %v8790_v58 = vld [vmem:[#allocation11 + $0x150] sm:$0xff]  }
 0x1d5   : > { %8188 = vmatpush3.bf16.msra.mxu1 %v8883_v56  ;;  %v1197_v1 = vrot.slane %v1195_v10, 7  ;;  %v3809_v44 = vrot.slane %v3807_v30, 5  ;;  %v3813_v6 = vrot.slane %v3811_v12, 4  ;;  %v1180_v14 = vrot.slane %v1178_v38, 7  ;;  %v3668_v56 = vld [vmem:[#allocation2 + $0x48] sm:$0xf] }
 0x1d6   : > { %v1192_v11 = vor.u32 %v1190_v55, %v1189_v17  ;;  %v1193_v15 = vrot.slane %v1189_v17, 4  ;;  %8189 = vmatprep.subr.bf16.mxu1 %v8788_v49  ;;  %v3805_v18 = vrot.slane %v3804_v13, 4  ;;  %v1175_v52 = vor.u32 %v1173_v54, %v1172_v16  ;;  %v3669_v10 = vld [vmem:[#allocation2 + $0x4c] sm:$0xf]  ;;  %v3670_v13 = vld [vmem:[#allocation2 + $0x50] sm:$0x1] }
 0x1d7   : > { %v1176_v51 = vrot.slane %v1172_v16, 4  ;;  %v1200_v8 = vor.u32 %v1198_v40, %v1197_v1  ;;  %v1202_v37 = vrot.slane %v1197_v1, 4  ;;  %v1183_v30 = vor.u32 %v1181_v50, %v1180_v14  ;;  %v8795_v1 = vld [vmem:[#allocation11 + $0x158] sm:$0xff]  }
 0x1d8   : > { %v1380_v2 = vsel %vm9529_vm9, %v1192_v11, %v1379_v42  ;;  %v1185_v12 = vrot.slane %v1180_v14, 4  ;;  %v3810_v55 = vsel %vm9782_vm13, %v3805_v18, %v3809_v44  ;;  %v1373_v17 = vsel %vm9529_vm9, %v1175_v52, %v1372_v27  ;;  %v8884_v18 = vld [vmem:[#allocation10] ss:$0 sm:$0xff] }
 0x1d9   : > { %1381 = vst [vmem:[#allocation2 + $0xa8] sm:$0xf] %v1380_v2  ;;  %v1201_v54 = vsel %vm9537_vm10, %v1193_v15, %v1200_v8  ;;  %v1384_v40 = vsel %vm9398_vm4, %v1202_v37, %v1383_v46  ;;  %v3814_v38 = vor.u32 %v3813_v6, %v3809_v44  ;;  %8190 = vmatpush3.bf16.msra.mxu1 %v8788_v49  ;;  %1374 = vst [vmem:[#allocation2 + $0x9c] sm:$0xf] %v1373_v17 }
 0x1da   : > { %1382 = vst [vmem:[#allocation2 + $0xac] sm:$0xf] %v1201_v54  ;;  %1385 = vst [vmem:[#allocation2 + $0xb0] sm:$0x1] %v1384_v40  ;;  %v1184_v42 = vsel %vm9537_vm10, %v1176_v51, %v1183_v30  ;;  %v1377_v50 = vsel %vm9398_vm4, %v1185_v12, %v1376_v31  ;;  %v3817_v16 = vshll.u32 %v3667_v63, 16  ;;  %v3822_v27 = vshrl.u32 %v3668_v56, 16  ;;  %8191 = vmatprep.subr.bf16.mxu1 %v8790_v58 }
 0x1db   : > { %1375 = vst [vmem:[#allocation2 + $0xa0] sm:$0xf] %v1184_v42  ;;  %1378 = vst [vmem:[#allocation2 + $0xa4] sm:$0x1] %v1377_v50  ;;  %v3815_v15 = vrot.slane %v3814_v38, 4  ;;  %v3825_v46 = vshll.u32 %v3668_v56, 16  ;;  %v765_v52 = vadd.f32 %v8884_v18, %v9737_v28  ;;  %v757_v63 = vadd.f32 %v8884_v18, %v9740_v5 }
 0x1dc   : > { %v3831_v6 = vshll.u32 %v3669_v10, 16  ;;  %v3835_v49 = vshrl.u32 %v3669_v10, 16  ;;  %v3819_v44 = vrot.slane %v3817_v16, 5  ;;  %v3824_v11 = vrot.slane %v3822_v27, 4  ;;  %v3671_v31 = vld [vmem:[#allocation2 + $0x54] sm:$0xf] }
 0x1dd   : > { %v3841_v14 = vshll.u32 %v3670_v13, 16  ;;  %v3827_v51 = vrot.slane %v3825_v46, 5  ;;  %8192 = vmatpush3.bf16.msra.mxu1 %v8790_v58  ;;  %v801_v56 = vmul.f32 0.01, %v765_v52  ;;  %v768_v12 = vadd.f32 %v8884_v18, %v9748_v34  ;;  %v8800_v10 = vld [vmem:[#allocation11 + $0x160] sm:$0xff]   ;;  %v8805_v34 = vld [vmem:[#allocation11 + $0x168] sm:$0xff]  }
 0x1de   : > { %v3833_v8 = vrot.slane %v3831_v6, 5  ;;  %v3837_v37 = vrot.slane %v3835_v49, 4  ;;  %v3820_v2 = vsel %vm9782_vm13, %v3815_v15, %v3819_v44  ;;  %8193 = vmatprep.subr.bf16.mxu1 %v8795_v1  ;;  %v799_v28 = vmul.f32 0.01, %v757_v63 }
 0x1df   : > { %v3843_v30 = vrot.slane %v3841_v14, 5  ;;  %v7486_v17 = vcombine.low %v3810_v55, %v3820_v2  ;;  %v3828_v54 = vor.u32 %v3827_v51, %v3824_v11  ;;  %v9844_v38 = vmax.f32 %v765_v52, %v801_v56 }
 0x1e0   : > { %v3838_v40 = vor.u32 %v3837_v37, %v3833_v8  ;;  %v802_v13 = vmul.f32 0.01, %v768_v12  ;;  %v760_v5 = vadd.f32 %v8884_v18, %v9756_v9  ;;  %v3846_v58 = vshrl.u32 %v3671_v31, 16 }
 0x1e1   : > { %10742 = vst [vmem:[#allocation29_spill] sm:$0xff] %v9844_v38  ;;  %8163 = vmatprep.mubr.bf16.mxu1 %v7486_v17  ;;  %v3829_v42 = vrot.slane %v3828_v54, 4  ;;  %v9847_v16 = vmax.f32 %v757_v63, %v799_v28  ;;  %v3849_v27 = vshll.u32 %v3671_v31, 16  ;;  %8194 = vmatpush3.bf16.msra.mxu1 %v8795_v1  ;;  %v7671_v55 = vpack.c.bf16 %v9844_v38, %v9844_v38  ;;  %v3672_v1 = vld [vmem:[#allocation2 + $0x58] sm:$0xf]  ;;  %v8803_v18 = vld [vmem:[#allocation2 + $0xa8] sm:$0xff]  }
 0x1e2   : > { %v3839_v50 = vrot.slane %v3838_v40, 4  ;;  %v9851_v15 = vmax.f32 %v768_v12, %v802_v13  ;;  %v800_v46 = vmul.f32 0.01, %v760_v5  ;;  %v3848_v6 = vrot.slane %v3846_v58, 4  ;;  %8195 = vmatprep.subr.bf16.mxu1 %v8800_v10  ;;  %v8801_v49 = vld [vmem:[#allocation2 + $0x9c] sm:$0xff]  }
 0x1e3   : > { %10743 = vst [vmem:[#allocation30_spill] sm:$0xff] %v9847_v16  ;;  %v3834_v9 = vsel %vm9782_vm13, %v3829_v42, %v3833_v8  ;;  %v7669_v11 = vpack.c.bf16 %v9847_v16, %v9847_v16  ;;  %v3851_v14 = vrot.slane %v3849_v27, 5  ;;  %v1221_v51 = vshrl.u32 %v7671_v55, 16  ;;  %7988 = vmatmul.mubr.bf16.gmra.mrb[56].mxu0 %v8801_v49  ;;  %v1393_v31 = vld [vmem:[#allocation2 + $0xc0] sm:$0xf] }
 0x1e4   : > { %10744 = vst [vmem:[#allocation31_spill] sm:$0xff] %v9851_v15  ;;  %v3844_v44 = vsel %vm9782_vm13, %v3839_v50, %v3843_v30  ;;  %v1224_v37 = vshll.u32 %v7671_v55, 16  ;;  %v7672_v63 = vpack.c.bf16 %v9851_v15, %v9851_v15  ;;  %v9861_v8 = vmax.f32 %v760_v5, %v800_v46  ;;  %7991 = vmatprep.mubr.bf16.mxu0 %v8803_v18  ;;  %v1386_v17 = vld [vmem:[#allocation2 + $0xb4] sm:$0xf]  ;;  %v8808_v13 = vld [vmem:[#allocation11 + $0x170] sm:$0xff]  }
 0x1e5   : > { %v7487_v52 = vcombine.low %v3834_v9, %v3844_v44  ;;  %v1204_v2 = vshrl.u32 %v7669_v11, 16  ;;  %v1207_v56 = vshll.u32 %v7669_v11, 16  ;;  %v3852_v12 = vor.u32 %v3851_v14, %v3848_v6  ;;  %8196 = vmatpush3.bf16.msra.mxu1 %v8800_v10  ;;  %v1397_v42 = vld [vmem:[#allocation2 + $0xc8] sm:$0x1]  ;;  %v3673_v6 = vld [vmem:[#allocation2 + $0x5c] sm:$0x1] }
 0x1e6   : > { %10745 = vst [vmem:[#allocation32_spill] sm:$0xff] %v9861_v8  ;;  %v1223_v30 = vrot.slane %v1221_v51, 7  ;;  %v1229_v54 = vshrl.u32 %v7672_v63, 16  ;;  %v1232_v40 = vshll.u32 %v7672_v63, 16  ;;  %v3855_v28 = vshll.u32 %v3672_v1, 16  ;;  %8197 = vmatprep.subr.bf16.mxu1 %v8805_v34 }
 0x1e7   : > { %8164 = vmatmul.mubr.bf16.gmra.mrb[4].mxu1 %v7487_v52  ;;  %v1206_v58 = vrot.slane %v1204_v2, 7  ;;  %v7670_v50 = vpack.c.bf16 %v9861_v8, %v9861_v8  ;;  %v9865_v27 = vrot.slane %v3852_v12, 4  ;;  %v3859_v5 = vshrl.u32 %v3672_v1, 16  ;;  %v3674_v18 = vld [vmem:[#allocation2 + $0x60] sm:$0xf] }
 0x1e8   : > { %v1226_v55 = vor.u32 %v1224_v37, %v1223_v30  ;;  %v1227_v46 = vrot.slane %v1223_v30, 4  ;;  %v1231_v10 = vrot.slane %v1229_v54, 7  ;;  %v3857_v49 = vrot.slane %v3855_v28, 5  ;;  %v8810_v37 = vld [vmem:[#allocation11 + $0x178] sm:$0xff]  }
 0x1e9   : > { %v1209_v9 = vor.u32 %v1207_v56, %v1206_v58  ;;  %v1210_v44 = vrot.slane %v1206_v58, 4  ;;  %v1212_v11 = vshrl.u32 %v7670_v50, 16  ;;  %v1215_v14 = vshll.u32 %v7670_v50, 16  ;;  %8198 = vmatpush3.bf16.msra.mxu1 %v8805_v34  ;;  %v3675_v54 = vld [vmem:[#allocation2 + $0x64] sm:$0xf] }
 0x1ea   : > { %v1394_v52 = vsel %vm9529_vm9, %v1226_v55, %v1393_v31  ;;  %v1234_v51 = vor.u32 %v1232_v40, %v1231_v10  ;;  %v1236_v63 = vrot.slane %v1231_v10, 4  ;;  %v3858_v1 = vsel %vm9782_vm13, %v9865_v27, %v3857_v49  ;;  %8199 = vmatprep.subr.bf16.mxu1 %v8808_v13  ;;  %v1390_v40 = vld [vmem:[#allocation2 + $0xbc] sm:$0x1]  ;;  %v3676_v28 = vld [vmem:[#allocation2 + $0x68] sm:$0x1]  ;;  %v9878_v10 = vld [vmem:[#allocation11 + $0x180] sm:$0xff]  }
 0x1eb   : > { %1395 = vst [vmem:[#allocation2 + $0xc0] sm:$0xf] %v1394_v52  ;;  %v1387_v2 = vsel %vm9529_vm9, %v1209_v9, %v1386_v17  ;;  %v1214_v56 = vrot.slane %v1212_v11, 7  ;;  %v3861_v12 = vrot.slane %v3859_v5, 4  ;;  %v3865_v30 = vshll.u32 %v3673_v6, 16 }
 0x1ec   : > { %1388 = vst [vmem:[#allocation2 + $0xb4] sm:$0xf] %v1387_v2  ;;  %v1235_v34 = vsel %vm9537_vm10, %v1227_v46, %v1234_v51  ;;  %v1398_v31 = vsel %vm9398_vm4, %v1236_v63, %v1397_v42  ;;  %v3870_v58 = vshrl.u32 %v3674_v18, 16  ;;  %v3873_v50 = vshll.u32 %v3674_v18, 16  ;;  %v3677_v5 = vld [vmem:[#allocation2 + $0x6c] sm:$0xf] }
 0x1ed   : > { %1396 = vst [vmem:[#allocation2 + $0xc4] sm:$0xf] %v1235_v34  ;;  %1399 = vst [vmem:[#allocation2 + $0xc8] sm:$0x1] %v1398_v31  ;;  %v1217_v27 = vor.u32 %v1215_v14, %v1214_v56  ;;  %v1219_v19 = vrot.slane %v1214_v56, 4  ;;  %v3862_v17 = vor.u32 %v3861_v12, %v3857_v49  ;;  %v3867_v55 = vrot.slane %v3865_v30, 5  ;;  %8200 = vmatpush3.bf16.msra.mxu1 %v8808_v13 }
 0x1ee   : > { %v3872_v6 = vrot.slane %v3870_v58, 4  ;;  %v3875_v9 = vrot.slane %v3873_v50, 5  ;;  %v3879_v46 = vshll.u32 %v3675_v54, 16  ;;  %v3883_v11 = vshrl.u32 %v3675_v54, 16  ;;  %v3678_v52 = vld [vmem:[#allocation2 + $0x70] sm:$0xf]  ;;  %8201 = vmatprep.subr.bf16.mxu1 %v8810_v37 }
 0x1ef   : > { %v1218_v42 = vsel %vm9537_vm10, %v1210_v44, %v1217_v27  ;;  %v1391_v18 = vsel %vm9398_vm4, %v1219_v19, %v1390_v40  ;;  %v3863_v14 = vrot.slane %v3862_v17, 4  ;;  %v3889_v51 = vshll.u32 %v3676_v28, 16  ;;  %v3679_v2 = vld [vmem:[#allocation2 + $0x74] sm:$0x1]  ;;  %v3681_v28 = vld [vmem:[#allocation2 + $0x7c] sm:$0xf] }
 0x1f0   : > { %1389 = vst [vmem:[#allocation2 + $0xb8] sm:$0xf] %v1218_v42  ;;  %1392 = vst [vmem:[#allocation2 + $0xbc] sm:$0x1] %v1391_v18  ;;  %v3876_v49 = vor.u32 %v3875_v9, %v3872_v6  ;;  %v3881_v13 = vrot.slane %v3879_v46, 5  ;;  %v3885_v63 = vrot.slane %v3883_v11, 4 }
 0x1f1   : > { %v3894_v56 = vshrl.u32 %v3677_v5, 16  ;;  %v3868_v12 = vsel %vm9782_vm13, %v3863_v14, %v3867_v55  ;;  %v3891_v30 = vrot.slane %v3889_v51, 5  ;;  %v3897_v54 = vshll.u32 %v3677_v5, 16  ;;  %8202 = vmatpush3.bf16.msra.mxu1 %v8810_v37  ;;  %v3682_v5 = vld [vmem:[#allocation2 + $0x80] sm:$0x1] }
 0x1f2   : > { %v3903_v34 = vshll.u32 %v3678_v52, 16  ;;  %v7488_v44 = vcombine.low %v3858_v1, %v3868_v12  ;;  %v3877_v31 = vrot.slane %v3876_v49, 4  ;;  %v3886_v40 = vor.u32 %v3885_v63, %v3881_v13  ;;  %8235 = vmatprep.subr.bf16.mxu1 %v9878_v10  ;;  %v3683_v18 = vld [vmem:[#allocation2 + $0x84] sm:$0xf]  ;;  %v3684_v63 = vld [vmem:[#allocation2 + $0x88] sm:$0xf] }
 0x1f3   : > { %v3896_v58 = vrot.slane %v3894_v56, 4  ;;  %v3899_v50 = vrot.slane %v3897_v54, 5  ;;  %v3907_v19 = vshrl.u32 %v3678_v52, 16  ;;  %v3913_v17 = vshll.u32 %v3679_v2, 16  ;;  %v2651_v16 = vld [vmem:[#allocation2 + $0xb4] sm:$0xe] }
 0x1f4   : > { %v3905_v27 = vrot.slane %v3903_v34, 5  ;;  %8167 = vmatprep.mubr.bf16.mxu1 %v7488_v44  ;;  %v3882_v55 = vsel %vm9782_vm13, %v3877_v31, %v3881_v13  ;;  %v3887_v6 = vrot.slane %v3886_v40, 4  ;;  %v3918_v9 = vshrl.u32 %v3680_v32, 16 }
 0x1f5   : > { %v3921_v46 = vshll.u32 %v3680_v32, 16  ;;  %v3900_v37 = vor.u32 %v3899_v50, %v3896_v58  ;;  %v3909_v1 = vrot.slane %v3907_v19, 4  ;;  %v3915_v11 = vrot.slane %v3913_v17, 5  ;;  %v3685_v50 = vld [vmem:[#allocation2 + $0x8c] sm:$0x1] }
 0x1f6   : > { %v3927_v42 = vshll.u32 %v3681_v28, 16  ;;  %v3892_v14 = vsel %vm9782_vm13, %v3887_v6, %v3891_v30  ;;  %v3920_v51 = vrot.slane %v3918_v9, 4  ;;  %v3931_v52 = vshrl.u32 %v3681_v28, 16  ;;  %v3686_v9 = vld [vmem:[#allocation2 + $0x90] sm:$0xf] }
 0x1f7   : > { %v3923_v49 = vrot.slane %v3921_v46, 5  ;;  %v7489_v2 = vcombine.low %v3882_v55, %v3892_v14  ;;  %v3901_v56 = vrot.slane %v3900_v37, 4  ;;  %v3910_v12 = vor.u32 %v3909_v1, %v3905_v27  ;;  %v8806_v54 = vld [vmem:[#allocation2 + $0xb4] sm:$0xff]  }
 0x1f8   : > { %v3929_v13 = vrot.slane %v3927_v42, 5  ;;  %v3933_v44 = vrot.slane %v3931_v52, 4  ;;  %v3937_v32 = vshll.u32 %v3682_v5, 16  ;;  %v3942_v31 = vshrl.u32 %v3683_v18, 16  ;;  %7992 = vmatmul.mubr.bf16.gmra.mrb[60].mxu0 %v8806_v54  ;;  %v3687_v42 = vld [vmem:[#allocation2 + $0x94] sm:$0xf] }
 0x1f9   : > { %v3924_v34 = vor.u32 %v3923_v49, %v3920_v51  ;;  %8168 = vmatmul.mubr.bf16.gmra.mrb[8].mxu1 %v7489_v2  ;;  %v3906_v40 = vsel %vm9782_vm13, %v3901_v56, %v3905_v27  ;;  %v3911_v58 = vrot.slane %v3910_v12, 4  ;;  %v3945_v30 = vshll.u32 %v3683_v18, 16  ;;  %v3688_v2 = vld [vmem:[#allocation2 + $0x98] sm:$0x1] }
 0x1fa   : > { %v3951_v19 = vshll.u32 %v3684_v63, 16  ;;  %v3934_v17 = vor.u32 %v3933_v44, %v3929_v13  ;;  %v3939_v55 = vrot.slane %v3937_v32, 5  ;;  %v3944_v6 = vrot.slane %v3942_v31, 4 }
 0x1fb   : > { %v3925_v28 = vrot.slane %v3924_v34, 4  ;;  %v3916_v46 = vsel %vm9782_vm13, %v3911_v58, %v3915_v11  ;;  %v3947_v37 = vrot.slane %v3945_v30, 5  ;;  %v3955_v1 = vshrl.u32 %v3684_v63, 16  ;;  %v3689_v63 = vld [vmem:[#allocation2 + $0x9c] sm:$0xf] }
 0x1fc   : > { %v3953_v5 = vrot.slane %v3951_v19, 5  ;;  %v7490_v14 = vcombine.low %v3906_v40, %v3916_v46  ;;  %v3935_v51 = vrot.slane %v3934_v17, 4  ;;  %v3961_v18 = vshll.u32 %v3685_v50, 16 }
 0x1fd   : > { %v3930_v27 = vsel %vm9782_vm13, %v3925_v28, %v3929_v13  ;;  %v3948_v49 = vor.u32 %v3947_v37, %v3944_v6  ;;  %v3957_v52 = vrot.slane %v3955_v1, 4  ;;  %v3966_v56 = vshrl.u32 %v3686_v9, 16  ;;  %v3690_v13 = vld [vmem:[#allocation2 + $0xa0] sm:$0xf] }
 0x1fe   : > { %v3969_v12 = vshll.u32 %v3686_v9, 16  ;;  %8171 = vmatprep.mubr.bf16.mxu1 %v7490_v14  ;;  %v3940_v54 = vsel %vm9782_vm13, %v3935_v51, %v3939_v55  ;;  %v3963_v11 = vrot.slane %v3961_v18, 5  ;;  %v3975_v34 = vshll.u32 %v3687_v42, 16 }
 0x1ff   : > { %v3979_v44 = vshrl.u32 %v3687_v42, 16  ;;  %v7491_v32 = vcombine.low %v3930_v27, %v3940_v54  ;;  %v3949_v31 = vrot.slane %v3948_v49, 4  ;;  %v3958_v40 = vor.u32 %v3957_v52, %v3953_v5  ;;  %v3691_v42 = vld [vmem:[#allocation2 + $0xa4] sm:$0x1]  ;;  %v3692_v27 = vld [vmem:[#allocation2 + $0xa8] sm:$0xf] }
 0x200   : > { %v3968_v58 = vrot.slane %v3966_v56, 4  ;;  %v3971_v30 = vrot.slane %v3969_v12, 5  ;;  %v3977_v50 = vrot.slane %v3975_v34, 5  ;;  %v3985_v28 = vshll.u32 %v3688_v2, 16  ;;  %v3693_v2 = vld [vmem:[#allocation2 + $0xac] sm:$0xf] }
 0x201   : > { %v3981_v19 = vrot.slane %v3979_v44, 4  ;;  %8172 = vmatmul.mubr.bf16.gmra.mrb[12].mxu1 %v7491_v32  ;;  %v3954_v17 = vsel %vm9782_vm13, %v3949_v31, %v3953_v5  ;;  %v3959_v6 = vrot.slane %v3958_v40, 4  ;;  %v3990_v9 = vshrl.u32 %v3689_v63, 16 }
 0x202   : > { %v3993_v55 = vshll.u32 %v3689_v63, 16  ;;  %v3972_v46 = vor.u32 %v3971_v30, %v3968_v58  ;;  %v3987_v1 = vrot.slane %v3985_v28, 5  ;;  %v3999_v14 = vshll.u32 %v3690_v13, 16 }
 0x203   : > { %v3982_v37 = vor.u32 %v3981_v19, %v3977_v50  ;;  %v3964_v51 = vsel %vm9782_vm13, %v3959_v6, %v3963_v11  ;;  %v3992_v18 = vrot.slane %v3990_v9, 4  ;;  %v4003_v52 = vshrl.u32 %v3690_v13, 16  ;;  %v3694_v11 = vld [vmem:[#allocation2 + $0xb0] sm:$0x1]  ;;  %v364_v13 = vld [vmem:[#allocation2 + $0x8] sm:$0x1] }
 0x204   : > { %v3995_v49 = vrot.slane %v3993_v55, 5  ;;  %v7492_v56 = vcombine.low %v3954_v17, %v3964_v51  ;;  %v3973_v12 = vrot.slane %v3972_v46, 4  ;;  %v4001_v5 = vrot.slane %v3999_v14, 5  ;;  %v1785_v9 = vld [vmem:[#allocation2] sm:$0xf] }
 0x205   : > { %v3983_v54 = vrot.slane %v3982_v37, 4  ;;  %v4005_v44 = vrot.slane %v4003_v52, 4  ;;  %v4009_v63 = vshll.u32 %v3691_v42, 16  ;;  %v4014_v32 = vshrl.u32 %v3692_v27, 16  ;;  %v1786_v14 = vld [vmem:[#allocation2 + $0x4] sm:$0xf] }
 0x206   : > { %v3996_v34 = vor.u32 %v3995_v49, %v3992_v18  ;;  %8175 = vmatprep.mubr.bf16.mxu1 %v7492_v56  ;;  %v3978_v31 = vsel %vm9782_vm13, %v3973_v12, %v3977_v50  ;;  %v4017_v58 = vshll.u32 %v3692_v27, 16  ;;  %v4023_v30 = vshll.u32 %v3693_v2, 16  ;;  %v1788_v12 = vld [vmem:[#allocation2 + $0xc] sm:$0xf] }
 0x207   : > { %v3988_v40 = vsel %vm9782_vm13, %v3983_v54, %v3987_v1  ;;  %v4006_v17 = vor.u32 %v4005_v44, %v4001_v5  ;;  %v4011_v6 = vrot.slane %v4009_v63, 5  ;;  %v4016_v55 = vrot.slane %v4014_v32, 4  ;;  %v1789_v63 = vld [vmem:[#allocation2 + $0x10] sm:$0xf] }
 0x208   : > { %v7493_v19 = vcombine.low %v3978_v31, %v3988_v40  ;;  %v3997_v28 = vrot.slane %v3996_v34, 4  ;;  %v4019_v46 = vrot.slane %v4017_v58, 5  ;;  %v4025_v37 = vrot.slane %v4023_v30, 5 }
 0x209   : > { %v4027_v42 = vshrl.u32 %v3693_v2, 16  ;;  %v4007_v51 = vrot.slane %v4006_v17, 4  ;;  %v4033_v1 = vshll.u32 %v3694_v11, 16  ;;  %v365_v27 = vsel %vm9432_vm6, 0, %v364_v13  ;;  %v1790_v13 = vld [vmem:[#allocation2 + $0x14] sm:$0x1] }
 0x20a   : > { %8176 = vmatmul.mubr.bf16.gmra.mrb[16].mxu1 %v7493_v19  ;;  %v4002_v50 = vsel %vm9782_vm13, %v3997_v28, %v4001_v5  ;;  %v4020_v18 = vor.u32 %v4019_v46, %v4016_v55  ;;  %366 = vst [vmem:[#allocation2 + $0x8] sm:$0x1] %v365_v27  ;;  %v1837_v52 = vshrl.u32 %v1785_v9, 16  ;;  %v1840_v56 = vshll.u32 %v1785_v9, 16 }
 0x20b   : > { %v4029_v49 = vrot.slane %v4027_v42, 4  ;;  %v4012_v54 = vsel %vm9782_vm13, %v4007_v51, %v4011_v6  ;;  %v4035_v2 = vrot.slane %v4033_v1, 5  ;;  %v1846_v34 = vshll.u32 %v1786_v14, 16 }
 0x20c   : > { %v1850_v44 = vshrl.u32 %v1786_v14, 16  ;;  %v7494_v32 = vcombine.low %v4002_v50, %v4012_v54  ;;  %v4021_v5 = vrot.slane %v4020_v18, 4  ;;  %v1839_v40 = vrot.slane %v1837_v52, 4  ;;  %v1791_v50 = vld [vmem:[#allocation2 + $0x18] sm:$0xf] }
 0x20d   : > { %v4030_v31 = vor.u32 %v4029_v49, %v4025_v37  ;;  %v1842_v11 = vrot.slane %v1840_v56, 5  ;;  %v1848_v58 = vrot.slane %v1846_v34, 5  ;;  %v1861_v19 = vshrl.u32 %v1788_v12, 16  ;;  %v1792_v49 = vld [vmem:[#allocation2 + $0x1c] sm:$0xf] }
 0x20e   : > { %v1852_v30 = vrot.slane %v1850_v44, 4  ;;  %8179 = vmatprep.mubr.bf16.mxu1 %v7494_v32  ;;  %v4026_v28 = vsel %vm9782_vm13, %v4021_v5, %v4025_v37  ;;  %v1864_v9 = vshll.u32 %v1788_v12, 16  ;;  %v1870_v6 = vshll.u32 %v1789_v63, 16  ;;  %v1793_v5 = vld [vmem:[#allocation2 + $0x20] sm:$0x1] }
 0x20f   : > { %v4031_v17 = vrot.slane %v4030_v31, 4  ;;  %v1843_v55 = vor.u32 %v1842_v11, %v1839_v40  ;;  %v1863_v42 = vrot.slane %v1861_v19, 4  ;;  %v1874_v14 = vshrl.u32 %v1789_v63, 16 }
 0x210   : > { %v1853_v46 = vor.u32 %v1852_v30, %v1848_v58  ;;  %v1866_v1 = vrot.slane %v1864_v9, 5  ;;  %v1872_v27 = vrot.slane %v1870_v6, 5  ;;  %v1880_v18 = vshll.u32 %v1790_v13, 16  ;;  %v3695_v30 = vld [vmem:[#allocation2 + $0xb4] sm:$0xf] }
 0x211   : > { %v4036_v51 = vsel %vm9782_vm13, %v4031_v17, %v4035_v2  ;;  %v1787_v56 = vld [vmem:[#allocation2 + $0x8] sm:$0x1]  ;;  %v1844_v54 = vrot.slane %v1843_v55, 4  ;;  %v1876_v37 = vrot.slane %v1874_v14, 4  ;;  %v1885_v31 = vshrl.u32 %v1791_v50, 16 }
 0x212   : > { %v7495_v52 = vcombine.low %v4026_v28, %v4036_v51  ;;  %v1854_v34 = vrot.slane %v1853_v46, 4  ;;  %v1856_v44 = vshll.u32 %v1787_v56, 16  ;;  %v1867_v12 = vor.u32 %v1866_v1, %v1863_v42  ;;  %v3697_v1 = vld [vmem:[#allocation2 + $0xbc] sm:$0x1] }
 0x213   : > { %v1882_v32 = vrot.slane %v1880_v18, 5  ;;  %v1849_v63 = vsel %vm9782_vm13, %v1844_v54, %v1848_v58  ;;  %v1877_v40 = vor.u32 %v1876_v37, %v1872_v27  ;;  %v1888_v2 = vshll.u32 %v1791_v50, 16  ;;  %v3696_v58 = vld [vmem:[#allocation2 + $0xb8] sm:$0xf]  ;;  %v3698_v54 = vld [vmem:[#allocation2 + $0xc0] sm:$0xf] }
 0x214   : > { %8180 = vmatmul.mubr.bf16.gmra.mrb[20].mxu1 %v7495_v52  ;;  %v1894_v11 = vshll.u32 %v1792_v49, 16  ;;  %v1858_v13 = vrot.slane %v1856_v44, 5  ;;  %v1868_v19 = vrot.slane %v1867_v12, 4  ;;  %v1887_v28 = vrot.slane %v1885_v31, 4  ;;  %v8816_v31 = vld [vmem:[#allocation11 + $0x88] sm:$0xff]  }
 0x215   : > { %v1898_v17 = vshrl.u32 %v1792_v49, 16  ;;  %v1878_v9 = vrot.slane %v1877_v40, 4  ;;  %v1890_v6 = vrot.slane %v1888_v2, 5  ;;  %v1904_v46 = vshll.u32 %v1793_v5, 16 }
 0x216   : > { %v1896_v55 = vrot.slane %v1894_v11, 5  ;;  %v1859_v42 = vsel %vm9782_vm13, %v1854_v34, %v1858_v13  ;;  %v1873_v14 = vsel %vm9782_vm13, %v1868_v19, %v1872_v27  ;;  %v4038_v50 = vshrl.u32 %v3695_v30, 16  ;;  %v3699_v11 = vld [vmem:[#allocation2 + $0xc4] sm:$0xf] }
 0x217   : > { %v1900_v51 = vrot.slane %v1898_v17, 4  ;;  %v7394_v18 = vcombine.low %v1849_v63, %v1859_v42  ;;  %v1883_v52 = vsel %vm9782_vm13, %v1878_v9, %v1882_v32  ;;  %v1891_v56 = vor.u32 %v1890_v6, %v1887_v28 }
 0x218   : > { %v1906_v49 = vrot.slane %v1904_v46, 5  ;;  %v7395_v37 = vcombine.low %v1873_v14, %v1883_v52  ;;  %v4040_v12 = vrot.slane %v4038_v50, 4  ;;  %v4041_v5 = vshll.u32 %v3695_v30, 16  ;;  %v3700_v46 = vld [vmem:[#allocation2 + $0xc8] sm:$0x1]  ;;  %v8817_v50 = vld [vmem:[#allocation11 + $0x90] sm:$0xff]  }
 0x219   : > { %v1901_v44 = vor.u32 %v1900_v51, %v1896_v55  ;;  %8011 = vmatprep.mubr.bf16.mxu0 %v7394_v18  ;;  %v1892_v34 = vrot.slane %v1891_v56, 4  ;;  %v4047_v40 = vshll.u32 %v3696_v58, 16  ;;  %v4051_v27 = vshrl.u32 %v3696_v58, 16  ;;  %v4471_v30 = vld [vmem:[#allocation2 + $0xc] sm:$0xe] }
 0x21a   : > { %v4057_v2 = vshll.u32 %v3697_v1, 16  ;;  %8012 = vmatmul.mubr.bf16.vlgmr.msra.gmra.mrb[32].mxu0 %v7395_v37  ;;  %v4043_v63 = vrot.slane %v4041_v5, 5  ;;  %v4062_v19 = vshrl.u32 %v3698_v54, 16  ;;  %v4065_v17 = vshll.u32 %v3698_v54, 16  ;;  %v4472_v1 = vld [vmem:[#allocation2 + $0x10] sm:$0xf] }
 0x21b   : > { %v1902_v13 = vrot.slane %v1901_v44, 4  ;;  %v1897_v32 = vsel %vm9782_vm13, %v1892_v34, %v1896_v55  ;;  %v4049_v28 = vrot.slane %v4047_v40, 5  ;;  %v4053_v9 = vrot.slane %v4051_v27, 4  ;;  %8044 = vmatpush3.bf16.msra.mxu0 %v9822_v4  ;;  %v4473_v54 = vld [vmem:[#allocation2 + $0x14] sm:$0x1] }
 0x21c   : > { %v4059_v6 = vrot.slane %v4057_v2, 5  ;;  %v4044_v14 = vor.u32 %v4043_v63, %v4040_v12  ;;  %v4064_v51 = vrot.slane %v4062_v19, 4  ;;  %v4067_v58 = vrot.slane %v4065_v17, 5  ;;  %8045 = vmatprep.subr.bf16.mxu0 %v8816_v31  ;;  %v1794_v37 = vld [vmem:[#allocation2 + $0x24] sm:$0xf] }
 0x21d   : > { %v1907_v42 = vsel %vm9782_vm13, %v1902_v13, %v1906_v49  ;;  %v4054_v52 = vor.u32 %v4053_v9, %v4049_v28  ;;  %v4071_v56 = vshll.u32 %v3699_v11, 16  ;;  %v4075_v55 = vshrl.u32 %v3699_v11, 16  ;;  %v1795_v4 = vld [vmem:[#allocation2 + $0x28] sm:$0xf]  ;;  %v1796_v27 = vld [vmem:[#allocation2 + $0x2c] sm:$0x1] }
 0x21e   : > { %v7396_v18 = vcombine.low %v1897_v32, %v1907_v42  ;;  %v4045_v44 = vrot.slane %v4044_v14, 4  ;;  %v4068_v5 = vor.u32 %v4067_v58, %v4064_v51  ;;  %v4081_v34 = vshll.u32 %v3700_v46, 16  ;;  %v8819_v17 = vld [vmem:[#allocation11 + $0x98] sm:$0xff]   ;;  %v1797_v58 = vld [vmem:[#allocation2 + $0x30] sm:$0xf] }
 0x21f   : > { %v4055_v40 = vrot.slane %v4054_v52, 4  ;;  %v4073_v49 = vrot.slane %v4071_v56, 5  ;;  %v4077_v12 = vrot.slane %v4075_v55, 4  ;;  %8046 = vmatpush3.bf16.msra.mxu0 %v8816_v31  ;;  %v7506_v19 = vrot.slane %v4471_v30, 9  ;;  %v1798_v55 = vld [vmem:[#allocation2 + $0x34] sm:$0xf] }
 0x220   : > { %8015 = vmatprep.mubr.bf16.mxu0 %v7396_v18  ;;  %v4050_v2 = vsel %vm9782_vm13, %v4045_v44, %v4049_v28  ;;  %v4069_v13 = vrot.slane %v4068_v5, 4  ;;  %v4083_v63 = vrot.slane %v4081_v34, 5  ;;  %8047 = vmatprep.subr.bf16.mxu0 %v8817_v50  ;;  %v4569_v46 = vrot.slane %v4472_v1, 5  ;;  %v4474_v5 = vld [vmem:[#allocation2 + $0x18] sm:$0xe]  ;;  %v8820_v34 = vld [vmem:[#allocation11 + $0xa0] sm:$0xff]  }
 0x221   : > { %v4060_v32 = vsel %vm9782_vm13, %v4055_v40, %v4059_v6  ;;  %v4078_v9 = vor.u32 %v4077_v12, %v4073_v49  ;;  %v4572_v42 = vrot.slane %v4473_v54, 5  ;;  %v1909_v28 = vshrl.u32 %v1794_v37, 16  ;;  %v1799_v12 = vld [vmem:[#allocation2 + $0x38] sm:$0x1] }
 0x222   : > { %v7496_v14 = vcombine.low %v4050_v2, %v4060_v32  ;;  %v4074_v31 = vsel %vm9782_vm13, %v4069_v13, %v4073_v49  ;;  %v1912_v51 = vshll.u32 %v1794_v37, 16  ;;  %v4570_v52 = vsel %vm9932_vm0, %v7506_v19, %v4569_v46  ;;  %v4475_v13 = vld [vmem:[#allocation2 + $0x1c] sm:$0xf] }
 0x223   : > { %v4079_v18 = vrot.slane %v4078_v9, 4  ;;  %v4571_v30 = vrot.slane %v4569_v46, 4  ;;  %v1918_v56 = vshll.u32 %v1795_v4, 16  ;;  %8048 = vmatpush3.bf16.msra.mxu0 %v8817_v50  ;;  %v1911_v6 = vrot.slane %v1909_v28, 4  ;;  %v4476_v46 = vld [vmem:[#allocation2 + $0x20] sm:$0x1] }
 0x224   : > { %8183 = vmatprep.mubr.bf16.mxu1 %v7496_v14  ;;  %v1914_v44 = vrot.slane %v1912_v51, 5  ;;  %v1922_v1 = vshrl.u32 %v1795_v4, 16  ;;  %v1928_v54 = vshll.u32 %v1796_v27, 16  ;;  %8049 = vmatprep.subr.bf16.mxu0 %v8819_v17  ;;  %v1933_v2 = vshrl.u32 %v1797_v58, 16  ;;  %v4477_v51 = vld [vmem:[#allocation2 + $0x24] sm:$0xe] }
 0x225   : > { %v4084_v37 = vsel %vm9782_vm13, %v4079_v18, %v4083_v63  ;;  %v4573_v40 = vsel %vm9932_vm0, %v4571_v30, %v4572_v42  ;;  %v1920_v49 = vrot.slane %v1918_v56, 5  ;;  %v1936_v14 = vshll.u32 %v1797_v58, 16  ;;  %v8822_v30 = vld [vmem:[#allocation11 + $0xa8] sm:$0xff]  }
 0x226   : > { %v7497_v19 = vcombine.low %v4074_v31, %v4084_v37  ;;  %v7522_v50 = vcombine.low %v4570_v52, %v4573_v40  ;;  %v1915_v32 = vor.u32 %v1914_v44, %v1911_v6  ;;  %v1924_v9 = vrot.slane %v1922_v1, 4  ;;  %v4478_v44 = vld [vmem:[#allocation2 + $0x28] sm:$0xf] }
 0x227   : > { %v1930_v4 = vrot.slane %v1928_v54, 5  ;;  %v1935_v27 = vrot.slane %v1933_v2, 4  ;;  %v1942_v28 = vshll.u32 %v1798_v55, 16  ;;  %8050 = vmatpush3.bf16.msra.mxu0 %v8819_v17  ;;  %v1946_v8 = vshrl.u32 %v1798_v55, 16  ;;  %v4479_v17 = vld [vmem:[#allocation2 + $0x2c] sm:$0x1] }
 0x228   : > { %8184 = vmatmul.mubr.bf16.gmra.mrb[24].mxu1 %v7497_v19  ;;  %v1916_v63 = vrot.slane %v1915_v32, 4  ;;  %v1925_v18 = vor.u32 %v1924_v9, %v1920_v49  ;;  %v1952_v42 = vshll.u32 %v1799_v12, 16  ;;  %8051 = vmatprep.subr.bf16.mxu0 %v8820_v34  ;;  %v1938_v56 = vrot.slane %v1936_v14, 5  ;;  %v1800_v19 = vld [vmem:[#allocation2 + $0x3c] sm:$0xf] }
 0x229   : > { %8203 = vmatprep.mubr.bf16.mxu1 %v7522_v50  ;;  %v1944_v31 = vrot.slane %v1942_v28, 5  ;;  %v7507_v52 = vrot.slane %v4474_v5, 9  ;;  %v4576_v6 = vrot.slane %v4475_v13, 5  ;;  %v1948_v54 = vrot.slane %v1946_v8, 4  ;;  %v1801_v50 = vld [vmem:[#allocation2 + $0x40] sm:$0xf] }
 0x22a   : > { %v1921_v1 = vsel %vm9782_vm13, %v1916_v63, %v1920_v49  ;;  %v1926_v58 = vrot.slane %v1925_v18, 4  ;;  %v1954_v37 = vrot.slane %v1952_v42, 5  ;;  %v1939_v40 = vor.u32 %v1938_v56, %v1935_v27  ;;  %v1802_v49 = vld [vmem:[#allocation2 + $0x44] sm:$0x1]  ;;  %v8812_v14 = vld [vmem:[#allocation11 + $0x188] sm:$0xff]  }
 0x22b   : > { %v4577_v55 = vsel %vm9932_vm0, %v7507_v52, %v4576_v6  ;;  %v4578_v12 = vrot.slane %v4576_v6, 4  ;;  %v4579_v2 = vrot.slane %v4476_v46, 5  ;;  %8052 = vmatpush3.bf16.msra.mxu0 %v8820_v34  ;;  %v1949_v13 = vor.u32 %v1948_v54, %v1944_v31  ;;  %v8823_v8 = vld [vmem:[#allocation11 + $0xb0] sm:$0xff]   ;;  %v1803_v46 = vld [vmem:[#allocation2 + $0x48] sm:$0xf] }
 0x22c   : > { %v1931_v5 = vsel %vm9782_vm13, %v1926_v58, %v1930_v4  ;;  %v7508_v32 = vrot.slane %v4477_v51, 9  ;;  %v4583_v9 = vrot.slane %v4478_v44, 5  ;;  %8053 = vmatprep.subr.bf16.mxu0 %v8822_v30  ;;  %v1940_v27 = vrot.slane %v1939_v40, 4 }
 0x22d   : > { %v7397_v28 = vcombine.low %v1921_v1, %v1931_v5  ;;  %v4580_v63 = vsel %vm9932_vm0, %v4578_v12, %v4579_v2  ;;  %v4586_v18 = vrot.slane %v4479_v17, 5  ;;  %v1950_v42 = vrot.slane %v1949_v13, 4  ;;  %v1804_v1 = vld [vmem:[#allocation2 + $0x4c] sm:$0xf]  ;;  %v4480_v12 = vld [vmem:[#allocation2 + $0x30] sm:$0xe] }
 0x22e   : > { %v7523_v56 = vcombine.low %v4577_v55, %v4580_v63  ;;  %v4584_v34 = vsel %vm9932_vm0, %v7508_v32, %v4583_v9  ;;  %v4585_v4 = vrot.slane %v4583_v9, 4  ;;  %v1945_v51 = vsel %vm9782_vm13, %v1940_v27, %v1944_v31  ;;  %v1805_v55 = vld [vmem:[#allocation2 + $0x50] sm:$0x1]  ;;  %v4481_v13 = vld [vmem:[#allocation2 + $0x34] sm:$0xf]  ;;  %v8813_v9 = vld [vmem:[#allocation11 + $0x190] sm:$0xff]  }
 0x22f   : > { %8016 = vmatmul.mubr.bf16.gmra.mrb[36].mxu0 %v7397_v28  ;;  %v1957_v52 = vshrl.u32 %v1800_v19, 16  ;;  %v1960_v6 = vshll.u32 %v1800_v19, 16  ;;  %v1966_v44 = vshll.u32 %v1801_v50, 16  ;;  %v1955_v58 = vsel %vm9782_vm13, %v1950_v42, %v1954_v37  ;;  %v4482_v32 = vld [vmem:[#allocation2 + $0x38] sm:$0x1]  ;;  %v8825_v37 = vld [vmem:[#allocation11 + $0xb8] sm:$0xff]  }
 0x230   : > { %8204 = vmatmul.mubr.bf16.vlgmr.msra.gmra.mrb[28].mxu1 %v7523_v56  ;;  %v4587_v54 = vsel %vm9932_vm0, %v4585_v4, %v4586_v18  ;;  %v1970_v17 = vshrl.u32 %v1801_v50, 16  ;;  %v1976_v40 = vshll.u32 %v1802_v49, 16  ;;  %8054 = vmatpush3.bf16.msra.mxu0 %v8822_v30  ;;  %v7398_v2 = vcombine.low %v1945_v51, %v1955_v58  ;;  %v4483_v50 = vld [vmem:[#allocation2 + $0x3c] sm:$0xe]  ;;  %v4484_v56 = vld [vmem:[#allocation2 + $0x40] sm:$0xf] }
 0x231   : > { %8236 = vmatpush3.bf16.msra.mxu1 %v9878_v10  ;;  %v7524_v31 = vcombine.low %v4584_v34, %v4587_v54  ;;  %v1959_v5 = vrot.slane %v1957_v52, 4  ;;  %v1962_v19 = vrot.slane %v1960_v6, 5  ;;  %8055 = vmatprep.subr.bf16.mxu0 %v8823_v8  ;;  %v1968_v28 = vrot.slane %v1966_v44, 5  ;;  %v4485_v6 = vld [vmem:[#allocation2 + $0x44] sm:$0x1]  ;;  %v9963_v58 = vld [vmem:[#allocation11 + $0x198] sm:$0xff]  }
 0x232   : > { %v1972_v27 = vrot.slane %v1970_v17, 4  ;;  %v1978_v63 = vrot.slane %v1976_v40, 5  ;;  %v1981_v18 = vshrl.u32 %v1803_v46, 16  ;;  %8237 = vmatprep.subr.bf16.mxu1 %v8812_v14  ;;  %8019 = vmatprep.mubr.bf16.mxu0 %v7398_v2  ;;  %v1984_v49 = vshll.u32 %v1803_v46, 16  ;;  %v9965_v44 = vld [vmem:[#allocation11 + $0xc0] sm:$0xff]  }
 0x233   : > { %8207 = vmatprep.mubr.bf16.mxu1 %v7524_v31  ;;  %v1963_v30 = vor.u32 %v1962_v19, %v1959_v5  ;;  %v1990_v42 = vshll.u32 %v1804_v1, 16  ;;  %v1994_v10 = vshrl.u32 %v1804_v1, 16  ;;  %v2000_v51 = vshll.u32 %v1805_v55, 16 }
 0x234   : > { %v1973_v34 = vor.u32 %v1972_v27, %v1968_v28  ;;  %v1983_v4 = vrot.slane %v1981_v18, 4  ;;  %v7509_v52 = vrot.slane %v4480_v12, 9  ;;  %8056 = vmatpush3.bf16.msra.mxu0 %v8823_v8  ;;  %v1986_v17 = vrot.slane %v1984_v49, 5  ;;  %v1806_v8 = vld [vmem:[#allocation2 + $0x54] sm:$0xf] }
 0x235   : > { %v1964_v54 = vrot.slane %v1963_v30, 4  ;;  %v1992_v40 = vrot.slane %v1990_v42, 5  ;;  %v1996_v2 = vrot.slane %v1994_v10, 4  ;;  %8238 = vmatpush3.bf16.msra.mxu1 %v8812_v14  ;;  %8057 = vmatprep.subr.bf16.mxu0 %v8825_v37  ;;  %v2002_v31 = vrot.slane %v2000_v51, 5  ;;  %v1807_v42 = vld [vmem:[#allocation2 + $0x58] sm:$0xf] }
 0x236   : > { %v1974_v46 = vrot.slane %v1973_v34, 4  ;;  %v4590_v1 = vrot.slane %v4481_v13, 5  ;;  %v4593_v5 = vrot.slane %v4482_v32, 5  ;;  %8239 = vmatprep.subr.bf16.mxu1 %v8813_v9  ;;  %v1987_v12 = vor.u32 %v1986_v17, %v1983_v4  ;;  %v1808_v10 = vld [vmem:[#allocation2 + $0x5c] sm:$0x1] }
 0x237   : > { %v1969_v55 = vsel %vm9782_vm13, %v1964_v54, %v1968_v28  ;;  %v1997_v19 = vor.u32 %v1996_v2, %v1992_v40  ;;  %v7510_v27 = vrot.slane %v4483_v50, 9  ;;  %v4597_v49 = vrot.slane %v4484_v56, 5  ;;  %v1809_v28 = vld [vmem:[#allocation2 + $0x60] sm:$0xf]  ;;  %v1810_v56 = vld [vmem:[#allocation2 + $0x64] sm:$0xf] }
 0x238   : > { %v1979_v18 = vsel %vm9782_vm13, %v1974_v46, %v1978_v63  ;;  %v4591_v30 = vsel %vm9932_vm0, %v7509_v52, %v4590_v1  ;;  %v4592_v14 = vrot.slane %v4590_v1, 4  ;;  %8058 = vmatpush3.bf16.msra.mxu0 %v8825_v37  ;;  %v1988_v32 = vrot.slane %v1987_v12, 4  ;;  %v1811_v17 = vld [vmem:[#allocation2 + $0x68] sm:$0x1]  ;;  %v8818_v2 = vld [vmem:[#allocation11 + $0x1a0] sm:$0xff]  }
 0x239   : > { %v7399_v13 = vcombine.low %v1969_v55, %v1979_v18  ;;  %v1998_v34 = vrot.slane %v1997_v19, 4  ;;  %v4600_v51 = vrot.slane %v4485_v6, 5  ;;  %8240 = vmatpush3.bf16.msra.mxu1 %v8813_v9  ;;  %8091 = vmatprep.subr.bf16.mxu0 %v9965_v44  ;;  %v4598_v63 = vsel %vm9932_vm0, %v7510_v27, %v4597_v49  ;;  %v4486_v12 = vld [vmem:[#allocation2 + $0x48] sm:$0xe] }
 0x23a   : > { %v4594_v50 = vsel %vm9932_vm0, %v4592_v14, %v4593_v5  ;;  %v4599_v4 = vrot.slane %v4597_v49, 4  ;;  %v2005_v52 = vshrl.u32 %v1806_v8, 16  ;;  %8241 = vmatprep.subr.bf16.mxu1 %v9963_v58  ;;  %v1993_v37 = vsel %vm9782_vm13, %v1988_v32, %v1992_v40  ;;  %v4487_v40 = vld [vmem:[#allocation2 + $0x4c] sm:$0xf]  ;;  %v4488_v49 = vld [vmem:[#allocation2 + $0x50] sm:$0x1] }
 0x23b   : > { %8020 = vmatmul.mubr.bf16.gmra.mrb[40].mxu0 %v7399_v13  ;;  %v2003_v9 = vsel %vm9782_vm13, %v1998_v34, %v2002_v31  ;;  %v7525_v6 = vcombine.low %v4591_v30, %v4594_v50  ;;  %v2008_v54 = vshll.u32 %v1806_v8, 16  ;;  %v2014_v55 = vshll.u32 %v1807_v42, 16  ;;  %v4489_v32 = vld [vmem:[#allocation2 + $0x54] sm:$0xe] }
 0x23c   : > { %v7400_v46 = vcombine.low %v1993_v37, %v2003_v9  ;;  %v4601_v1 = vsel %vm9932_vm0, %v4599_v4, %v4600_v51  ;;  %v2007_v5 = vrot.slane %v2005_v52, 4  ;;  %v2018_v18 = vshrl.u32 %v1807_v42, 16  ;;  %v4490_v52 = vld [vmem:[#allocation2 + $0x58] sm:$0xf] }
 0x23d   : > { %8208 = vmatmul.mubr.bf16.gmra.mrb[0].mxu1 %v7525_v6  ;;  %v7526_v19 = vcombine.low %v4598_v63, %v4601_v1  ;;  %v2010_v27 = vrot.slane %v2008_v54, 5  ;;  %v2024_v14 = vshll.u32 %v1808_v10, 16  ;;  %v2016_v31 = vrot.slane %v2014_v55, 5  ;;  %v8821_v63 = vld [vmem:[#allocation11 + $0x1a8] sm:$0xff]   ;;  %v1812_v55 = vld [vmem:[#allocation2 + $0x6c] sm:$0xf] }
 0x23e   : > { %8023 = vmatprep.mubr.bf16.mxu0 %v7400_v46  ;;  %v2029_v30 = vshrl.u32 %v1809_v28, 16  ;;  %v2032_v8 = vshll.u32 %v1809_v28, 16  ;;  %v2038_v13 = vshll.u32 %v1810_v56, 16  ;;  %8242 = vmatpush3.bf16.msra.mxu1 %v9963_v58  ;;  %v2020_v51 = vrot.slane %v2018_v18, 4  ;;  %v4491_v6 = vld [vmem:[#allocation2 + $0x5c] sm:$0x1] }
 0x23f   : > { %8211 = vmatprep.mubr.bf16.mxu1 %v7526_v19  ;;  %v2011_v34 = vor.u32 %v2010_v27, %v2007_v5  ;;  %v2026_v50 = vrot.slane %v2024_v14, 5  ;;  %v2042_v4 = vshrl.u32 %v1810_v56, 16  ;;  %8243 = vmatprep.subr.bf16.mxu1 %v8818_v2  ;;  %v2048_v9 = vshll.u32 %v1811_v17, 16  ;;  %v8824_v27 = vld [vmem:[#allocation11 + $0x1b0] sm:$0xff]  }
 0x240   : > { %v2031_v42 = vrot.slane %v2029_v30, 4  ;;  %v2034_v10 = vrot.slane %v2032_v8, 5  ;;  %v2040_v37 = vrot.slane %v2038_v13, 5  ;;  %v2021_v46 = vor.u32 %v2020_v51, %v2016_v31  ;;  %v1813_v8 = vld [vmem:[#allocation2 + $0x70] sm:$0xf] }
 0x241   : > { %v2012_v54 = vrot.slane %v2011_v34, 4  ;;  %v2044_v28 = vrot.slane %v2042_v4, 4  ;;  %v7511_v1 = vrot.slane %v4486_v12, 9  ;;  %v2050_v58 = vrot.slane %v2048_v9, 5  ;;  %v1814_v51 = vld [vmem:[#allocation2 + $0x74] sm:$0x1] }
 0x242   : > { %v2035_v15 = vor.u32 %v2034_v10, %v2031_v42  ;;  %v4604_v19 = vrot.slane %v4487_v40, 5  ;;  %v4607_v5 = vrot.slane %v4488_v49, 5  ;;  %8244 = vmatpush3.bf16.msra.mxu1 %v8818_v2  ;;  %v2022_v18 = vrot.slane %v2021_v46, 4  ;;  %v1815_v42 = vld [vmem:[#allocation2 + $0x78] sm:$0xf] }
 0x243   : > { %v2017_v56 = vsel %vm9782_vm13, %v2012_v54, %v2016_v31  ;;  %v2045_v14 = vor.u32 %v2044_v28, %v2040_v37  ;;  %v7512_v30 = vrot.slane %v4489_v32, 9  ;;  %8245 = vmatprep.subr.bf16.mxu1 %v8821_v63  ;;  %v4611_v34 = vrot.slane %v4490_v52, 5  ;;  %v1816_v9 = vld [vmem:[#allocation2 + $0x7c] sm:$0xf]  ;;  %v8826_v52 = vld [vmem:[#allocation11 + $0x1b8] sm:$0xff]  }
 0x244   : > { %v2036_v17 = vrot.slane %v2035_v15, 4  ;;  %v4605_v13 = vsel %vm9932_vm0, %v7511_v1, %v4604_v19  ;;  %v4606_v12 = vrot.slane %v4604_v19, 4  ;;  %v2027_v40 = vsel %vm9782_vm13, %v2022_v18, %v2026_v50  ;;  %v1817_v28 = vld [vmem:[#allocation2 + $0x80] sm:$0x1]  ;;  %v4493_v18 = vld [vmem:[#allocation2 + $0x64] sm:$0xf] }
 0x245   : > { %v2046_v2 = vrot.slane %v2045_v14, 4  ;;  %v4614_v49 = vrot.slane %v4491_v6, 5  ;;  %v2053_v4 = vshrl.u32 %v1812_v55, 16  ;;  %v7401_v31 = vcombine.low %v2017_v56, %v2027_v40  ;;  %v4494_v40 = vld [vmem:[#allocation2 + $0x68] sm:$0x1] }
 0x246   : > { %v2041_v32 = vsel %vm9782_vm13, %v2036_v17, %v2040_v37  ;;  %v4608_v15 = vsel %vm9932_vm0, %v4606_v12, %v4607_v5  ;;  %v4612_v10 = vsel %vm9932_vm0, %v7512_v30, %v4611_v34  ;;  %8246 = vmatpush3.bf16.msra.mxu1 %v8821_v63  ;;  %v4613_v6 = vrot.slane %v4611_v34, 4  ;;  %v4492_v5 = vld [vmem:[#allocation2 + $0x60] sm:$0xe] }
 0x247   : > { %v2051_v50 = vsel %vm9782_vm13, %v2046_v2, %v2050_v58  ;;  %v7527_v54 = vcombine.low %v4605_v13, %v4608_v15  ;;  %v2055_v46 = vrot.slane %v2053_v4, 4  ;;  %8247 = vmatprep.subr.bf16.mxu1 %v8824_v27  ;;  %8024 = vmatmul.mubr.bf16.gmra.mrb[44].mxu0 %v7401_v31  ;;  %v2056_v37 = vshll.u32 %v1812_v55, 16  ;;  %v10002_v2 = vld [vmem:[#allocation11 + $0x1c0] sm:$0xff]  }
 0x248   : > { %v7402_v1 = vcombine.low %v2041_v32, %v2051_v50  ;;  %v2062_v19 = vshll.u32 %v1813_v8, 16  ;;  %v2066_v56 = vshrl.u32 %v1813_v8, 16  ;;  %v4615_v63 = vsel %vm9932_vm0, %v4613_v6, %v4614_v49  ;;  %v4495_v32 = vld [vmem:[#allocation2 + $0x6c] sm:$0xe]  ;;  %v4496_v50 = vld [vmem:[#allocation2 + $0x70] sm:$0xf] }
 0x249   : > { %8212 = vmatmul.mubr.bf16.gmra.mrb[4].mxu1 %v7527_v54  ;;  %v2072_v14 = vshll.u32 %v1814_v51, 16  ;;  %v2077_v30 = vshrl.u32 %v1815_v42, 16  ;;  %v2080_v17 = vshll.u32 %v1815_v42, 16  ;;  %v7528_v58 = vcombine.low %v4612_v10, %v4615_v63  ;;  %v4497_v63 = vld [vmem:[#allocation2 + $0x74] sm:$0x1] }
 0x24a   : > { %8027 = vmatprep.mubr.bf16.mxu0 %v7402_v1  ;;  %v2058_v13 = vrot.slane %v2056_v37, 5  ;;  %v2064_v12 = vrot.slane %v2062_v19, 5  ;;  %v2068_v34 = vrot.slane %v2066_v56, 4  ;;  %8248 = vmatpush3.bf16.msra.mxu1 %v8824_v27  ;;  %v2086_v31 = vshll.u32 %v1816_v9, 16 }
 0x24b   : > { %v2074_v55 = vrot.slane %v2072_v14, 5  ;;  %v2079_v8 = vrot.slane %v2077_v30, 4  ;;  %v2082_v4 = vrot.slane %v2080_v17, 5  ;;  %8249 = vmatprep.subr.bf16.mxu1 %v8826_v52  ;;  %8215 = vmatprep.mubr.bf16.mxu1 %v7528_v58  ;;  %v2090_v15 = vshrl.u32 %v1816_v9, 16  ;;  %v1818_v58 = vld [vmem:[#allocation2 + $0x84] sm:$0xf] }
 0x24c   : > { %v2059_v49 = vor.u32 %v2058_v13, %v2055_v46  ;;  %v2069_v51 = vor.u32 %v2068_v34, %v2064_v12  ;;  %v2096_v42 = vshll.u32 %v1817_v28, 16  ;;  %v2088_v54 = vrot.slane %v2086_v31, 5  ;;  %v1819_v13 = vld [vmem:[#allocation2 + $0x88] sm:$0xf]  ;;  %v1820_v34 = vld [vmem:[#allocation2 + $0x8c] sm:$0x1] }
 0x24d   : > { %v2083_v10 = vor.u32 %v2082_v4, %v2079_v8  ;;  %v7513_v6 = vrot.slane %v4492_v5, 9  ;;  %v4618_v1 = vrot.slane %v4493_v18, 5  ;;  %v2092_v19 = vrot.slane %v2090_v15, 4  ;;  %v1821_v31 = vld [vmem:[#allocation2 + $0x90] sm:$0xf] }
 0x24e   : > { %v2060_v37 = vrot.slane %v2059_v49, 4  ;;  %v2070_v27 = vrot.slane %v2069_v51, 4  ;;  %v2098_v56 = vrot.slane %v2096_v42, 5  ;;  %8250 = vmatpush3.bf16.msra.mxu1 %v8826_v52  ;;  %v4621_v46 = vrot.slane %v4494_v40, 5  ;;  %v1822_v42 = vld [vmem:[#allocation2 + $0x94] sm:$0xf] }
 0x24f   : > { %v2084_v14 = vrot.slane %v2083_v10, 4  ;;  %v4619_v30 = vsel %vm9932_vm0, %v7513_v6, %v4618_v1  ;;  %v4620_v17 = vrot.slane %v4618_v1, 4  ;;  %8283 = vmatprep.subr.bf16.mxu1 %v10002_v2  ;;  %v2093_v5 = vor.u32 %v2092_v19, %v2088_v54  ;;  %v1823_v1 = vld [vmem:[#allocation2 + $0x98] sm:$0x1]  ;;  %v4498_v19 = vld [vmem:[#allocation2 + $0x78] sm:$0xe] }
 0x250   : > { %v2065_v9 = vsel %vm9782_vm13, %v2060_v37, %v2064_v12  ;;  %v2075_v28 = vsel %vm9782_vm13, %v2070_v27, %v2074_v55  ;;  %v7514_v18 = vrot.slane %v4495_v32, 9  ;;  %v4625_v4 = vrot.slane %v4496_v50, 5 }
 0x251   : > { %v7403_v52 = vcombine.low %v2065_v9, %v2075_v28  ;;  %v2089_v8 = vsel %vm9782_vm13, %v2084_v14, %v2088_v54  ;;  %v4622_v40 = vsel %vm9932_vm0, %v4620_v17, %v4621_v46  ;;  %v2094_v49 = vrot.slane %v2093_v5, 4  ;;  %v4499_v46 = vld [vmem:[#allocation2 + $0x7c] sm:$0xf]  ;;  %v4500_v9 = vld [vmem:[#allocation2 + $0x80] sm:$0x1] }
 0x252   : > { %v7529_v51 = vcombine.low %v4619_v30, %v4622_v40  ;;  %v4628_v15 = vrot.slane %v4497_v63, 5  ;;  %v2101_v12 = vshrl.u32 %v1818_v58, 16  ;;  %v4626_v55 = vsel %vm9932_vm0, %v7514_v18, %v4625_v4 }
 0x253   : > { %8028 = vmatmul.mubr.bf16.gmra.mrb[48].mxu0 %v7403_v52  ;;  %v4627_v32 = vrot.slane %v4625_v4, 4  ;;  %v2104_v10 = vshll.u32 %v1818_v58, 16  ;;  %v2110_v6 = vshll.u32 %v1819_v13, 16  ;;  %v2099_v54 = vsel %vm9782_vm13, %v2094_v49, %v2098_v56  ;;  %v4501_v52 = vld [vmem:[#allocation2 + $0x84] sm:$0xe] }
 0x254   : > { %8216 = vmatmul.mubr.bf16.gmra.mrb[8].mxu1 %v7529_v51  ;;  %v2103_v37 = vrot.slane %v2101_v12, 4  ;;  %v2114_v50 = vshrl.u32 %v1819_v13, 16  ;;  %v2120_v27 = vshll.u32 %v1820_v34, 16  ;;  %v7404_v14 = vcombine.low %v2089_v8, %v2099_v54  ;;  %v4502_v34 = vld [vmem:[#allocation2 + $0x88] sm:$0xf] }
 0x255   : > { %v4629_v63 = vsel %vm9932_vm0, %v4627_v32, %v4628_v15  ;;  %v2106_v30 = vrot.slane %v2104_v10, 5  ;;  %v2112_v17 = vrot.slane %v2110_v6, 5  ;;  %v2125_v18 = vshrl.u32 %v1821_v31, 16  ;;  %v4503_v12 = vld [vmem:[#allocation2 + $0x8c] sm:$0x1] }
 0x256   : > { %v7530_v28 = vcombine.low %v4626_v55, %v4629_v63  ;;  %v2116_v58 = vrot.slane %v2114_v50, 4  ;;  %v2122_v5 = vrot.slane %v2120_v27, 5  ;;  %8031 = vmatprep.mubr.bf16.mxu0 %v7404_v14  ;;  %v2128_v40 = vshll.u32 %v1821_v31, 16  ;;  %v1824_v54 = vld [vmem:[#allocation2 + $0x9c] sm:$0xf] }
 0x257   : > { %v2107_v56 = vor.u32 %v2106_v30, %v2103_v37  ;;  %v2134_v4 = vshll.u32 %v1822_v42, 16  ;;  %v2138_v13 = vshrl.u32 %v1822_v42, 16  ;;  %v2127_v49 = vrot.slane %v2125_v18, 4  ;;  %v1825_v18 = vld [vmem:[#allocation2 + $0xa0] sm:$0xf] }
 0x258   : > { %8219 = vmatprep.mubr.bf16.mxu1 %v7530_v28  ;;  %v2117_v8 = vor.u32 %v2116_v58, %v2112_v17  ;;  %v2144_v51 = vshll.u32 %v1823_v1, 16  ;;  %v7515_v15 = vrot.slane %v4498_v19, 9  ;;  %v2130_v10 = vrot.slane %v2128_v40, 5 }
 0x259   : > { %v2108_v32 = vrot.slane %v2107_v56, 4  ;;  %v2136_v6 = vrot.slane %v2134_v4, 5  ;;  %v2140_v55 = vrot.slane %v2138_v13, 4  ;;  %v4632_v63 = vrot.slane %v4499_v46, 5 }
 0x25a   : > { %v2118_v50 = vrot.slane %v2117_v8, 4  ;;  %v2146_v27 = vrot.slane %v2144_v51, 5  ;;  %v4635_v14 = vrot.slane %v4500_v9, 5  ;;  %v2131_v42 = vor.u32 %v2130_v10, %v2127_v49  ;;  %v1826_v9 = vld [vmem:[#allocation2 + $0xa4] sm:$0x1] }
 0x25b   : > { %v2113_v31 = vsel %vm9782_vm13, %v2108_v32, %v2112_v17  ;;  %v2141_v37 = vor.u32 %v2140_v55, %v2136_v6  ;;  %v7516_v30 = vrot.slane %v4501_v52, 9  ;;  %v4633_v19 = vsel %vm9932_vm0, %v7515_v15, %v4632_v63  ;;  %v1828_v49 = vld [vmem:[#allocation2 + $0xac] sm:$0xf]  ;;  %v1829_v32 = vld [vmem:[#allocation2 + $0xb0] sm:$0x1] }
 0x25c   : > { %v2123_v1 = vsel %vm9782_vm13, %v2118_v50, %v2122_v5  ;;  %v4634_v28 = vrot.slane %v4632_v63, 4  ;;  %v4639_v58 = vrot.slane %v4502_v34, 5  ;;  %v2132_v40 = vrot.slane %v2131_v42, 4  ;;  %v1827_v5 = vld [vmem:[#allocation2 + $0xa8] sm:$0xf] }
 0x25d   : > { %v7405_v56 = vcombine.low %v2113_v31, %v2123_v1  ;;  %v2142_v4 = vrot.slane %v2141_v37, 4  ;;  %v4642_v46 = vrot.slane %v4503_v12, 5  ;;  %v2149_v8 = vshrl.u32 %v1824_v54, 16  ;;  %v4505_v1 = vld [vmem:[#allocation2 + $0x94] sm:$0xf] }
 0x25e   : > { %v4636_v17 = vsel %vm9932_vm0, %v4634_v28, %v4635_v14  ;;  %v4640_v52 = vsel %vm9932_vm0, %v7516_v30, %v4639_v58  ;;  %v4641_v13 = vrot.slane %v4639_v58, 4  ;;  %v2137_v34 = vsel %vm9782_vm13, %v2132_v40, %v2136_v6  ;;  %v4504_v14 = vld [vmem:[#allocation2 + $0x90] sm:$0xe] }
 0x25f   : > { %8032 = vmatmul.mubr.bf16.gmra.mrb[52].mxu0 %v7405_v56  ;;  %v2147_v51 = vsel %vm9782_vm13, %v2142_v4, %v2146_v27  ;;  %v7531_v15 = vcombine.low %v4633_v19, %v4636_v17  ;;  %v2152_v12 = vshll.u32 %v1824_v54, 16  ;;  %v2151_v50 = vrot.slane %v2149_v8, 4  ;;  %v4506_v54 = vld [vmem:[#allocation2 + $0x98] sm:$0x1] }
 0x260   : > { %v7406_v10 = vcombine.low %v2137_v34, %v2147_v51  ;;  %v4643_v55 = vsel %vm9932_vm0, %v4641_v13, %v4642_v46  ;;  %v2158_v63 = vshll.u32 %v1825_v18, 16  ;;  %v2162_v37 = vshrl.u32 %v1825_v18, 16  ;;  %v4507_v46 = vld [vmem:[#allocation2 + $0x9c] sm:$0xe]  ;;  %v4508_v34 = vld [vmem:[#allocation2 + $0xa0] sm:$0xf] }
 0x261   : > { %8220 = vmatmul.mubr.bf16.gmra.mrb[12].mxu1 %v7531_v15  ;;  %v7532_v31 = vcombine.low %v4640_v52, %v4643_v55  ;;  %v2154_v42 = vrot.slane %v2152_v12, 5  ;;  %v2168_v30 = vshll.u32 %v1826_v9, 16  ;;  %v2173_v28 = vshrl.u32 %v1827_v5, 16  ;;  %v4509_v12 = vld [vmem:[#allocation2 + $0xa4] sm:$0x1] }
 0x262   : > { %8035 = vmatprep.mubr.bf16.mxu0 %v7406_v10  ;;  %v2160_v6 = vrot.slane %v2158_v63, 5  ;;  %v2176_v27 = vshll.u32 %v1827_v5, 16  ;;  %v2182_v19 = vshll.u32 %v1828_v49, 16  ;;  %v2164_v56 = vrot.slane %v2162_v37, 4 }
 0x263   : > { %8223 = vmatprep.mubr.bf16.mxu1 %v7532_v31  ;;  %v2155_v58 = vor.u32 %v2154_v42, %v2151_v50  ;;  %v2170_v40 = vrot.slane %v2168_v30, 5  ;;  %v2186_v4 = vshrl.u32 %v1828_v49, 16  ;;  %v2175_v17 = vrot.slane %v2173_v28, 4  ;;  %v1830_v31 = vld [vmem:[#allocation2 + $0xb4] sm:$0xf] }
 0x264   : > { %v2178_v13 = vrot.slane %v2176_v27, 5  ;;  %v2184_v8 = vrot.slane %v2182_v19, 5  ;;  %v2192_v52 = vshll.u32 %v1829_v32, 16  ;;  %v2165_v9 = vor.u32 %v2164_v56, %v2160_v6  ;;  %v1831_v30 = vld [vmem:[#allocation2 + $0xb8] sm:$0xf] }
 0x265   : > { %v2156_v18 = vrot.slane %v2155_v58, 4  ;;  %v2188_v51 = vrot.slane %v2186_v4, 4  ;;  %v7517_v15 = vrot.slane %v4504_v14, 9  ;;  %v4646_v55 = vrot.slane %v4505_v1, 5  ;;  %v1832_v14 = vld [vmem:[#allocation2 + $0xbc] sm:$0x1] }
 0x266   : > { %v2179_v10 = vor.u32 %v2178_v13, %v2175_v17  ;;  %v2194_v5 = vrot.slane %v2192_v52, 5  ;;  %v4649_v63 = vrot.slane %v4506_v54, 5  ;;  %v2166_v49 = vrot.slane %v2165_v9, 4  ;;  %v4510_v13 = vld [vmem:[#allocation2 + $0xa8] sm:$0xe] }
 0x267   : > { %v2161_v50 = vsel %vm9782_vm13, %v2156_v18, %v2160_v6  ;;  %v2189_v42 = vor.u32 %v2188_v51, %v2184_v8  ;;  %v7518_v37 = vrot.slane %v4507_v46, 9  ;;  %v4647_v32 = vsel %vm9932_vm0, %v7517_v15, %v4646_v55  ;;  %v4511_v52 = vld [vmem:[#allocation2 + $0xac] sm:$0xf]  ;;  %v4512_v51 = vld [vmem:[#allocation2 + $0xb0] sm:$0x1] }
 0x268   : > { %v2180_v28 = vrot.slane %v2179_v10, 4  ;;  %v4648_v27 = vrot.slane %v4646_v55, 4  ;;  %v4653_v19 = vrot.slane %v4508_v34, 5  ;;  %v2171_v58 = vsel %vm9782_vm13, %v2166_v49, %v2170_v40  ;;  %v4514_v15 = vld [vmem:[#allocation2 + $0xb8] sm:$0xf] }
 0x269   : > { %v2190_v1 = vrot.slane %v2189_v42, 4  ;;  %v4656_v54 = vrot.slane %v4509_v12, 5  ;;  %v2197_v56 = vshrl.u32 %v1830_v31, 16  ;;  %v7407_v4 = vcombine.low %v2161_v50, %v2171_v58  ;;  %v4513_v50 = vld [vmem:[#allocation2 + $0xb4] sm:$0xe] }
 0x26a   : > { %v2185_v6 = vsel %vm9782_vm13, %v2180_v28, %v2184_v8  ;;  %v4650_v46 = vsel %vm9932_vm0, %v4648_v27, %v4649_v63  ;;  %v4654_v17 = vsel %vm9932_vm0, %v7518_v37, %v4653_v19  ;;  %v4655_v40 = vrot.slane %v4653_v19, 4  ;;  %v2606_v63 = vld [vmem:[#allocation2] sm:$0xe] }
 0x26b   : > { %v2195_v34 = vsel %vm9782_vm13, %v2190_v1, %v2194_v5  ;;  %v7533_v18 = vcombine.low %v4647_v32, %v4650_v46  ;;  %v2199_v9 = vrot.slane %v2197_v56, 4  ;;  %8036 = vmatmul.mubr.bf16.gmra.mrb[56].mxu0 %v7407_v4  ;;  %v2200_v10 = vshll.u32 %v1830_v31, 16  ;;  %v4515_v5 = vld [vmem:[#allocation2 + $0xbc] sm:$0x1]  ;;  %v2607_v32 = vld [vmem:[#allocation2 + $0x4] sm:$0xf] }
 0x26c   : > { %v7408_v12 = vcombine.low %v2185_v6, %v2195_v34  ;;  %v2206_v8 = vshll.u32 %v1831_v30, 16  ;;  %v2210_v55 = vshrl.u32 %v1831_v30, 16  ;;  %v4657_v49 = vsel %vm9932_vm0, %v4655_v40, %v4656_v54  ;;  %v2608_v56 = vld [vmem:[#allocation2 + $0x8] sm:$0x1] }
 0x26d   : > { %8224 = vmatmul.mubr.bf16.gmra.mrb[16].mxu1 %v7533_v18  ;;  %v2216_v42 = vshll.u32 %v1832_v14, 16  ;;  %v7519_v37 = vrot.slane %v4510_v13, 9  ;;  %v4660_v28 = vrot.slane %v4511_v52, 5  ;;  %v7534_v27 = vcombine.low %v4654_v17, %v4657_v49  ;;  %v2610_v18 = vld [vmem:[#allocation2 + $0x10] sm:$0xf] }
 0x26e   : > { %8039 = vmatprep.mubr.bf16.mxu0 %v7408_v12  ;;  %v2202_v19 = vrot.slane %v2200_v10, 5  ;;  %v2208_v58 = vrot.slane %v2206_v8, 5  ;;  %v2212_v1 = vrot.slane %v2210_v55, 4  ;;  %v4663_v30 = vrot.slane %v4512_v51, 5 }
 0x26f   : > { %v2218_v31 = vrot.slane %v2216_v42, 5  ;;  %v4662_v4 = vrot.slane %v4660_v28, 4  ;;  %8227 = vmatprep.mubr.bf16.mxu1 %v7534_v27  ;;  %v4661_v54 = vsel %vm9932_vm0, %v7519_v37, %v4660_v28  ;;  %v4667_v14 = vrot.slane %v4514_v15, 5  ;;  %v2611_v42 = vld [vmem:[#allocation2 + $0x14] sm:$0x1] }
 0x270   : > { %v2203_v6 = vor.u32 %v2202_v19, %v2199_v9  ;;  %v2213_v46 = vor.u32 %v2212_v1, %v2208_v58  ;;  %v7520_v52 = vrot.slane %v4513_v50, 9  ;;  %v7418_v34 = vrot.slane %v2606_v63, 9  ;;  %v2613_v37 = vld [vmem:[#allocation2 + $0x1c] sm:$0xf]  ;;  %v2609_v63 = vld [vmem:[#allocation2 + $0xc] sm:$0xe] }
 0x271   : > { %v4664_v13 = vsel %vm9932_vm0, %v4662_v4, %v4663_v30  ;;  %v2707_v17 = vrot.slane %v2607_v32, 5  ;;  %v4670_v8 = vrot.slane %v4515_v5, 5  ;;  %v4669_v55 = vrot.slane %v4667_v14, 4  ;;  %v2614_v32 = vld [vmem:[#allocation2 + $0x20] sm:$0x1] }
 0x272   : > { %v2204_v40 = vrot.slane %v2203_v6, 4  ;;  %v2214_v12 = vrot.slane %v2213_v46, 4  ;;  %v7535_v10 = vcombine.low %v4661_v54, %v4664_v13  ;;  %v2710_v49 = vrot.slane %v2608_v56, 5  ;;  %v4516_v27 = vld [vmem:[#allocation2 + $0xc0] sm:$0xe] }
 0x273   : > { %v2708_v9 = vsel %vm9932_vm0, %v7418_v34, %v2707_v17  ;;  %v2709_v51 = vrot.slane %v2707_v17, 4  ;;  %v2714_v28 = vrot.slane %v2610_v18, 5  ;;  %v4668_v5 = vsel %vm9932_vm0, %v7520_v52, %v4667_v14  ;;  %v4517_v4 = vld [vmem:[#allocation2 + $0xc4] sm:$0xf]  ;;  %v4518_v46 = vld [vmem:[#allocation2 + $0xc8] sm:$0x1] }
 0x274   : > { %v2209_v15 = vsel %vm9782_vm13, %v2204_v40, %v2208_v58  ;;  %v2219_v50 = vsel %vm9782_vm13, %v2214_v12, %v2218_v31  ;;  %v4671_v1 = vsel %vm9932_vm0, %v4669_v55, %v4670_v8  ;;  %v2721_v31 = vrot.slane %v2613_v37, 5  ;;  %v2616_v54 = vld [vmem:[#allocation2 + $0x28] sm:$0xf]  ;;  %v2612_v34 = vld [vmem:[#allocation2 + $0x18] sm:$0xe] }
 0x275   : > { %v7409_v19 = vcombine.low %v2209_v15, %v2219_v50  ;;  %8228 = vmatmul.mubr.bf16.gmra.mrb[20].mxu1 %v7535_v10  ;;  %v2711_v56 = vsel %vm9932_vm0, %v2709_v51, %v2710_v49  ;;  %v7536_v58 = vcombine.low %v4668_v5, %v4671_v1  ;;  %v2716_v6 = vrot.slane %v2714_v28, 4  ;;  %v2619_v14 = vld [vmem:[#allocation2 + $0x34] sm:$0xf]  ;;  %v8827_v1 = vld [vmem:[#allocation2 + $0x18] sm:$0xff]  }
 0x276   : > { %v7434_v30 = vcombine.low %v2708_v9, %v2711_v56  ;;  %v2717_v13 = vrot.slane %v2611_v42, 5  ;;  %v4674_v17 = vrot.slane %v4517_v4, 5  ;;  %v7419_v52 = vrot.slane %v2609_v63, 9  ;;  %v2620_v4 = vld [vmem:[#allocation2 + $0x38] sm:$0x1] }
 0x277   : > { %8040 = vmatmul.mubr.bf16.gmra.mrb[60].mxu0 %v7409_v19  ;;  %8231 = vmatprep.mubr.bf16.mxu1 %v7536_v58  ;;  %v2723_v18 = vrot.slane %v2721_v31, 4  ;;  %v2724_v40 = vrot.slane %v2614_v32, 5  ;;  %v7521_v12 = vrot.slane %v4516_v27, 9  ;;  %v4677_v55 = vrot.slane %v4518_v46, 5  ;;  %v2617_v19 = vld [vmem:[#allocation2 + $0x2c] sm:$0x1] }
 0x278   : > { %8059 = vmatprep.mubr.bf16.mxu0 %v7434_v30  ;;  %v2718_v10 = vsel %vm9932_vm0, %v2716_v6, %v2717_v13  ;;  %v4676_v8 = vrot.slane %v4674_v17, 4  ;;  %v2728_v9 = vrot.slane %v2616_v54, 5  ;;  %v7420_v51 = vrot.slane %v2612_v34, 9  ;;  %v8841_v58 = vld [vmem:[#allocation11 + $0xc8] sm:$0xff]   ;;  %v2622_v6 = vld [vmem:[#allocation2 + $0x40] sm:$0xf] }
 0x279   : > { %v2725_v49 = vsel %vm9932_vm0, %v2723_v18, %v2724_v40  ;;  %v2735_v37 = vrot.slane %v2619_v14, 5  ;;  %v2715_v42 = vsel %vm9932_vm0, %v7419_v52, %v2714_v28  ;;  %v4675_v15 = vsel %vm9932_vm0, %v7521_v12, %v4674_v17  ;;  %v2615_v28 = vld [vmem:[#allocation2 + $0x24] sm:$0xe]  ;;  %v2618_v54 = vld [vmem:[#allocation2 + $0x30] sm:$0xe] }
 0x27a   : > { %v4678_v50 = vsel %vm9932_vm0, %v4676_v8, %v4677_v55  ;;  %v7435_v63 = vcombine.low %v2715_v42, %v2718_v10  ;;  %v2722_v32 = vsel %vm9932_vm0, %v7420_v51, %v2721_v31  ;;  %v2730_v56 = vrot.slane %v2728_v9, 4  ;;  %v2625_v13 = vld [vmem:[#allocation2 + $0x4c] sm:$0xf]  ;;  %v8842_v52 = vld [vmem:[#allocation11 + $0xd0] sm:$0xff]  }
 0x27b   : > { %v7537_v27 = vcombine.low %v4675_v15, %v4678_v50  ;;  %v7436_v5 = vcombine.low %v2722_v32, %v2725_v49  ;;  %v2737_v30 = vrot.slane %v2735_v37, 4  ;;  %v2731_v46 = vrot.slane %v2617_v19, 5  ;;  %v2623_v51 = vld [vmem:[#allocation2 + $0x44] sm:$0x1]  ;;  %v8831_v49 = vld [vmem:[#allocation11 + $0x1c8] sm:$0xff]  }
 0x27c   : > { %v2738_v34 = vrot.slane %v2620_v4, 5  ;;  %v7421_v31 = vrot.slane %v2615_v28, 9  ;;  %v2742_v14 = vrot.slane %v2622_v6, 5  ;;  %v7422_v18 = vrot.slane %v2618_v54, 9  ;;  %v8830_v15 = vld [vmem:[#allocation2 + $0x30] sm:$0xff]   ;;  %v8834_v4 = vld [vmem:[#allocation11 + $0x1d0] sm:$0xff]  }
 0x27d   : > { %8232 = vmatmul.mubr.bf16.gmra.mrb[24].mxu1 %v7537_v27  ;;  %v2732_v17 = vsel %vm9932_vm0, %v2730_v56, %v2731_v46  ;;  %v2749_v12 = vrot.slane %v2625_v13, 5  ;;  %v2621_v32 = vld [vmem:[#allocation2 + $0x3c] sm:$0xe]  ;;  %v2628_v19 = vld [vmem:[#allocation2 + $0x58] sm:$0xf] }
 0x27e   : > { %8251 = vmatprep.mubr.bf16.mxu1 %v8827_v1  ;;  %v2739_v40 = vsel %vm9932_vm0, %v2737_v30, %v2738_v34  ;;  %v2729_v10 = vsel %vm9932_vm0, %v7421_v31, %v2728_v9  ;;  %v2736_v55 = vsel %vm9932_vm0, %v7422_v18, %v2735_v37  ;;  %v2744_v50 = vrot.slane %v2742_v14, 4  ;;  %v2624_v37 = vld [vmem:[#allocation2 + $0x48] sm:$0xe]  ;;  %v2631_v1 = vld [vmem:[#allocation2 + $0x64] sm:$0xf]  ;;  %v8832_v13 = vld [vmem:[#allocation2 + $0x3c] sm:$0xff]  }
 0x27f   : > { %8060 = vmatmul.mubr.bf16.vlgmr.msra.gmra.mrb[32].mxu0 %v7435_v63  ;;  %v7437_v8 = vcombine.low %v2729_v10, %v2732_v17  ;;  %v7438_v42 = vcombine.low %v2736_v55, %v2739_v40  ;;  %v2626_v63 = vld [vmem:[#allocation2 + $0x50] sm:$0x1]  ;;  %v2751_v27 = vrot.slane %v2749_v12, 4  ;;  %v2745_v9 = vrot.slane %v2623_v51, 5  ;;  %v359_v34 = vld [vmem:[#allocation2 + $0xcc] sm:$0x1] }
 0x280   : > { %8063 = vmatprep.mubr.bf16.mxu0 %v7436_v5  ;;  %8092 = vmatpush3.bf16.msra.mxu0 %v9965_v44  ;;  %v8829_v44 = vld [vmem:[#allocation2 + $0x24] sm:$0xff]   ;;  %v2752_v56 = vrot.slane %v2626_v63, 5  ;;  %v2756_v30 = vrot.slane %v2628_v19, 5  ;;  %v7424_v6 = vrot.slane %v2624_v37, 9  ;;  %v2763_v54 = vrot.slane %v2631_v1, 5 }
 0x281   : > { %8093 = vmatprep.subr.bf16.mxu0 %v8841_v58  ;;  %v8846_v5 = vld [vmem:[#allocation11 + $0xd8] sm:$0xff]   ;;  %v2746_v28 = vsel %vm9932_vm0, %v2744_v50, %v2745_v9  ;;  %v2629_v40 = vld [vmem:[#allocation2 + $0x5c] sm:$0x1]  ;;  %v2630_v50 = vld [vmem:[#allocation2 + $0x60] sm:$0xe] }
 0x282   : > { %v2753_v46 = vsel %vm9932_vm0, %v2751_v27, %v2752_v56  ;;  %v2750_v17 = vsel %vm9932_vm0, %v7424_v6, %v2749_v12  ;;  %v8833_v18 = vld [vmem:[#allocation2 + $0x48] sm:$0xff]   ;;  %v2758_v55 = vrot.slane %v2756_v30, 4  ;;  %v2759_v12 = vrot.slane %v2629_v40, 5  ;;  %v2637_v63 = vld [vmem:[#allocation2 + $0x7c] sm:$0xf] }
 0x283   : > { %v7440_v10 = vcombine.low %v2750_v17, %v2753_v46  ;;  %v8838_v51 = vld [vmem:[#allocation11 + $0x1d8] sm:$0xff]   ;;  %v8843_v9 = vld [vmem:[#allocation11 + $0x1e0] sm:$0xff]   ;;  %v7426_v7 = vrot.slane %v2630_v50, 9  ;;  %v2777_v1 = vrot.slane %v2637_v63, 5  ;;  %v2638_v17 = vld [vmem:[#allocation2 + $0x80] sm:$0x1] }
 0x284   : > { %8094 = vmatpush3.bf16.msra.mxu0 %v8841_v58  ;;  %v7423_v58 = vrot.slane %v2621_v32, 9  ;;  %v2760_v19 = vsel %vm9932_vm0, %v2758_v55, %v2759_v12  ;;  %v2635_v6 = vld [vmem:[#allocation2 + $0x74] sm:$0x1]  ;;  %v10112_v46 = vld [vmem:[#allocation2 + $0x88] sm:$0xf] }
 0x285   : > { %8095 = vmatprep.subr.bf16.mxu0 %v8842_v52  ;;  %8252 = vmatmul.mubr.bf16.vlgmr.msra.gmra.mrb[28].mxu1 %v8829_v44  ;;  %v2632_v44 = vld [vmem:[#allocation2 + $0x68] sm:$0x1]  ;;  %v2779_v40 = vrot.slane %v2777_v1, 4  ;;  %v2643_v55 = vld [vmem:[#allocation2 + $0x94] sm:$0xf] }
 0x286   : > { %8284 = vmatpush3.bf16.msra.mxu1 %v10002_v2  ;;  %8255 = vmatprep.mubr.bf16.mxu1 %v8830_v15  ;;  %v2743_v2 = vsel %vm9932_vm0, %v7423_v58, %v2742_v14  ;;  %v2765_v14 = vrot.slane %v2763_v54, 4  ;;  %v360_v15 = vsel %vm9398_vm4, 0, %v359_v34  ;;  %v2766_v32 = vrot.slane %v2632_v44, 5  ;;  %v8836_v34 = vld [vmem:[#allocation2 + $0x60] sm:$0xff]   ;;  %v2641_v12 = vld [vmem:[#allocation2 + $0x8c] sm:$0x1] }
 0x287   : > { %8064 = vmatmul.mubr.bf16.gmra.mrb[36].mxu0 %v7437_v8  ;;  %8285 = vmatprep.subr.bf16.mxu1 %v8831_v49  ;;  %v7439_v31 = vcombine.low %v2743_v2, %v2746_v28  ;;  %v2627_v8 = vld [vmem:[#allocation2 + $0x54] sm:$0xe]  ;;  %361 = vst [vmem:[#allocation2 + $0xcc] sm:$0x1] %v360_v15  ;;  %v2764_v28 = vsel %vm9932_vm0, %v7426_v7, %v2763_v54  ;;  %v8852_v2 = vld [vmem:[#allocation11 + $0xf0] sm:$0xff]   ;;  %v2773_v54 = vrot.slane %v2635_v6, 5 }
 0x288   : > { %8067 = vmatprep.mubr.bf16.mxu0 %v7438_v42  ;;  %8096 = vmatpush3.bf16.msra.mxu0 %v8842_v52  ;;  %v8847_v52 = vld [vmem:[#allocation11 + $0xe0] sm:$0xff]   ;;  %v7425_v27 = vrot.slane %v2627_v8, 9  ;;  %v2767_v37 = vsel %vm9932_vm0, %v2765_v14, %v2766_v32  ;;  %v2784_v8 = vrot.slane %v10112_v46, 5  ;;  %v2780_v44 = vrot.slane %v2638_v17, 5  ;;  %v2644_v46 = vld [vmem:[#allocation2 + $0x98] sm:$0x1] }
 0x289   : > { %8097 = vmatprep.subr.bf16.mxu0 %v8846_v5  ;;  %v10099_v42 = vld [vmem:[#allocation2 + $0x70] sm:$0xf]  ;;  %v2791_v50 = vrot.slane %v2643_v55, 5  ;;  %v2787_v6 = vrot.slane %v2641_v12, 5  ;;  %v8844_v12 = vld [vmem:[#allocation2 + $0x84] sm:$0xff]  }
 0x28a   : > { %8286 = vmatpush3.bf16.msra.mxu1 %v8831_v49  ;;  %v8851_v49 = vld [vmem:[#allocation11 + $0xe8] sm:$0xff]   ;;  %v2757_v56 = vsel %vm9932_vm0, %v7425_v27, %v2756_v30  ;;  %v2633_v30 = vld [vmem:[#allocation2 + $0x6c] sm:$0xe]  ;;  %v2781_v15 = vsel %vm9932_vm0, %v2779_v40, %v2780_v44 }
 0x28b   : > { %8287 = vmatprep.subr.bf16.mxu1 %v8834_v4  ;;  %v7441_v58 = vcombine.low %v2757_v56, %v2760_v19  ;;  %v8839_v32 = vld [vmem:[#allocation2 + $0x6c] sm:$0xff]   ;;  %v8840_v27 = vld [vmem:[#allocation2 + $0x78] sm:$0xff]   ;;  %v2639_v19 = vld [vmem:[#allocation2 + $0x84] sm:$0xe] }
 0x28c   : > { %8098 = vmatpush3.bf16.msra.mxu0 %v8846_v5  ;;  %v2770_v5 = vrot.slane %v10099_v42, 5  ;;  %v8854_v42 = vld [vmem:[#allocation11 + $0x1f0] sm:$0xff]   ;;  %v2642_v56 = vld [vmem:[#allocation2 + $0x90] sm:$0xe]  ;;  %v5516_v40 = vld [vmem:[#allocation2 + $0x18] sm:$0xf] }
 0x28d   : > { %8256 = vmatmul.mubr.bf16.gmra.mrb[0].mxu1 %v8832_v13  ;;  %8099 = vmatprep.subr.bf16.mxu0 %v8847_v52  ;;  %v7442_v13 = vcombine.low %v2764_v28, %v2767_v37  ;;  %v2645_v44 = vld [vmem:[#allocation2 + $0x9c] sm:$0xe] }
 0x28e   : > { %8259 = vmatprep.mubr.bf16.mxu1 %v8833_v18  ;;  %8288 = vmatpush3.bf16.msra.mxu1 %v8834_v4  ;;  %v8835_v4 = vld [vmem:[#allocation2 + $0x54] sm:$0xff]  }
 0x28f   : > { %8068 = vmatmul.mubr.bf16.gmra.mrb[40].mxu0 %v7439_v31  ;;  %8289 = vmatprep.subr.bf16.mxu1 %v8838_v51  ;;  %v2772_v31 = vrot.slane %v2770_v5, 4  ;;  %v8848_v18 = vld [vmem:[#allocation11 + $0x1e8] sm:$0xff]  }
 0x290   : > { %8071 = vmatprep.mubr.bf16.mxu0 %v7440_v10  ;;  %8100 = vmatpush3.bf16.msra.mxu0 %v8847_v52  ;;  %v8857_v52 = vld [vmem:[#allocation11 + $0xf8] sm:$0xff]   ;;  %v2636_v10 = vld [vmem:[#allocation2 + $0x78] sm:$0xe] }
 0x291   : > { %8101 = vmatprep.subr.bf16.mxu0 %v8851_v49  ;;  %v2774_v14 = vsel %vm9932_vm0, %v2772_v31, %v2773_v54 }
 0x292   : > { %8290 = vmatpush3.bf16.msra.mxu1 %v8838_v51  ;;  %v7427_v51 = vrot.slane %v2633_v30, 9  ;;  %v2794_v30 = vrot.slane %v2644_v46, 5 }
 0x293   : > { %8291 = vmatprep.subr.bf16.mxu1 %v8843_v9 }
 0x294   : > { %8102 = vmatpush3.bf16.msra.mxu0 %v8851_v49  ;;  %v7428_v49 = vrot.slane %v2636_v10, 9  ;;  %v2771_v63 = vsel %vm9932_vm0, %v7427_v51, %v2770_v5  ;;  %v8860_v5 = vld [vmem:[#allocation11 + $0x1f8] sm:$0xff]   ;;  %v10131_v10 = vld [vmem:[#allocation11 + $0x100] sm:$0xff]  }
 0x295   : > { %8260 = vmatmul.mubr.bf16.gmra.mrb[4].mxu1 %v8835_v4  ;;  %8103 = vmatprep.subr.bf16.mxu0 %v8852_v2  ;;  %v7443_v7 = vcombine.low %v2771_v63, %v2774_v14  ;;  %v10123_v4 = vld [vmem:[#allocation2 + $0xa0] sm:$0xf]  ;;  %v10136_v51 = vld [vmem:[#allocation11 + $0x200] sm:$0xff]   ;;  %v5519_v14 = vld [vmem:[#allocation2 + $0x24] sm:$0xf] }
 0x296   : > { %8263 = vmatprep.mubr.bf16.mxu1 %v8836_v34  ;;  %8292 = vmatpush3.bf16.msra.mxu1 %v8843_v9  ;;  %v2786_v9 = vrot.slane %v2784_v8, 4  ;;  %v2778_v37 = vsel %vm9932_vm0, %v7428_v49, %v2777_v1  ;;  %v7429_v34 = vrot.slane %v2639_v19, 9  ;;  %v2798_v31 = vrot.slane %v10123_v4, 5  ;;  %v2647_v63 = vld [vmem:[#allocation2 + $0xa4] sm:$0x1] }
 0x297   : > { %8072 = vmatmul.mubr.bf16.gmra.mrb[44].mxu0 %v7441_v58  ;;  %8293 = vmatprep.subr.bf16.mxu1 %v8848_v18  ;;  %v10125_v58 = vld [vmem:[#allocation2 + $0xac] sm:$0xf]  ;;  %v7444_v28 = vcombine.low %v2778_v37, %v2781_v15  ;;  %v5568_v37 = vshll.u32 %v5516_v40, 16  ;;  %v5592_v46 = vshll.u32 %v5519_v14, 16 }
 0x298   : > { %8075 = vmatprep.mubr.bf16.mxu0 %v7442_v13  ;;  %8104 = vmatpush3.bf16.msra.mxu0 %v8852_v2  ;;  %v5517_v2 = vld [vmem:[#allocation2 + $0x1c] sm:$0xf]  ;;  %v2793_v13 = vrot.slane %v2791_v50, 4  ;;  %v2788_v1 = vsel %vm9932_vm0, %v2786_v9, %v2787_v6  ;;  %v10700_v17 = vrot.slane %v10125_v58, 5  ;;  %v2785_v55 = vsel %vm9932_vm0, %v7429_v34, %v2784_v8  ;;  %v2650_v8 = vld [vmem:[#allocation2 + $0xb0] sm:$0x1] }
 0x299   : > { %8105 = vmatprep.subr.bf16.mxu0 %v8857_v52  ;;  %v5578_v54 = vshrl.u32 %v5517_v2, 16  ;;  %v7445_v49 = vcombine.low %v2785_v55, %v2788_v1  ;;  %v2800_v19 = vrot.slane %v2798_v31, 4  ;;  %v5589_v6 = vshrl.u32 %v5519_v14, 16 }
 0x29a   : > { %8294 = vmatpush3.bf16.msra.mxu1 %v8848_v18  ;;  %v7430_v18 = vrot.slane %v2642_v56, 9  ;;  %v2807_v9 = vrot.slane %v10700_v17, 4  ;;  %v10146_v56 = vld [vmem:[#allocation2 + $0xb8] sm:$0xf]  ;;  %v2801_v34 = vrot.slane %v2647_v63, 5  ;;  %v5570_v14 = vrot.slane %v5568_v37, 5 }
 0x29b   : > { %8295 = vmatprep.subr.bf16.mxu1 %v8854_v42  ;;  %v5522_v17 = vld [vmem:[#allocation2 + $0x30] sm:$0xf]  ;;  %v5518_v63 = vld [vmem:[#allocation2 + $0x20] sm:$0x1]  ;;  %v10748_v37 = vrot.slane %v10125_v58, 5 }
 0x29c   : > { %8106 = vmatpush3.bf16.msra.mxu0 %v8857_v52  ;;  %v5574_v52 = vshll.u32 %v5517_v2, 16  ;;  %v2792_v15 = vsel %vm9932_vm0, %v7430_v18, %v2791_v50 }
 0x29d   : > { %8264 = vmatmul.mubr.bf16.gmra.mrb[8].mxu1 %v8839_v32  ;;  %8139 = vmatprep.subr.bf16.mxu0 %v10131_v10  ;;  %v2648_v32 = vld [vmem:[#allocation2 + $0xa8] sm:$0xe] }
 0x29e   : > { %8267 = vmatprep.mubr.bf16.mxu1 %v8840_v27  ;;  %8296 = vmatpush3.bf16.msra.mxu1 %v8854_v42  ;;  %v2795_v42 = vsel %vm9932_vm0, %v2793_v13, %v2794_v30  ;;  %v5520_v27 = vld [vmem:[#allocation2 + $0x28] sm:$0xf]  ;;  %v10148_v50 = vrot.slane %v5574_v52, 5  ;;  %v8845_v13 = vld [vmem:[#allocation2 + $0x90] sm:$0xff]   ;;  %v7431_v30 = vrot.slane %v2645_v44, 9  ;;  %v7432_v55 = vrot.slane %v2648_v32, 9 }
 0x29f   : > { %8076 = vmatmul.mubr.bf16.gmra.mrb[48].mxu0 %v7443_v7  ;;  %8297 = vmatprep.subr.bf16.mxu1 %v8860_v5  ;;  %v5565_v7 = vshrl.u32 %v5516_v40, 16  ;;  %v7446_v2 = vcombine.low %v2792_v15, %v2795_v42  ;;  %v5598_v1 = vshll.u32 %v5520_v27, 16  ;;  %v5602_v18 = vshrl.u32 %v5520_v27, 16  ;;  %v5523_v15 = vld [vmem:[#allocation2 + $0x34] sm:$0xf] }
 0x2a0   : > { %8079 = vmatprep.mubr.bf16.mxu0 %v7444_v28  ;;  %v5580_v28 = vrot.slane %v5578_v54, 4  ;;  %v2808_v40 = vrot.slane %v2650_v8, 5  ;;  %v2812_v52 = vrot.slane %v10146_v56, 5  ;;  %v5591_v44 = vrot.slane %v5589_v6, 4  ;;  %v2653_v56 = vld [vmem:[#allocation2 + $0xbc] sm:$0x1] }
 0x2a1   : > { %v5567_v54 = vrot.slane %v5565_v7, 4  ;;  %v10157_v32 = vrot.slane %v5598_v1, 5  ;;  %v5604_v27 = vrot.slane %v5602_v18, 4  ;;  %v5613_v8 = vshrl.u32 %v5522_v17, 16  ;;  %v8849_v1 = vld [vmem:[#allocation2 + $0x9c] sm:$0xff]  }
 0x2a2   : > { %8298 = vmatpush3.bf16.msra.mxu1 %v8860_v5  ;;  %v2802_v5 = vsel %vm9932_vm0, %v2800_v19, %v2801_v34  ;;  %v2809_v42 = vsel %vm9932_vm0, %v2807_v9, %v2808_v40  ;;  %v5626_v19 = vshrl.u32 %v5523_v15, 16  ;;  %v2799_v7 = vsel %vm9932_vm0, %v7431_v30, %v2798_v31 }
 0x2a3   : > { %8331 = vmatprep.subr.bf16.mxu1 %v10136_v51  ;;  %v2806_v9 = vsel %vm9932_vm0, %v7432_v55, %v10748_v37  ;;  %v5584_v6 = vshll.u32 %v5518_v63, 16  ;;  %v2814_v18 = vrot.slane %v2812_v52, 4  ;;  %v5605_v38 = vor.u32 %v5604_v27, %v10157_v32  ;;  %v5524_v55 = vld [vmem:[#allocation2 + $0x38] sm:$0x1]  ;;  %v5525_v63 = vld [vmem:[#allocation2 + $0x3c] sm:$0xf] }
 0x2a4   : > { %v7448_v34 = vcombine.low %v2806_v9, %v2809_v42  ;;  %v5615_v31 = vrot.slane %v5613_v8, 4  ;;  %v2815_v58 = vrot.slane %v2653_v56, 5  ;;  %v5637_v56 = vshrl.u32 %v5525_v63, 16 }
 0x2a5   : > { %8268 = vmatmul.mubr.bf16.gmra.mrb[12].mxu1 %v8844_v12  ;;  %v5594_v12 = vrot.slane %v5592_v46, 5  ;;  %v7447_v46 = vcombine.low %v2799_v7, %v2802_v5  ;;  %v5606_v8 = vrot.slane %v5605_v38, 4  ;;  %v5632_v7 = vshll.u32 %v5524_v55, 16 }
 0x2a6   : > { %8271 = vmatprep.mubr.bf16.mxu1 %v8845_v13  ;;  %v5622_v13 = vshll.u32 %v5523_v15, 16  ;;  %v8850_v15 = vld [vmem:[#allocation2 + $0xa8] sm:$0xff]   ;;  %v5640_v55 = vshll.u32 %v5525_v63, 16 }
 0x2a7   : > { %8080 = vmatmul.mubr.bf16.gmra.mrb[52].mxu0 %v7445_v49  ;;  %v5581_v49 = vor.u32 %v5580_v28, %v10148_v50  ;;  %v5571_v28 = vor.u32 %v5570_v14, %v5567_v54  ;;  %v5595_v40 = vor.u32 %v5594_v12, %v5591_v44  ;;  %v5628_v54 = vrot.slane %v5626_v19, 4 }
 0x2a8   : > { %8083 = vmatprep.mubr.bf16.mxu0 %v7446_v2  ;;  %v5616_v2 = vshll.u32 %v5522_v17, 16  ;;  %v5521_v17 = vld [vmem:[#allocation2 + $0x2c] sm:$0x1]  ;;  %v10168_v37 = vrot.slane %v5622_v13, 5  ;;  %v5586_v14 = vrot.slane %v5584_v6, 5  ;;  %v7433_v44 = vrot.slane %v2651_v16, 9 }
 0x2a9   : > { %v5582_v4 = vrot.slane %v5581_v49, 4  ;;  %v5572_v5 = vrot.slane %v5571_v28, 4  ;;  %v5608_v42 = vshll.u32 %v5521_v17, 16  ;;  %v2816_v49 = vsel %vm9932_vm0, %v2814_v18, %v2815_v58  ;;  %v5526_v13 = vld [vmem:[#allocation2 + $0x40] sm:$0xf]  ;;  %v8853_v6 = vld [vmem:[#allocation2 + $0xc] sm:$0xff]  }
 0x2aa   : > { %v5618_v30 = vrot.slane %v5616_v2, 5  ;;  %v5596_v12 = vrot.slane %v5595_v40, 4  ;;  %v2813_v19 = vsel %vm9932_vm0, %v7433_v44, %v2812_v52  ;;  %v5629_v9 = vor.u32 %v5628_v54, %v10168_v37  ;;  %v8855_v16 = vld [vmem:[#allocation2 + $0xb4] sm:$0xff]   ;;  %v10185_v17 = vld [vmem:[#allocation2 + $0x44] sm:$0x1] }
 0x2ab   : > { %v5587_v27 = vsel %vm9782_vm13, %v5582_v4, %v5586_v14  ;;  %v7449_v28 = vcombine.low %v2813_v19, %v2816_v49  ;;  %v5646_v52 = vshll.u32 %v5526_v13, 16  ;;  %v5650_v40 = vshrl.u32 %v5526_v13, 16  ;;  %v5532_v4 = vld [vmem:[#allocation2 + $0x58] sm:$0xf]  ;;  %v5535_v54 = vld [vmem:[#allocation2 + $0x64] sm:$0xf] }
 0x2ac   : > { %v5619_v2 = vor.u32 %v5618_v30, %v5615_v31  ;;  %v5601_v38 = vsel %vm9782_vm13, %v5596_v12, %v10157_v32  ;;  %v8856_v31 = vld [vmem:[#allocation2 + $0xc0] sm:$0xff]   ;;  %v10195_v32 = vrot.slane %v5637_v56, 4  ;;  %v5531_v44 = vld [vmem:[#allocation2 + $0x54] sm:$0xf]  ;;  %v5718_v13 = vshll.u32 %v5535_v54, 16 }
 0x2ad   : > { %8272 = vmatmul.mubr.bf16.gmra.mrb[16].mxu1 %v8849_v1  ;;  %v5529_v1 = vld [vmem:[#allocation2 + $0x4c] sm:$0xf]  ;;  %v5652_v63 = vrot.slane %v5650_v40, 4  ;;  %v5722_v19 = vshrl.u32 %v5535_v54, 16  ;;  %v5685_v56 = vshrl.u32 %v5531_v44, 16 }
 0x2ae   : > { %8275 = vmatprep.mubr.bf16.mxu1 %v8850_v15  ;;  %v5528_v15 = vld [vmem:[#allocation2 + $0x48] sm:$0xf]  ;;  %v10189_v58 = vrot.slane %v5619_v2, 4  ;;  %v5670_v14 = vshll.u32 %v5529_v1, 16  ;;  %v5534_v2 = vld [vmem:[#allocation2 + $0x60] sm:$0xf] }
 0x2af   : > { %8084 = vmatmul.mubr.bf16.gmra.mrb[56].mxu0 %v7447_v46  ;;  %v5577_v46 = vsel %vm9782_vm13, %v5572_v5, %v10148_v50  ;;  %v10191_v50 = vrot.slane %v5632_v7, 5  ;;  %v10193_v5 = vrot.slane %v5629_v9, 4  ;;  %v5661_v49 = vshrl.u32 %v5528_v15, 16 }
 0x2b0   : > { %8087 = vmatprep.mubr.bf16.mxu0 %v7448_v34  ;;  %v5610_v34 = vrot.slane %v5608_v42, 5  ;;  %v10180_v18 = vcombine.low %v5577_v46, %v5587_v27  ;;  %v5674_v42 = vshrl.u32 %v5529_v1, 16  ;;  %v5664_v12 = vshll.u32 %v5528_v15, 16  ;;  %v8861_v46 = vld [vmem:[#allocation2 + $0xcc] sm:$0xff]  }
 0x2b1   : > { %v5694_v27 = vshll.u32 %v5532_v4, 16  ;;  %v10197_v7 = vrot.slane %v5646_v52, 5  ;;  %v5656_v9 = vshll.u32 %v10185_v17, 16  ;;  %v5709_v1 = vshrl.u32 %v5534_v2, 16 }
 0x2b2   : > { %v5611_v30 = vsel %vm9782_vm13, %v5606_v8, %v5610_v34  ;;  %v5698_v8 = vshrl.u32 %v5532_v4, 16  ;;  %v10200_v34 = vrot.slane %v5670_v14, 5  ;;  %v5663_v15 = vrot.slane %v5661_v49, 4 }
 0x2b3   : > { %v5666_v45 = vrot.slane %v5664_v12, 5  ;;  %v10202_v4 = vrot.slane %v5694_v27, 5  ;;  %v7571_v40 = vcombine.low %v5601_v38, %v5611_v30  ;;  %v5653_v54 = vor.u32 %v5652_v63, %v10197_v7  ;;  %v5537_v38 = vld [vmem:[#allocation2 + $0x6c] sm:$0xf] }
 0x2b4   : > { %v5700_v52 = vrot.slane %v5698_v8, 4  ;;  %v10205_v23 = vrot.slane %v5718_v13, 5  ;;  %v5724_v17 = vrot.slane %v5722_v19, 4  ;;  %v5625_v14 = vsel %vm9782_vm13, %v10189_v58, %v10168_v37  ;;  %v5533_v8 = vld [vmem:[#allocation2 + $0x5c] sm:$0x1] }
 0x2b5   : > { %8276 = vmatmul.mubr.bf16.gmra.mrb[20].mxu1 %v8855_v16  ;;  %v5688_v16 = vshll.u32 %v5531_v44, 16  ;;  %v8859_v44 = vld [vmem:[#allocation2 + $0x24] sm:$0xff]   ;;  %v5687_v49 = vrot.slane %v5685_v56, 4  ;;  %v5538_v13 = vld [vmem:[#allocation2 + $0x70] sm:$0xf]  ;;  %v5658_v37 = vrot.slane %v5656_v9, 5  ;;  %v5667_v58 = vor.u32 %v5666_v45, %v5663_v15 }
 0x2b6   : > { %8279 = vmatprep.mubr.bf16.mxu1 %v8856_v31  ;;  %v5712_v31 = vshll.u32 %v5534_v2, 16  ;;  %v5711_v2 = vrot.slane %v5709_v1, 4  ;;  %v5654_v56 = vrot.slane %v5653_v54, 4  ;;  %v5746_v1 = vshrl.u32 %v5538_v13, 16 }
 0x2b7   : > { %8088 = vmatmul.mubr.bf16.gmra.mrb[60].mxu0 %v7449_v28  ;;  %v5642_v28 = vrot.slane %v5640_v55, 5  ;;  %v5530_v55 = vld [vmem:[#allocation2 + $0x50] sm:$0x1]  ;;  %v5690_v12 = vrot.slane %v5688_v16, 5  ;;  %v5668_v54 = vrot.slane %v5667_v58, 4 }
 0x2b8   : > { %8107 = vmatprep.mubr.bf16.mxu0 %v8853_v6  ;;  %v5676_v6 = vrot.slane %v5674_v42, 4  ;;  %v5635_v42 = vsel %vm9782_vm13, %v10193_v5, %v10191_v50  ;;  %v5714_v63 = vrot.slane %v5712_v31, 5  ;;  %v5680_v19 = vshll.u32 %v5530_v55, 16  ;;  %v5536_v5 = vld [vmem:[#allocation2 + $0x68] sm:$0x1]  ;;  %v8886_v31 = vld [vmem:[#allocation11 + $0x108] sm:$0xff]  }
 0x2b9   : > { %v5643_v30 = vor.u32 %v5642_v28, %v10195_v32  ;;  %v5701_v50 = vor.u32 %v5700_v52, %v10202_v4  ;;  %v5733_v32 = vshrl.u32 %v5537_v38, 16  ;;  %v5736_v28 = vshll.u32 %v5537_v38, 16  ;;  %v8862_v55 = vld [vmem:[#allocation2 + $0x30] sm:$0xff]   ;;  %v8863_v52 = vld [vmem:[#allocation2 + $0x3c] sm:$0xff]  }
 0x2ba   : > { %v5677_v27 = vor.u32 %v5676_v6, %v10200_v34  ;;  %v5691_v16 = vor.u32 %v5690_v12, %v5687_v49  ;;  %v5742_v6 = vshll.u32 %v5538_v13, 16  ;;  %v5715_v45 = vor.u32 %v5714_v63, %v5711_v2  ;;  %v5541_v63 = vld [vmem:[#allocation2 + $0x7c] sm:$0xf] }
 0x2bb   : > { %v5728_v15 = vshll.u32 %v5536_v5, 16  ;;  %v5682_v3 = vrot.slane %v5680_v19, 5  ;;  %v5735_v12 = vrot.slane %v5733_v32, 4  ;;  %v5738_v38 = vrot.slane %v5736_v28, 5  ;;  %v8887_v5 = vld [vmem:[#allocation11 + $0x110] sm:$0xff]  }
 0x2bc   : > { %v5678_v9 = vrot.slane %v5677_v27, 4  ;;  %v5692_v13 = vrot.slane %v5691_v16, 4  ;;  %v10223_v27 = vrot.slane %v5742_v6, 5  ;;  %v5748_v2 = vrot.slane %v5746_v1, 4  ;;  %v5544_v32 = vld [vmem:[#allocation2 + $0x88] sm:$0xf] }
 0x2bd   : > { %8280 = vmatmul.mubr.bf16.gmra.mrb[24].mxu1 %v8861_v46  ;;  %v5704_v46 = vshll.u32 %v5533_v8, 16  ;;  %v5540_v8 = vld [vmem:[#allocation2 + $0x78] sm:$0xf]  ;;  %v5730_v58 = vrot.slane %v5728_v15, 5  ;;  %v5739_v28 = vor.u32 %v5738_v38, %v5735_v12  ;;  %v5543_v15 = vld [vmem:[#allocation2 + $0x84] sm:$0xf] }
 0x2be   : > { %8299 = vmatprep.mubr.bf16.mxu1 %v10180_v18  ;;  %v5644_v18 = vrot.slane %v5643_v30, 4  ;;  %v5760_v16 = vshll.u32 %v5540_v8, 16  ;;  %v5749_v1 = vor.u32 %v5748_v2, %v10223_v27  ;;  %v5546_v12 = vld [vmem:[#allocation2 + $0x90] sm:$0xf] }
 0x2bf   : > { %8108 = vmatmul.mubr.bf16.vlgmr.msra.gmra.mrb[32].mxu0 %v8858_v47  ;;  %v5725_v47 = vor.u32 %v5724_v17, %v10205_v23  ;;  %v5702_v17 = vrot.slane %v5701_v50, 4  ;;  %v5706_v30 = vrot.slane %v5704_v46, 5  ;;  %v5673_v50 = vsel %vm9782_vm13, %v5668_v54, %v10200_v34  ;;  %v5547_v46 = vld [vmem:[#allocation2 + $0x94] sm:$0xf] }
 0x2c0   : > { %8111 = vmatprep.mubr.bf16.mxu0 %v8859_v44  ;;  %8140 = vmatpush3.bf16.msra.mxu0 %v10131_v10  ;;  %v7572_v44 = vcombine.low %v5625_v14, %v5635_v42  ;;  %v5659_v10 = vsel %vm9782_vm13, %v5654_v56, %v5658_v37  ;;  %v5649_v14 = vsel %vm9782_vm13, %v5644_v18, %v10197_v7  ;;  %v5716_v37 = vrot.slane %v5715_v45, 4  ;;  %v8870_v56 = vld [vmem:[#allocation11 + $0x210] sm:$0xff]   ;;  %v5539_v7 = vld [vmem:[#allocation2 + $0x74] sm:$0x1]  ;;  %v8865_v18 = vld [vmem:[#allocation2 + $0x48] sm:$0xff]  }
 0x2c1   : > { %8141 = vmatprep.subr.bf16.mxu0 %v8886_v31  ;;  %v5726_v49 = vrot.slane %v5725_v47, 4  ;;  %v5683_v42 = vsel %vm9782_vm13, %v5678_v9, %v5682_v3  ;;  %v7573_v19 = vcombine.low %v5649_v14, %v5659_v10  ;;  %v5757_v47 = vshrl.u32 %v5540_v8, 16  ;;  %v8866_v54 = vld [vmem:[#allocation2 + $0x54] sm:$0xff]  }
 0x2c2   : > { %v7574_v6 = vcombine.low %v5673_v50, %v5683_v42  ;;  %v5697_v34 = vsel %vm9782_vm13, %v5692_v13, %v10202_v4  ;;  %v5721_v45 = vsel %vm9782_vm13, %v5716_v37, %v10205_v23  ;;  %v8873_v4 = vld [vmem:[#allocation11 + $0x218] sm:$0xff]   ;;  %v5752_v10 = vshll.u32 %v5539_v7, 16  ;;  %v5550_v37 = vld [vmem:[#allocation2 + $0xa0] sm:$0xf] }
 0x2c3   : > { %v5731_v3 = vsel %vm9782_vm13, %v5726_v49, %v5730_v58  ;;  %v10249_v49 = vld [vmem:[#allocation2 + $0x80] sm:$0x1]  ;;  %v5814_v38 = vshll.u32 %v5547_v46, 16  ;;  %v5818_v8 = vshrl.u32 %v5547_v46, 16  ;;  %v10251_v13 = vrot.slane %v5739_v28, 4  ;;  %v8889_v46 = vld [vmem:[#allocation11 + $0x120] sm:$0xff]  }
 0x2c4   : > { %8142 = vmatpush3.bf16.msra.mxu0 %v8886_v31  ;;  %v5770_v31 = vshrl.u32 %v5541_v63, 16  ;;  %v5759_v23 = vrot.slane %v5757_v47, 4  ;;  %v5781_v14 = vshrl.u32 %v5543_v15, 16  ;;  %v5784_v42 = vshll.u32 %v5543_v15, 16  ;;  %v8868_v15 = vld [vmem:[#allocation2 + $0x60] sm:$0xff]  }
 0x2c5   : > { %8143 = vmatprep.subr.bf16.mxu0 %v8887_v5  ;;  %8300 = vmatmul.mubr.bf16.vlgmr.msra.gmra.mrb[28].mxu1 %v7571_v40  ;;  %v5707_v40 = vsel %vm9782_vm13, %v5702_v17, %v5706_v30  ;;  %v10247_v17 = vcombine.low %v5721_v45, %v5731_v3  ;;  %v5762_v30 = vrot.slane %v5760_v16, 5  ;;  %v10259_v47 = vrot.slane %v5814_v38, 5 }
 0x2c6   : > { %8332 = vmatpush3.bf16.msra.mxu1 %v10136_v51  ;;  %8303 = vmatprep.mubr.bf16.mxu1 %v7572_v44  ;;  %v5766_v51 = vshll.u32 %v5541_v63, 16  ;;  %v10242_v9 = vcombine.low %v5697_v34, %v5707_v40  ;;  %v8888_v44 = vld [vmem:[#allocation11 + $0x118] sm:$0xff]   ;;  %v5549_v63 = vld [vmem:[#allocation2 + $0x9c] sm:$0xf]  ;;  %v5805_v40 = vshrl.u32 %v5546_v12, 16  ;;  %v5820_v3 = vrot.slane %v5818_v8, 4 }
 0x2c7   : > { %8112 = vmatmul.mubr.bf16.gmra.mrb[36].mxu0 %v8862_v55  ;;  %8333 = vmatprep.subr.bf16.mxu1 %v8867_v60  ;;  %v5790_v55 = vshll.u32 %v5544_v32, 16  ;;  %v5829_v7 = vshrl.u32 %v5549_v63, 16  ;;  %v5832_v28 = vshll.u32 %v5549_v63, 16  ;;  %v10261_v16 = vrot.slane %v5752_v10, 5 }
 0x2c8   : > { %8115 = vmatprep.mubr.bf16.mxu0 %v8863_v52  ;;  %8144 = vmatpush3.bf16.msra.mxu0 %v8887_v5  ;;  %v5794_v52 = vshrl.u32 %v5544_v32, 16  ;;  %v10253_v2 = vrot.slane %v5766_v51, 5  ;;  %v10255_v5 = vrot.slane %v5749_v1, 4  ;;  %v5808_v32 = vshll.u32 %v5546_v12, 16  ;;  %v5548_v12 = vld [vmem:[#allocation2 + $0x98] sm:$0x1] }
 0x2c9   : > { %8145 = vmatprep.subr.bf16.mxu0 %v8888_v44  ;;  %v10257_v58 = vrot.slane %v5790_v55, 5  ;;  %v5776_v51 = vshll.u32 %v10249_v49, 16  ;;  %v5842_v34 = vshrl.u32 %v5550_v37, 16  ;;  %v5763_v1 = vor.u32 %v5762_v30, %v5759_v23  ;;  %v8890_v49 = vld [vmem:[#allocation11 + $0x128] sm:$0xff]   ;;  %v5553_v23 = vld [vmem:[#allocation2 + $0xac] sm:$0xf] }
 0x2ca   : > { %8334 = vmatpush3.bf16.msra.mxu1 %v8867_v60  ;;  %v5772_v60 = vrot.slane %v5770_v31, 4  ;;  %v5796_v50 = vrot.slane %v5794_v52, 4  ;;  %v8876_v31 = vld [vmem:[#allocation11 + $0x220] sm:$0xff]   ;;  %v5786_v45 = vrot.slane %v5784_v42, 5  ;;  %v5545_v52 = vld [vmem:[#allocation2 + $0x8c] sm:$0x1]  ;;  %v5821_v38 = vor.u32 %v5820_v3, %v10259_v47 }
 0x2cb   : > { %8335 = vmatprep.subr.bf16.mxu1 %v8870_v56  ;;  %v5810_v10 = vrot.slane %v5808_v32, 5  ;;  %v5831_v8 = vrot.slane %v5829_v7, 4  ;;  %v5844_v63 = vrot.slane %v5842_v34, 4  ;;  %v415_v42 = vld [vmem:[#allocation2 + $0xd4] sm:$0x1]  ;;  %v5862_v34 = vshll.u32 %v5553_v23, 16 }
 0x2cc   : > { %8146 = vmatpush3.bf16.msra.mxu0 %v8888_v44  ;;  %v5773_v55 = vor.u32 %v5772_v60, %v10253_v2  ;;  %v5797_v44 = vor.u32 %v5796_v50, %v10257_v58  ;;  %v5764_v50 = vrot.slane %v5763_v1, 4  ;;  %v5866_v1 = vshrl.u32 %v5553_v23, 16 }
 0x2cd   : > { %8304 = vmatmul.mubr.bf16.gmra.mrb[0].mxu1 %v7573_v19  ;;  %8147 = vmatprep.subr.bf16.mxu0 %v8889_v46  ;;  %v5838_v19 = vshll.u32 %v5550_v37, 16  ;;  %v8869_v37 = vld [vmem:[#allocation2 + $0x6c] sm:$0xff]  }
 0x2ce   : > { %8307 = vmatprep.mubr.bf16.mxu1 %v7574_v6  ;;  %8336 = vmatpush3.bf16.msra.mxu1 %v8870_v56  ;;  %v5745_v6 = vsel %vm9782_vm13, %v10251_v13, %v10223_v27  ;;  %v5552_v56 = vld [vmem:[#allocation2 + $0xa8] sm:$0xf]  ;;  %v5755_v27 = vsel %vm9782_vm13, %v10255_v5, %v10261_v16  ;;  %v5834_v13 = vrot.slane %v5832_v28, 5  ;;  %v8879_v5 = vld [vmem:[#allocation11 + $0x228] sm:$0xff]   ;;  %v5774_v3 = vrot.slane %v5773_v55, 4 }
 0x2cf   : > { %8116 = vmatmul.mubr.bf16.gmra.mrb[40].mxu0 %v8865_v18  ;;  %8337 = vmatprep.subr.bf16.mxu1 %v8873_v4  ;;  %v5783_v18 = vrot.slane %v5781_v14, 4  ;;  %v10275_v30 = vrot.slane %v5838_v19, 5  ;;  %v5853_v60 = vshrl.u32 %v5552_v56, 16  ;;  %v5856_v14 = vshll.u32 %v5552_v56, 16  ;;  %v5551_v19 = vld [vmem:[#allocation2 + $0xa4] sm:$0x1] }
 0x2d0   : > { %8119 = vmatprep.mubr.bf16.mxu0 %v8866_v54  ;;  %8148 = vmatpush3.bf16.msra.mxu0 %v8889_v46  ;;  %v5807_v54 = vrot.slane %v5805_v40, 4  ;;  %v5778_v40 = vrot.slane %v5776_v51, 5  ;;  %v5800_v46 = vshll.u32 %v5545_v52, 16  ;;  %v5798_v7 = vrot.slane %v5797_v44, 4 }
 0x2d1   : > { %8149 = vmatprep.subr.bf16.mxu0 %v8890_v49  ;;  %v5787_v32 = vor.u32 %v5786_v45, %v5783_v18  ;;  %v5824_v28 = vshll.u32 %v5548_v12, 16  ;;  %v5822_v16 = vrot.slane %v5821_v38, 4  ;;  %v416_v51 = vsel %vm9432_vm6, 0, %v415_v42  ;;  %v8892_v12 = vld [vmem:[#allocation11 + $0x138] sm:$0xff]   ;;  %v8871_v38 = vld [vmem:[#allocation2 + $0x78] sm:$0xff]  }
 0x2d2   : > { %8338 = vmatpush3.bf16.msra.mxu1 %v8873_v4  ;;  %v5811_v4 = vor.u32 %v5810_v10, %v5807_v54  ;;  %v5835_v18 = vor.u32 %v5834_v13, %v5831_v8  ;;  %v5845_v45 = vor.u32 %v5844_v63, %v10275_v30  ;;  %v5855_v56 = vrot.slane %v5853_v60, 4  ;;  %417 = vst [vmem:[#allocation2 + $0xd4] sm:$0x1] %v416_v51  ;;  %v5559_v51 = vld [vmem:[#allocation2 + $0xc4] sm:$0xf] }
 0x2d3   : > { %8339 = vmatprep.subr.bf16.mxu1 %v8876_v31  ;;  %v7577_v55 = vcombine.low %v5745_v6, %v5755_v27  ;;  %v5788_v52 = vrot.slane %v5787_v32, 4  ;;  %v5802_v44 = vrot.slane %v5800_v46, 5  ;;  %v5779_v54 = vsel %vm9782_vm13, %v5774_v3, %v5778_v40  ;;  %v8872_v40 = vld [vmem:[#allocation2 + $0x84] sm:$0xff]  }
 0x2d4   : > { %8150 = vmatpush3.bf16.msra.mxu0 %v8890_v49  ;;  %v5812_v26 = vrot.slane %v5811_v4, 4  ;;  %v5826_v10 = vrot.slane %v5824_v28, 5  ;;  %v3653_v49 = vld [vmem:[#allocation2 + $0xc] sm:$0xf]  ;;  %v5769_v8 = vsel %vm9782_vm13, %v5764_v50, %v10253_v2  ;;  %v10289_v27 = vrot.slane %v5862_v34, 5 }
 0x2d5   : > { %8308 = vmatmul.mubr.bf16.gmra.mrb[4].mxu1 %v10242_v9  ;;  %v5858_v9 = vrot.slane %v5856_v14, 5  ;;  %v5803_v6 = vsel %vm9782_vm13, %v5798_v7, %v5802_v44  ;;  %v5868_v13 = vrot.slane %v5866_v1, 4  ;;  %v5836_v63 = vrot.slane %v5835_v18, 4  ;;  %v5554_v14 = vld [vmem:[#allocation2 + $0xb0] sm:$0x1]  ;;  %v8882_v3 = vld [vmem:[#allocation11 + $0x238] sm:$0xff]  }
 0x2d6   : > { %8311 = vmatprep.mubr.bf16.mxu1 %v10247_v17  ;;  %8340 = vmatpush3.bf16.msra.mxu1 %v8876_v31  ;;  %v8881_v17 = vld [vmem:[#allocation11 + $0x230] sm:$0xff]   ;;  %v5848_v31 = vshll.u32 %v5551_v19, 16  ;;  %v5827_v23 = vsel %vm9782_vm13, %v5822_v16, %v5826_v10  ;;  %v5846_v60 = vrot.slane %v5845_v45, 4  ;;  %v7578_v32 = vcombine.low %v5769_v8, %v5779_v54  ;;  %v5556_v28 = vld [vmem:[#allocation2 + $0xb8] sm:$0xf] }
 0x2d7   : > { %8120 = vmatmul.mubr.bf16.gmra.mrb[44].mxu0 %v8868_v15  ;;  %v8891_v15 = vld [vmem:[#allocation11 + $0x130] sm:$0xff]   ;;  %8341 = vmatprep.subr.bf16.mxu1 %v8879_v5  ;;  %v5859_v42 = vor.u32 %v5858_v9, %v5855_v56  ;;  %v5793_v2 = vsel %vm9782_vm13, %v5788_v52, %v10257_v58  ;;  %v3702_v50 = vshrl.u32 %v3653_v49, 16  ;;  %v3705_v46 = vshll.u32 %v3653_v49, 16  ;;  %v5555_v1 = vld [vmem:[#allocation2 + $0xb4] sm:$0xf] }
 0x2d8   : > { %8123 = vmatprep.mubr.bf16.mxu0 %v8869_v37  ;;  %8151 = vmatprep.subr.bf16.mxu0 %v8891_v15  ;;  %v3654_v37 = vld [vmem:[#allocation2 + $0x10] sm:$0xf]  ;;  %v7579_v7 = vcombine.low %v5793_v2, %v5803_v6  ;;  %v5850_v4 = vrot.slane %v5848_v31, 5  ;;  %v5869_v19 = vor.u32 %v5868_v13, %v10289_v27  ;;  %v5872_v58 = vshll.u32 %v5554_v14, 16  ;;  %v5558_v54 = vld [vmem:[#allocation2 + $0xc0] sm:$0xf] }
 0x2d9   : > { %8152 = vmatpush3.bf16.msra.mxu0 %v8891_v15  ;;  %v3711_v34 = vshll.u32 %v3654_v37, 16  ;;  %v5841_v18 = vsel %vm9782_vm13, %v5836_v63, %v10275_v30  ;;  %v10305_v56 = vrot.slane %v5859_v42, 4  ;;  %v3715_v9 = vshrl.u32 %v3654_v37, 16  ;;  %v8874_v49 = vld [vmem:[#allocation2 + $0x90] sm:$0xff]   ;;  %v5561_v14 = vld [vmem:[#allocation2 + $0xcc] sm:$0xf] }
 0x2da   : > { %8153 = vmatprep.subr.bf16.mxu0 %v8892_v12  ;;  %8342 = vmatpush3.bf16.msra.mxu1 %v8879_v5  ;;  %v5817_v5 = vsel %vm9782_vm13, %v5812_v26, %v10259_v47  ;;  %v5851_v45 = vsel %vm9782_vm13, %v5846_v60, %v5850_v4  ;;  %v10307_v47 = vld [vmem:[#allocation2 + $0x14] sm:$0x1]  ;;  %v10309_v15 = vrot.slane %v3702_v50, 4  ;;  %v5886_v52 = vshll.u32 %v5556_v28, 16  ;;  %v5562_v13 = vld [vmem:[#allocation2 + $0xd0] sm:$0xf] }
 0x2db   : > { %8343 = vmatprep.subr.bf16.mxu1 %v8881_v17  ;;  %v7580_v16 = vcombine.low %v5817_v5, %v5827_v23  ;;  %v5890_v44 = vshrl.u32 %v5556_v28, 16  ;;  %v5877_v26 = vshrl.u32 %v5555_v1, 16  ;;  %v5880_v10 = vshll.u32 %v5555_v1, 16  ;;  %v8875_v42 = vld [vmem:[#allocation2 + $0x9c] sm:$0xff]  }
 0x2dc   : > { %v5910_v30 = vshll.u32 %v5559_v51, 16  ;;  %v5914_v31 = vshrl.u32 %v5559_v51, 16  ;;  %v5874_v8 = vrot.slane %v5872_v58, 5  ;;  %v10313_v6 = vrot.slane %v3711_v34, 5  ;;  %v3657_v28 = vld [vmem:[#allocation2 + $0x1c] sm:$0xf] }
 0x2dd   : > { %8154 = vmatpush3.bf16.msra.mxu0 %v8892_v12  ;;  %8312 = vmatmul.mubr.bf16.gmra.mrb[8].mxu1 %v7577_v55  ;;  %v10311_v55 = vrot.slane %v3705_v46, 5  ;;  %v7581_v12 = vcombine.low %v5841_v18, %v5851_v45  ;;  %v3721_v23 = vshll.u32 %v10307_v47, 16  ;;  %v5901_v63 = vshrl.u32 %v5558_v54, 16 }
 0x2de   : > { %8315 = vmatprep.mubr.bf16.mxu1 %v7578_v32  ;;  %8344 = vmatpush3.bf16.msra.mxu1 %v8881_v17  ;;  %v3717_v17 = vrot.slane %v3715_v9, 4  ;;  %v5904_v60 = vshll.u32 %v5558_v54, 16  ;;  %v5865_v37 = vsel %vm9782_vm13, %v10305_v56, %v10289_v27  ;;  %v5557_v32 = vld [vmem:[#allocation2 + $0xbc] sm:$0x1]  ;;  %v10322_v2 = vrot.slane %v5886_v52, 5 }
 0x2df   : > { %8124 = vmatmul.mubr.bf16.gmra.mrb[48].mxu0 %v8871_v38  ;;  %8345 = vmatprep.subr.bf16.mxu1 %v8882_v3  ;;  %v5870_v38 = vrot.slane %v5869_v19, 4  ;;  %v5892_v50 = vrot.slane %v5890_v44, 4  ;;  %v5879_v46 = vrot.slane %v5877_v26, 4  ;;  %v5882_v5 = vrot.slane %v5880_v10, 5  ;;  %v3656_v19 = vld [vmem:[#allocation2 + $0x18] sm:$0xf] }
 0x2e0   : > { %8127 = vmatprep.mubr.bf16.mxu0 %v8872_v40  ;;  %v3708_v40 = vor.u32 %v10311_v55, %v10309_v15  ;;  %v10324_v4 = vrot.slane %v5910_v30, 5  ;;  %v5925_v58 = vshrl.u32 %v5561_v14, 16  ;;  %v5928_v27 = vshll.u32 %v5561_v14, 16  ;;  %v5560_v9 = vld [vmem:[#allocation2 + $0xc8] sm:$0x1] }
 0x2e1   : > { %v5934_v34 = vshll.u32 %v5562_v13, 16  ;;  %v5938_v1 = vshrl.u32 %v5562_v13, 16  ;;  %v5875_v51 = vsel %vm9782_vm13, %v5870_v38, %v5874_v8  ;;  %v3718_v18 = vor.u32 %v3717_v17, %v10313_v6 }
 0x2e2   : > { %8346 = vmatpush3.bf16.msra.mxu1 %v8882_v3  ;;  %v5916_v3 = vrot.slane %v5914_v31, 4  ;;  %v5903_v45 = vrot.slane %v5901_v63, 4  ;;  %v5893_v56 = vor.u32 %v5892_v50, %v10322_v2  ;;  %v5896_v47 = vshll.u32 %v5557_v32, 16  ;;  %v5563_v63 = vld [vmem:[#allocation2 + $0xd4] sm:$0x1] }
 0x2e3   : > { %v3735_v15 = vshll.u32 %v3657_v28, 16  ;;  %v3739_v55 = vshrl.u32 %v3657_v28, 16  ;;  %v5883_v52 = vor.u32 %v5882_v5, %v5879_v46  ;;  %v3726_v44 = vshrl.u32 %v3656_v19, 16 }
 0x2e4   : > { %v3729_v54 = vshll.u32 %v3656_v19, 16  ;;  %v5927_v26 = vrot.slane %v5925_v58, 4  ;;  %v5930_v10 = vrot.slane %v5928_v27, 5  ;;  %v10331_v30 = vrot.slane %v5934_v34, 5  ;;  %v3658_v19 = vld [vmem:[#allocation2 + $0x20] sm:$0x1] }
 0x2e5   : > { %8316 = vmatmul.mubr.bf16.gmra.mrb[12].mxu1 %v7579_v7  ;;  %v5906_v7 = vrot.slane %v5904_v60, 5  ;;  %v5940_v31 = vrot.slane %v5938_v1, 4  ;;  %v7582_v38 = vcombine.low %v5865_v37, %v5875_v51  ;;  %v3723_v8 = vrot.slane %v3721_v23, 5  ;;  %v8878_v60 = vld [vmem:[#allocation2 + $0xb4] sm:$0xff]   ;;  %v6335_v34 = vld [vmem:[#allocation2 + $0x1c] sm:$0xf] }
 0x2e6   : > { %8319 = vmatprep.mubr.bf16.mxu1 %v7580_v16  ;;  %v5917_v16 = vor.u32 %v5916_v3, %v10324_v4  ;;  %v5920_v17 = vshll.u32 %v5560_v9, 16  ;;  %v3719_v14 = vrot.slane %v3718_v18, 4  ;;  %v3737_v32 = vrot.slane %v3735_v15, 5 }
 0x2e7   : > { %8128 = vmatmul.mubr.bf16.gmra.mrb[52].mxu0 %v8874_v49  ;;  %v8877_v49 = vld [vmem:[#allocation2 + $0xa8] sm:$0xff]   ;;  %v5907_v13 = vor.u32 %v5906_v7, %v5903_v45  ;;  %v3741_v50 = vrot.slane %v3739_v55, 4  ;;  %v5884_v46 = vrot.slane %v5883_v52, 4  ;;  %v5898_v5 = vrot.slane %v5896_v47, 5 }
 0x2e8   : > { %8131 = vmatprep.mubr.bf16.mxu0 %v8875_v42  ;;  %v5894_v42 = vrot.slane %v5893_v56, 4  ;;  %v5918_v3 = vrot.slane %v5917_v16, 4  ;;  %v3728_v28 = vrot.slane %v3726_v44, 4  ;;  %v3731_v58 = vrot.slane %v3729_v54, 5  ;;  %v8880_v44 = vld [vmem:[#allocation2 + $0xc0] sm:$0xff]  }
 0x2e9   : > { %v5931_v37 = vor.u32 %v5930_v10, %v5927_v26  ;;  %v5941_v23 = vor.u32 %v5940_v31, %v10331_v30  ;;  %v5944_v27 = vshll.u32 %v5563_v63, 16  ;;  %v3709_v1 = vrot.slane %v3708_v40, 4 }
 0x2ea   : > { %v5908_v51 = vrot.slane %v5907_v13, 4  ;;  %v5922_v18 = vrot.slane %v5920_v17, 5  ;;  %v3724_v45 = vsel %vm9782_vm13, %v3719_v14, %v3723_v8  ;;  %v3742_v7 = vor.u32 %v3741_v50, %v3737_v32  ;;  %v6338_v13 = vld [vmem:[#allocation2 + $0x28] sm:$0xf]  ;;  %v6341_v14 = vld [vmem:[#allocation2 + $0x34] sm:$0xf] }
 0x2eb   : > { %v5889_v56 = vsel %vm9782_vm13, %v5884_v46, %v10322_v2  ;;  %v3745_v9 = vshll.u32 %v3658_v19, 16  ;;  %v6432_v15 = vrot.slane %v6335_v34, 5  ;;  %v3732_v55 = vor.u32 %v3731_v58, %v3728_v28 }
 0x2ec   : > { %v5923_v47 = vsel %vm9782_vm13, %v5918_v3, %v5922_v18  ;;  %v5932_v40 = vrot.slane %v5931_v37, 4  ;;  %v5942_v52 = vrot.slane %v5941_v23, 4  ;;  %v5946_v16 = vrot.slane %v5944_v27, 5  ;;  %v6339_v23 = vld [vmem:[#allocation2 + $0x2c] sm:$0x1] }
 0x2ed   : > { %8320 = vmatmul.mubr.bf16.gmra.mrb[16].mxu1 %v7581_v12  ;;  %v5899_v12 = vsel %vm9782_vm13, %v5894_v42, %v5898_v5  ;;  %v3714_v54 = vsel %vm9782_vm13, %v3709_v1, %v10313_v6  ;;  %v5913_v10 = vsel %vm9782_vm13, %v5908_v51, %v10324_v4  ;;  %v6434_v8 = vrot.slane %v6432_v15, 4  ;;  %v6334_v4 = vld [vmem:[#allocation2 + $0x18] sm:$0xe]  ;;  %v6342_v1 = vld [vmem:[#allocation2 + $0x38] sm:$0x1] }
 0x2ee   : > { %8323 = vmatprep.mubr.bf16.mxu1 %v7582_v38  ;;  %v7583_v26 = vcombine.low %v5889_v56, %v5899_v12  ;;  %v7482_v2 = vcombine.low %v3714_v54, %v3724_v45  ;;  %v7584_v31 = vcombine.low %v5913_v10, %v5923_v47  ;;  %v6336_v38 = vld [vmem:[#allocation2 + $0x20] sm:$0x1]  ;;  %v3733_v17 = vrot.slane %v3732_v55, 4  ;;  %v6337_v51 = vld [vmem:[#allocation2 + $0x24] sm:$0xe] }
 0x2ef   : > { %8132 = vmatmul.mubr.bf16.gmra.mrb[56].mxu0 %v8877_v49  ;;  %v3743_v49 = vrot.slane %v3742_v7, 4  ;;  %v3747_v63 = vrot.slane %v3745_v9, 5  ;;  %v5937_v6 = vsel %vm9782_vm13, %v5932_v40, %v10331_v30  ;;  %v6435_v42 = vrot.slane %v6336_v38, 5  ;;  %v6344_v45 = vld [vmem:[#allocation2 + $0x40] sm:$0xf] }
 0x2f0   : > { %8135 = vmatprep.mubr.bf16.mxu0 %v8878_v60  ;;  %v5947_v60 = vsel %vm9782_vm13, %v5942_v52, %v5946_v16  ;;  %v6439_v46 = vrot.slane %v6338_v13, 5  ;;  %v7594_v3 = vrot.slane %v6334_v4, 9  ;;  %v6446_v19 = vrot.slane %v6341_v14, 5  ;;  %v6340_v7 = vld [vmem:[#allocation2 + $0x30] sm:$0xe] }
 0x2f1   : > { %v3748_v50 = vsel %vm9782_vm13, %v3743_v49, %v3747_v63  ;;  %v7585_v5 = vcombine.low %v5937_v6, %v5947_v60  ;;  %v6436_v28 = vsel %vm9932_vm0, %v6434_v8, %v6435_v42  ;;  %v3738_v58 = vsel %vm9782_vm13, %v3733_v17, %v3737_v32  ;;  %v6347_v56 = vld [vmem:[#allocation2 + $0x4c] sm:$0xf]  ;;  %v6345_v54 = vld [vmem:[#allocation2 + $0x44] sm:$0x1]  ;;  %v6350_v38 = vld [vmem:[#allocation2 + $0x58] sm:$0xf] }
 0x2f2   : > { %v7483_v30 = vcombine.low %v3738_v58, %v3748_v50  ;;  %v6433_v37 = vsel %vm9932_vm0, %v7594_v3, %v6432_v15  ;;  %v6441_v34 = vrot.slane %v6439_v46, 4  ;;  %v6448_v18 = vrot.slane %v6446_v19, 4  ;;  %v6346_v13 = vld [vmem:[#allocation2 + $0x48] sm:$0xe]  ;;  %v6353_v17 = vld [vmem:[#allocation2 + $0x64] sm:$0xf] }
 0x2f3   : > { %v7610_v27 = vcombine.low %v6433_v37, %v6436_v28  ;;  %v6442_v12 = vrot.slane %v6339_v23, 5  ;;  %v6449_v47 = vrot.slane %v6342_v1, 5  ;;  %v7595_v41 = vrot.slane %v6337_v51, 9  ;;  %v6351_v28 = vld [vmem:[#allocation2 + $0x5c] sm:$0x1] }
 0x2f4   : > { %v6453_v9 = vrot.slane %v6344_v45, 5  ;;  %v7596_v15 = vrot.slane %v6340_v7, 9  ;;  %v6460_v40 = vrot.slane %v6347_v56, 5  ;;  %v6456_v8 = vrot.slane %v6345_v54, 5  ;;  %v6349_v37 = vld [vmem:[#allocation2 + $0x54] sm:$0xe] }
 0x2f5   : > { %8324 = vmatmul.mubr.bf16.gmra.mrb[20].mxu1 %v7583_v26  ;;  %v6443_v32 = vsel %vm9932_vm0, %v6441_v34, %v6442_v12  ;;  %v6450_v55 = vsel %vm9932_vm0, %v6448_v18, %v6449_v47  ;;  %v6440_v52 = vsel %vm9932_vm0, %v7595_v41, %v6439_v46  ;;  %v6467_v4 = vrot.slane %v6350_v38, 5  ;;  %v6352_v1 = vld [vmem:[#allocation2 + $0x60] sm:$0xe]  ;;  %v6359_v51 = vld [vmem:[#allocation2 + $0x7c] sm:$0xf] }
 0x2f6   : > { %8327 = vmatprep.mubr.bf16.mxu1 %v7584_v31  ;;  %v7611_v16 = vcombine.low %v6440_v52, %v6443_v32  ;;  %v6455_v10 = vrot.slane %v6453_v9, 4  ;;  %v6343_v31 = vld [vmem:[#allocation2 + $0x3c] sm:$0xe]  ;;  %v6462_v49 = vrot.slane %v6460_v40, 4  ;;  %v7598_v14 = vrot.slane %v6346_v13, 9 }
 0x2f7   : > { %8136 = vmatmul.mubr.bf16.gmra.mrb[60].mxu0 %v8880_v44  ;;  %v6447_v44 = vsel %vm9932_vm0, %v7596_v15, %v6446_v19  ;;  %v7597_v6 = vrot.slane %v6343_v31, 9  ;;  %v6474_v50 = vrot.slane %v6353_v17, 5  ;;  %v6469_v58 = vrot.slane %v6467_v4, 4  ;;  %v6365_v31 = vld [vmem:[#allocation2 + $0x94] sm:$0xf] }
 0x2f8   : > { %8155 = vmatprep.mubr.bf16.mxu0 %v7482_v2  ;;  %v7612_v26 = vcombine.low %v6447_v44, %v6450_v55  ;;  %v6348_v2 = vld [vmem:[#allocation2 + $0x50] sm:$0x1]  ;;  %v6457_v60 = vsel %vm9932_vm0, %v6455_v10, %v6456_v8  ;;  %v6461_v3 = vsel %vm9932_vm0, %v7598_v14, %v6460_v40  ;;  %v6470_v34 = vrot.slane %v6351_v28, 5  ;;  %v6357_v55 = vld [vmem:[#allocation2 + $0x74] sm:$0x1] }
 0x2f9   : > { %v6463_v63 = vrot.slane %v6348_v2, 5  ;;  %v6454_v46 = vsel %vm9932_vm0, %v7597_v6, %v6453_v9  ;;  %v6476_v23 = vrot.slane %v6474_v50, 4  ;;  %v7599_v45 = vrot.slane %v6349_v37, 9  ;;  %v6355_v44 = vld [vmem:[#allocation2 + $0x6c] sm:$0xe] }
 0x2fa   : > { %v6471_v12 = vsel %vm9932_vm0, %v6469_v58, %v6470_v34  ;;  %v7600_v56 = vrot.slane %v6352_v1, 9  ;;  %v6488_v41 = vrot.slane %v6359_v51, 5  ;;  %v6484_v10 = vrot.slane %v6357_v55, 5  ;;  %v6358_v2 = vld [vmem:[#allocation2 + $0x78] sm:$0xe] }
 0x2fb   : > { %v6464_v42 = vsel %vm9932_vm0, %v6462_v49, %v6463_v63  ;;  %v6468_v32 = vsel %vm9932_vm0, %v7599_v45, %v6467_v4  ;;  %v7601_v38 = vrot.slane %v6355_v44, 9  ;;  %v7602_v17 = vrot.slane %v6358_v2, 9  ;;  %v6371_v37 = vld [vmem:[#allocation2 + $0xac] sm:$0xf]  ;;  %v6377_v44 = vld [vmem:[#allocation2 + $0xc4] sm:$0xf] }
 0x2fc   : > { %v7614_v19 = vcombine.low %v6461_v3, %v6464_v42  ;;  %v7615_v9 = vcombine.low %v6468_v32, %v6471_v12  ;;  %v6475_v15 = vsel %vm9932_vm0, %v7600_v56, %v6474_v50  ;;  %v6490_v54 = vrot.slane %v6488_v41, 4  ;;  %v6363_v42 = vld [vmem:[#allocation2 + $0x8c] sm:$0x1]  ;;  %v6361_v3 = vld [vmem:[#allocation2 + $0x84] sm:$0xe] }
 0x2fd   : > { %8328 = vmatmul.mubr.bf16.gmra.mrb[24].mxu1 %v7585_v5  ;;  %v7613_v5 = vcombine.low %v6454_v46, %v6457_v60  ;;  %v6502_v6 = vrot.slane %v6365_v31, 5  ;;  %v6489_v14 = vsel %vm9932_vm0, %v7602_v17, %v6488_v41  ;;  %v6498_v58 = vrot.slane %v6363_v42, 5  ;;  %v6373_v42 = vld [vmem:[#allocation2 + $0xb4] sm:$0xe] }
 0x2fe   : > { %8347 = vmatprep.mubr.bf16.mxu1 %v7610_v27  ;;  %v6356_v27 = vld [vmem:[#allocation2 + $0x70] sm:$0xf]  ;;  %v6516_v45 = vrot.slane %v6371_v37, 5 }
 0x2ff   : > { %8156 = vmatmul.mubr.bf16.vlgmr.msra.gmra.mrb[32].mxu0 %v7483_v30  ;;  %v6354_v30 = vld [vmem:[#allocation2 + $0x68] sm:$0x1]  ;;  %v6481_v7 = vrot.slane %v6356_v27, 5  ;;  %v6504_v28 = vrot.slane %v6502_v6, 4  ;;  %v7603_v27 = vrot.slane %v6361_v3, 9 }
 0x300   : > { %v6477_v18 = vrot.slane %v6354_v30, 5  ;;  %v6364_v30 = vld [vmem:[#allocation2 + $0x90] sm:$0xe]  ;;  %v6518_v55 = vrot.slane %v6516_v45, 4 }
 0x301   : > { %v6483_v52 = vrot.slane %v6481_v7, 4  ;;  %v6482_v60 = vsel %vm9932_vm0, %v7601_v38, %v6481_v7  ;;  %v7604_v51 = vrot.slane %v6364_v30, 9  ;;  %v6530_v38 = vrot.slane %v6377_v44, 5 }
 0x302   : > { %v6478_v47 = vsel %vm9932_vm0, %v6476_v23, %v6477_v18  ;;  %v7607_v30 = vrot.slane %v6373_v42, 9 }
 0x303   : > { %v7616_v40 = vcombine.low %v6475_v15, %v6478_v47  ;;  %v6485_v8 = vsel %vm9932_vm0, %v6483_v52, %v6484_v10  ;;  %v6503_v56 = vsel %vm9932_vm0, %v7604_v51, %v6502_v6  ;;  %v6369_v47 = vld [vmem:[#allocation2 + $0xa4] sm:$0x1]  ;;  %v6367_v15 = vld [vmem:[#allocation2 + $0x9c] sm:$0xe]  ;;  %v6380_v6 = vld [vmem:[#allocation2 + $0xd0] sm:$0xf] }
 0x304   : > { %v7617_v4 = vcombine.low %v6482_v60, %v6485_v8  ;;  %v6512_v52 = vrot.slane %v6369_v47, 5  ;;  %v6537_v3 = vrot.slane %v6380_v6, 5 }
 0x305   : > { %8348 = vmatmul.mubr.bf16.vlgmr.msra.gmra.mrb[28].mxu1 %v7611_v16  ;;  %v6360_v16 = vld [vmem:[#allocation2 + $0x80] sm:$0x1] }
 0x306   : > { %8351 = vmatprep.mubr.bf16.mxu1 %v7612_v26  ;;  %v6362_v26 = vld [vmem:[#allocation2 + $0x88] sm:$0xf]  ;;  %v6491_v49 = vrot.slane %v6360_v16, 5  ;;  %v6539_v51 = vrot.slane %v6537_v3, 4 }
 0x307   : > { %v6495_v13 = vrot.slane %v6362_v26, 5  ;;  %v6370_v16 = vld [vmem:[#allocation2 + $0xa8] sm:$0xe]  ;;  %v7605_v26 = vrot.slane %v6367_v15, 9 }
 0x308   : > { %v6492_v63 = vsel %vm9932_vm0, %v6490_v54, %v6491_v49  ;;  %v7606_v31 = vrot.slane %v6370_v16, 9 }
 0x309   : > { %v7618_v50 = vcombine.low %v6489_v14, %v6492_v63  ;;  %v6497_v46 = vrot.slane %v6495_v13, 4  ;;  %v6496_v12 = vsel %vm9932_vm0, %v7603_v27, %v6495_v13  ;;  %v6375_v63 = vld [vmem:[#allocation2 + $0xbc] sm:$0x1]  ;;  %v6378_v14 = vld [vmem:[#allocation2 + $0xc8] sm:$0x1] }
 0x30a   : > { %v6517_v17 = vsel %vm9932_vm0, %v7606_v31, %v6516_v45 }
 0x30b   : > { %v6499_v34 = vsel %vm9932_vm0, %v6497_v46, %v6498_v58  ;;  %v6526_v46 = vrot.slane %v6375_v63, 5  ;;  %v6381_v58 = vld [vmem:[#allocation2 + $0xd4] sm:$0x1] }
 0x30c   : > { %v7619_v7 = vcombine.low %v6496_v12, %v6499_v34 }
 0x30d   : > { %8352 = vmatmul.mubr.bf16.gmra.mrb[0].mxu1 %v7613_v5  ;;  %v6366_v5 = vld [vmem:[#allocation2 + $0x98] sm:$0x1] }
 0x30e   : > { %8355 = vmatprep.mubr.bf16.mxu1 %v7614_v19  ;;  %v6368_v19 = vld [vmem:[#allocation2 + $0xa0] sm:$0xf]  ;;  %v6505_v23 = vrot.slane %v6366_v5, 5 }
 0x30f   : > { %v6509_v1 = vrot.slane %v6368_v19, 5  ;;  %v6376_v5 = vld [vmem:[#allocation2 + $0xc0] sm:$0xe]  ;;  %v6379_v19 = vld [vmem:[#allocation2 + $0xcc] sm:$0xe] }
 0x310   : > { %v6506_v18 = vsel %vm9932_vm0, %v6504_v28, %v6505_v23  ;;  %v6533_v28 = vrot.slane %v6378_v14, 5  ;;  %v7608_v23 = vrot.slane %v6376_v5, 9 }
 0x311   : > { %v7620_v41 = vcombine.low %v6503_v56, %v6506_v18  ;;  %v6511_v32 = vrot.slane %v6509_v1, 4  ;;  %v6510_v8 = vsel %vm9932_vm0, %v7605_v26, %v6509_v1  ;;  %v7609_v1 = vrot.slane %v6379_v19, 9 }
 0x312   : > { %v6540_v18 = vrot.slane %v6381_v58, 5  ;;  %v6531_v12 = vsel %vm9932_vm0, %v7608_v23, %v6530_v38 }
 0x313   : > { %v6513_v10 = vsel %vm9932_vm0, %v6511_v32, %v6512_v52  ;;  %v6538_v56 = vsel %vm9932_vm0, %v7609_v1, %v6537_v3 }
 0x314   : > { %v7621_v13 = vcombine.low %v6510_v8, %v6513_v10  ;;  %v6541_v47 = vsel %vm9932_vm0, %v6539_v51, %v6540_v18 }
 0x315   : > { %8356 = vmatmul.mubr.bf16.gmra.mrb[4].mxu1 %v7615_v9  ;;  %v6372_v9 = vld [vmem:[#allocation2 + $0xb0] sm:$0x1] }
 0x316   : > { %8359 = vmatprep.mubr.bf16.mxu1 %v7616_v40  ;;  %v6374_v40 = vld [vmem:[#allocation2 + $0xb8] sm:$0xf]  ;;  %v6519_v54 = vrot.slane %v6372_v9, 5 }
 0x317   : > { %v6523_v2 = vrot.slane %v6374_v40, 5 }
 0x318   : > { %v6520_v49 = vsel %vm9932_vm0, %v6518_v55, %v6519_v54 }
 0x319   : > { %v7622_v60 = vcombine.low %v6517_v17, %v6520_v49  ;;  %v6524_v34 = vsel %vm9932_vm0, %v7607_v30, %v6523_v2 }
 0x31d   : > { %8360 = vmatmul.mubr.bf16.gmra.mrb[8].mxu1 %v7617_v4  ;;  %v6525_v4 = vrot.slane %v6523_v2, 4 }
 0x31e   : > { %8363 = vmatprep.mubr.bf16.mxu1 %v7618_v50  ;;  %v6532_v50 = vrot.slane %v6530_v38, 4 }
 0x31f   : > { %v6527_v37 = vsel %vm9932_vm0, %v6525_v4, %v6526_v46 }
 0x320   : > { %v6534_v27 = vsel %vm9932_vm0, %v6532_v50, %v6533_v28  ;;  %v7623_v45 = vcombine.low %v6524_v34, %v6527_v37  ;;  %v10474_v37 = vld [vmem:[#allocation13] ss:$0 sm:$0xff] }
 0x325   : > { %8364 = vmatmul.mubr.bf16.gmra.mrb[12].mxu1 %v7619_v7  ;;  %v7624_v7 = vcombine.low %v6531_v12, %v6534_v27 }
 0x326   : > { %8367 = vmatprep.mubr.bf16.mxu1 %v7620_v41  ;;  %v7625_v41 = vcombine.low %v6538_v56, %v6541_v47 }
 0x32d   : > { %8368 = vmatmul.mubr.bf16.gmra.mrb[16].mxu1 %v7621_v13 }
 0x32e   : > { %8371 = vmatprep.mubr.bf16.mxu1 %v7622_v60 }
 0x335   : > { %8372 = vmatmul.mubr.bf16.gmra.mrb[20].mxu1 %v7623_v45 }
 0x336   : > { %8375 = vmatprep.mubr.bf16.mxu1 %v7624_v7 }
 0x33d   : > { %8376 = vmatmul.mubr.bf16.gmra.mrb[24].mxu1 %v7625_v41 }
 0x39a   : > { %v8113_v32 = vpop.f32.mrb[36].mxu0 }
 0x39b   : > { %v3446_v9 = vpop.f32.mrb[37].mxu0 }
 0x39c   : > { %v10422_v15 = vpop.f32.mrb[38].mxu0 }
 0x39d   : > { %v10424_v55 = vpop.f32.mrb[39].mxu0 }
 0x3a2   : > { %v10426_v40 = vpop.f32.mrb[40].mxu0 }
 0x3a3   : > { %v10428_v52 = vpop.f32.mrb[41].mxu0 }
 0x3a4   : > { %v10430_v16 = vpop.f32.mrb[42].mxu0 }
 0x3a5   : > { %v10432_v44 = vpop.f32.mrb[43].mxu0 }
 0x3aa   : > { %v10434_v54 = vpop.f32.mrb[44].mxu0 }
 0x3ab   : > { %v10436_v11 = vpop.f32.mrb[45].mxu0 }
 0x3ac   : > { %v10438_v26 = vpop.f32.mrb[46].mxu0 }
 0x3ad   : > { %v10440_v10 = vpop.f32.mrb[47].mxu0 }
 0x3b2   : > { %v10442_v2 = vpop.f32.mrb[48].mxu0 }
 0x3b3   : > { %v10444_v31 = vpop.f32.mrb[49].mxu0 }
 0x3b4   : > { %v10446_v49 = vpop.f32.mrb[50].mxu0 }
 0x3b5   : > { %v10448_v38 = vpop.f32.mrb[51].mxu0 }
 0x3ba   : > { %v10450_v8 = vpop.f32.mrb[52].mxu0 }
 0x3bb   : > { %v10452_v13 = vpop.f32.mrb[53].mxu0 }
 0x3bc   : > { %v10454_v17 = vpop.f32.mrb[54].mxu0 }
 0x3bd   : > { %v10456_v63 = vpop.f32.mrb[55].mxu0 }
 0x3c2   : > { %v10458_v6 = vpop.f32.mrb[56].mxu0 }
 0x3c3   : > { %v10460_v60 = vpop.f32.mrb[57].mxu0 }
 0x3c4   : > { %v10462_v4 = vpop.f32.mrb[58].mxu0 }
 0x3c5   : > { %v10464_v14 = vpop.f32.mrb[59].mxu0 }
 0x3ca   : > { %v10466_v42 = vpop.f32.mrb[60].mxu0 }
 0x3cb   : > { %10749 = vst [vmem:[#allocation33_spill] sm:$0xff] %v10466_v42  ;;  %v10468_v50 = vpop.f32.mrb[61].mxu0 }
 0x3cc   : > { %10750 = vst [vmem:[#allocation34_spill] sm:$0xff] %v10468_v50  ;;  %v10470_v46 = vpop.f32.mrb[62].mxu0 }
 0x3cd   : > { %10751 = vst [vmem:[#allocation35_spill] sm:$0xff] %v10470_v46  ;;  %v10472_v5 = vpop.f32.mrb[63].mxu0 }
 0x3ce   : > { %10752 = vst [vmem:[#allocation36_spill] sm:$0xff] %v10472_v5 }
 0x3d2   : > { %v8157_v3 = vpop.f32.mrb[32].mxu0 }
 0x3d3   : > { %v4248_v28 = vpop.f32.mrb[33].mxu0 }
 0x3d4   : > { %v8158_v19 = vpop.f32.mrb[34].mxu0 }
 0x3d5   : > { %v4251_v58 = vpop.f32.mrb[35].mxu0 }
 0x3d8   : > { %v8349_v30 = vpop.f32.mrb[28].mxu1 }
 0x3d9   : > { %v8395_v23 = vadd.f32 %v8349_v30, %v8157_v3  ;;  %v6705_v27 = vpop.f32.mrb[29].mxu1 }
 0x3da   : > { %v8396_v34 = vadd.f32 %v6705_v27, %v4248_v28  ;;  %v8350_v1 = vpop.f32.mrb[30].mxu1 }
 0x3db   : > { %v6969_v51 = vadd.f32 %v8395_v23, %v10474_v37  ;;  %v8397_v18 = vadd.f32 %v8350_v1, %v8158_v19  ;;  %v6708_v45 = vpop.f32.mrb[31].mxu1 }
 0x3dc   : > { %v6967_v12 = vadd.f32 %v8396_v34, %v10474_v37  ;;  %v8398_v7 = vadd.f32 %v6708_v45, %v4251_v58 }
 0x3dd   : > { %v7001_v56 = vmul.f32 0.01, %v6969_v51  ;;  %v6970_v47 = vadd.f32 %v8397_v18, %v10474_v37 }
 0x3de   : > { %v6999_v41 = vmul.f32 0.01, %v6967_v12  ;;  %v6968_v5 = vadd.f32 %v8398_v7, %v10474_v37 }
 0x3df   : > { %v7033_v46 = vmax.f32 %v6969_v51, %v7001_v56  ;;  %v7002_v50 = vmul.f32 0.01, %v6970_v47 }
 0x3e0   : > { %v7031_v3 = vmax.f32 %v6967_v12, %v6999_v41  ;;  %v7000_v28 = vmul.f32 0.01, %v6968_v5  ;;  %v8353_v30 = vpop.f32.mrb[0].mxu1 }
 0x3e1   : > { %v7097_v23 = vadd.f32 %v7033_v46, %v9509_v57  ;;  %v7034_v19 = vmax.f32 %v6970_v47, %v7002_v50  ;;  %v8399_v27 = vadd.f32 %v8353_v30, %v8113_v32  ;;  %v6721_v1 = vpop.f32.mrb[1].mxu1 }
 0x3e2   : > { %v7095_v58 = vadd.f32 %v7031_v3, %v9511_v59  ;;  %v7032_v34 = vmax.f32 %v6968_v5, %v7000_v28  ;;  %v8400_v45 = vadd.f32 %v6721_v1, %v3446_v9  ;;  %v8354_v42 = vpop.f32.mrb[2].mxu1 }
 0x3e3   : > { %7130 = vst.msk [vmem:[%s10483_s26 + $0x10] sm:$0xff] %vm7127_vm1, %v7097_v23  ;;  %v7098_v51 = vadd.f32 %v7034_v19, %v9515_v62  ;;  %v6973_v57 = vadd.f32 %v8399_v27, %v10474_v37  ;;  %v8401_v32 = vadd.f32 %v8354_v42, %v10422_v15  ;;  %v6724_v50 = vpop.f32.mrb[3].mxu1 }
 0x3e4   : > { %7128 = vst.msk [vmem:[%s10483_s26] sm:$0xff] %vm7127_vm1, %v7095_v58  ;;  %v7096_v59 = vadd.f32 %v7032_v34, %v9519_v0  ;;  %v6971_v9 = vadd.f32 %v8400_v45, %v10474_v37  ;;  %v8402_v46 = vadd.f32 %v6724_v50, %v10424_v55 }
 0x3e5   : > { %7131 = vst.msk [vmem:[%s10483_s26 + $0x18] sm:$0xff] %vm7127_vm1, %v7098_v51  ;;  %v7005_v5 = vmul.f32 0.01, %v6973_v57  ;;  %v6974_v18 = vadd.f32 %v8401_v32, %v10474_v37 }
 0x3e6   : > { %7129 = vst.msk [vmem:[%s10483_s26 + $0x8] sm:$0xff] %vm7127_vm1, %v7096_v59  ;;  %v7003_v62 = vmul.f32 0.01, %v6971_v9  ;;  %v6972_v15 = vadd.f32 %v8402_v46, %v10474_v37 }
 0x3e7   : > { %v7037_v42 = vmax.f32 %v6973_v57, %v7005_v5  ;;  %v7006_v12 = vmul.f32 0.01, %v6974_v18 }
 0x3e8   : > { %v7035_v7 = vmax.f32 %v6971_v9, %v7003_v62  ;;  %v7004_v0 = vmul.f32 0.01, %v6972_v15  ;;  %v8357_v56 = vpop.f32.mrb[4].mxu1 }
 0x3e9   : > { %v7101_v47 = vadd.f32 %v7037_v42, %v9533_v29  ;;  %v7038_v55 = vmax.f32 %v6974_v18, %v7006_v12  ;;  %v8403_v41 = vadd.f32 %v8357_v56, %v10426_v40  ;;  %v6737_v3 = vpop.f32.mrb[5].mxu1 }
 0x3ea   : > { %v7099_v28 = vadd.f32 %v7035_v7, %v9541_v35  ;;  %v7036_v30 = vmax.f32 %v6972_v15, %v7004_v0  ;;  %v8404_v23 = vadd.f32 %v6737_v3, %v10428_v52  ;;  %v8358_v19 = vpop.f32.mrb[6].mxu1 }
 0x3eb   : > { %7134 = vst.msk [vmem:[%s10483_s26 + $0x30] sm:$0xff] %vm7127_vm1, %v7101_v47  ;;  %v7102_v27 = vadd.f32 %v7038_v55, %v9575_v20  ;;  %v6977_v1 = vadd.f32 %v8403_v41, %v10474_v37  ;;  %v8405_v29 = vadd.f32 %v8358_v19, %v10430_v16  ;;  %v6740_v58 = vpop.f32.mrb[7].mxu1 }
 0x3ec   : > { %7132 = vst.msk [vmem:[%s10483_s26 + $0x20] sm:$0xff] %vm7127_vm1, %v7099_v28  ;;  %v7100_v40 = vadd.f32 %v7036_v30, %v9577_v21  ;;  %v6975_v35 = vadd.f32 %v8404_v23, %v10474_v37  ;;  %v8406_v34 = vadd.f32 %v6740_v58, %v10432_v44 }
 0x3ed   : > { %7135 = vst.msk [vmem:[%s10483_s26 + $0x38] sm:$0xff] %vm7127_vm1, %v7102_v27  ;;  %v7009_v52 = vmul.f32 0.01, %v6977_v1  ;;  %v6978_v45 = vadd.f32 %v8405_v29, %v10474_v37 }
 0x3ee   : > { %7133 = vst.msk [vmem:[%s10483_s26 + $0x28] sm:$0xff] %vm7127_vm1, %v7100_v40  ;;  %v7007_v20 = vmul.f32 0.01, %v6975_v35  ;;  %v6976_v16 = vadd.f32 %v8406_v34, %v10474_v37 }
 0x3ef   : > { %v7041_v51 = vmax.f32 %v6977_v1, %v7009_v52  ;;  %v7010_v57 = vmul.f32 0.01, %v6978_v45 }
 0x3f0   : > { %v7039_v32 = vmax.f32 %v6975_v35, %v7007_v20  ;;  %v7008_v21 = vmul.f32 0.01, %v6976_v16  ;;  %v8361_v50 = vpop.f32.mrb[8].mxu1 }
 0x3f1   : > { %v7105_v59 = vadd.f32 %v7041_v51, %v9581_v24  ;;  %v7042_v44 = vmax.f32 %v6978_v45, %v7010_v57  ;;  %v8407_v9 = vadd.f32 %v8361_v50, %v10434_v54  ;;  %v6753_v46 = vpop.f32.mrb[9].mxu1 }
 0x3f2   : > { %v7103_v5 = vadd.f32 %v7039_v32, %v9583_v25  ;;  %v7040_v18 = vmax.f32 %v6976_v16, %v7008_v21  ;;  %v8408_v62 = vadd.f32 %v6753_v46, %v10436_v11  ;;  %v8362_v15 = vpop.f32.mrb[10].mxu1  ;;  %v10753_v46 = vld [vmem:[#allocation19_spill] sm:$0xff] }
 0x3f3   : > { %7138 = vst.msk [vmem:[%s10483_s26 + $0x50] sm:$0xff] %vm7127_vm1, %v7105_v59  ;;  %v7106_v42 = vadd.f32 %v7042_v44, %v9589_v33  ;;  %v6981_v12 = vadd.f32 %v8407_v9, %v10474_v37  ;;  %v8409_v24 = vadd.f32 %v8362_v15, %v10438_v26  ;;  %v6756_v7 = vpop.f32.mrb[11].mxu1 }
 0x3f4   : > { %7136 = vst.msk [vmem:[%s10483_s26 + $0x40] sm:$0xff] %vm7127_vm1, %v7103_v5  ;;  %v7104_v54 = vadd.f32 %v7040_v18, %v9598_v39  ;;  %v6979_v25 = vadd.f32 %v8408_v62, %v10474_v37  ;;  %v8410_v0 = vadd.f32 %v6756_v7, %v10440_v10 }
 0x3f5   : > { %7139 = vst.msk [vmem:[%s10483_s26 + $0x58] sm:$0xff] %vm7127_vm1, %v7106_v42  ;;  %v7013_v11 = vmul.f32 0.01, %v6981_v12  ;;  %v6982_v56 = vadd.f32 %v8409_v24, %v10474_v37 }
 0x3f6   : > { %7137 = vst.msk [vmem:[%s10483_s26 + $0x48] sm:$0xff] %vm7127_vm1, %v7104_v54  ;;  %v7011_v33 = vmul.f32 0.01, %v6979_v25  ;;  %v6980_v26 = vadd.f32 %v8410_v0, %v10474_v37 }
 0x3f7   : > { %v7045_v47 = vmax.f32 %v6981_v12, %v7013_v11  ;;  %v7014_v55 = vmul.f32 0.01, %v6982_v56 }
 0x3f8   : > { %v7043_v41 = vmax.f32 %v6979_v25, %v7011_v33  ;;  %v7012_v39 = vmul.f32 0.01, %v6980_v26  ;;  %v8365_v3 = vpop.f32.mrb[12].mxu1 }
 0x3f9   : > { %v7109_v28 = vadd.f32 %v7045_v47, %v9630_v43  ;;  %v7046_v10 = vmax.f32 %v6982_v56, %v7014_v55  ;;  %v8411_v30 = vadd.f32 %v8365_v3, %v10442_v2  ;;  %v6769_v23 = vpop.f32.mrb[13].mxu1  ;;  %v10755_v56 = vld [vmem:[#allocation21_spill] sm:$0xff]  ;;  %v10756_v55 = vld [vmem:[#allocation22_spill] sm:$0xff] }
 0x3fa   : > { %v7107_v19 = vadd.f32 %v7043_v41, %v9632_v48  ;;  %v7044_v27 = vmax.f32 %v6980_v26, %v7012_v39  ;;  %v8412_v1 = vadd.f32 %v6769_v23, %v10444_v31  ;;  %v8366_v29 = vpop.f32.mrb[14].mxu1 }
 0x3fb   : > { %7142 = vst.msk [vmem:[%s10483_s26 + $0x70] sm:$0xff] %vm7127_vm1, %v7109_v28  ;;  %v7110_v58 = vadd.f32 %v7046_v10, %v9655_v22  ;;  %v6985_v40 = vadd.f32 %v8411_v30, %v10474_v37  ;;  %v8413_v43 = vadd.f32 %v8366_v29, %v10446_v49  ;;  %v6772_v35 = vpop.f32.mrb[15].mxu1  ;;  %v10757_v10 = vld [vmem:[#allocation23_spill] sm:$0xff] }
 0x3fc   : > { %7140 = vst.msk [vmem:[%s10483_s26 + $0x60] sm:$0xff] %vm7127_vm1, %v7107_v19  ;;  %v7108_v2 = vadd.f32 %v7044_v27, %v9659_v36  ;;  %v6983_v48 = vadd.f32 %v8412_v1, %v10474_v37  ;;  %v8414_v34 = vadd.f32 %v6772_v35, %v10448_v38 }
 0x3fd   : > { %7143 = vst.msk [vmem:[%s10483_s26 + $0x78] sm:$0xff] %vm7127_vm1, %v7110_v58  ;;  %v7017_v31 = vmul.f32 0.01, %v6985_v40  ;;  %v6986_v52 = vadd.f32 %v8413_v43, %v10474_v37 }
 0x3fe   : > { %7141 = vst.msk [vmem:[%s10483_s26 + $0x68] sm:$0xff] %vm7127_vm1, %v7108_v2  ;;  %v7015_v22 = vmul.f32 0.01, %v6983_v48  ;;  %v6984_v49 = vadd.f32 %v8414_v34, %v10474_v37 }
 0x3ff   : > { %v7049_v45 = vmax.f32 %v6985_v40, %v7017_v31  ;;  %v7018_v20 = vmul.f32 0.01, %v6986_v52 }
 0x400   : > { %v7047_v16 = vmax.f32 %v6983_v48, %v7015_v22  ;;  %v7016_v36 = vmul.f32 0.01, %v6984_v49  ;;  %v8369_v51 = vpop.f32.mrb[16].mxu1 }
 0x401   : > { %v7113_v57 = vadd.f32 %v7049_v45, %v9672_v53  ;;  %v7050_v38 = vmax.f32 %v6986_v52, %v7018_v20  ;;  %v8415_v32 = vadd.f32 %v8369_v51, %v10450_v8  ;;  %v6785_v21 = vpop.f32.mrb[17].mxu1  ;;  %v10754_v8 = vld [vmem:[#allocation20_spill] sm:$0xff]  ;;  %v10759_v52 = vld [vmem:[#allocation25_spill] sm:$0xff] }
 0x402   : > { %v7111_v50 = vadd.f32 %v7047_v16, %v9678_v61  ;;  %v7048_v59 = vmax.f32 %v6984_v49, %v7016_v36  ;;  %v8416_v44 = vadd.f32 %v6785_v21, %v10452_v13  ;;  %v8370_v9 = vpop.f32.mrb[18].mxu1  ;;  %v10760_v49 = vld [vmem:[#allocation33_spill] sm:$0xff]  ;;  %v10761_v16 = vld [vmem:[#allocation26_spill] sm:$0xff]  ;;  %v10763_v21 = vld [vmem:[#allocation27_spill] sm:$0xff] }
 0x403   : > { %7146 = vst.msk [vmem:[%s10483_s26 + $0x90] sm:$0xff] %vm7127_vm1, %v7113_v57  ;;  %v7114_v5 = vadd.f32 %v7050_v38, %v10753_v46  ;;  %v6989_v18 = vadd.f32 %v8415_v32, %v10474_v37  ;;  %v8417_v53 = vadd.f32 %v8370_v9, %v10454_v17  ;;  %v6788_v62 = vpop.f32.mrb[19].mxu1  ;;  %v10762_v57 = vld [vmem:[#allocation34_spill] sm:$0xff] }
 0x404   : > { %7144 = vst.msk [vmem:[%s10483_s26 + $0x80] sm:$0xff] %vm7127_vm1, %v7111_v50  ;;  %v7112_v15 = vadd.f32 %v7048_v59, %v10754_v8  ;;  %v6987_v61 = vadd.f32 %v8416_v44, %v10474_v37  ;;  %v8418_v42 = vadd.f32 %v6788_v62, %v10456_v63  ;;  %v10764_v44 = vld [vmem:[#allocation35_spill] sm:$0xff]  ;;  %v10766_v62 = vld [vmem:[#allocation36_spill] sm:$0xff] }
 0x405   : > { %7147 = vst.msk [vmem:[%s10483_s26 + $0x98] sm:$0xff] %vm7127_vm1, %v7114_v5  ;;  %v7021_v13 = vmul.f32 0.01, %v6989_v18  ;;  %v6990_v12 = vadd.f32 %v8417_v53, %v10474_v37  ;;  %v10765_v5 = vld [vmem:[#allocation28_spill] sm:$0xff] }
 0x406   : > { %7145 = vst.msk [vmem:[%s10483_s26 + $0x88] sm:$0xff] %vm7127_vm1, %v7112_v15  ;;  %v7019_v24 = vmul.f32 0.01, %v6987_v61  ;;  %v6988_v17 = vadd.f32 %v8418_v42, %v10474_v37 }
 0x407   : > { %v7053_v7 = vmax.f32 %v6989_v18, %v7021_v13  ;;  %v7022_v54 = vmul.f32 0.01, %v6990_v12 }
 0x408   : > { %v7051_v25 = vmax.f32 %v6987_v61, %v7019_v24  ;;  %v7020_v0 = vmul.f32 0.01, %v6988_v17  ;;  %v8373_v11 = vpop.f32.mrb[20].mxu1 }
 0x409   : > { %v7117_v33 = vadd.f32 %v7053_v7, %v10755_v56  ;;  %v7054_v63 = vmax.f32 %v6990_v12, %v7022_v54  ;;  %v8419_v26 = vadd.f32 %v8373_v11, %v10458_v6  ;;  %v6801_v47 = vpop.f32.mrb[21].mxu1  ;;  %v10758_v6 = vld [vmem:[#allocation24_spill] sm:$0xff]  ;;  %v10767_v54 = vld [vmem:[#allocation29_spill] sm:$0xff]  ;;  %v10768_v11 = vld [vmem:[#allocation30_spill] sm:$0xff] }
 0x40a   : > { %v7115_v41 = vadd.f32 %v7051_v25, %v10756_v55  ;;  %v7052_v39 = vmax.f32 %v6988_v17, %v7020_v0  ;;  %v8420_v3 = vadd.f32 %v6801_v47, %v10460_v60  ;;  %v8374_v28 = vpop.f32.mrb[22].mxu1 }
 0x40b   : > { %7150 = vst.msk [vmem:[%s10483_s26 + $0xb0] sm:$0xff] %vm7127_vm1, %v7117_v33  ;;  %v7118_v30 = vadd.f32 %v7054_v63, %v10757_v10  ;;  %v6993_v23 = vadd.f32 %v8419_v26, %v10474_v37  ;;  %v8421_v19 = vadd.f32 %v8374_v28, %v10462_v4  ;;  %v6804_v27 = vpop.f32.mrb[23].mxu1  ;;  %v10769_v63 = vld [vmem:[#allocation31_spill] sm:$0xff]  ;;  %v10770_v26 = vld [vmem:[#allocation32_spill] sm:$0xff] }
 0x40c   : > { %7148 = vst.msk [vmem:[%s10483_s26 + $0xa0] sm:$0xff] %vm7127_vm1, %v7115_v41  ;;  %v7116_v1 = vadd.f32 %v7052_v39, %v10758_v6  ;;  %v6991_v29 = vadd.f32 %v8420_v3, %v10474_v37  ;;  %v8422_v58 = vadd.f32 %v6804_v27, %v10464_v14 }
 0x40d   : > { %7151 = vst.msk [vmem:[%s10483_s26 + $0xb8] sm:$0xff] %vm7127_vm1, %v7118_v30  ;;  %v7025_v60 = vmul.f32 0.01, %v6993_v23  ;;  %v6994_v40 = vadd.f32 %v8421_v19, %v10474_v37 }
 0x40e   : > { %7149 = vst.msk [vmem:[%s10483_s26 + $0xa8] sm:$0xff] %vm7127_vm1, %v7116_v1  ;;  %v7023_v43 = vmul.f32 0.01, %v6991_v29  ;;  %v6992_v4 = vadd.f32 %v8422_v58, %v10474_v37 }
 0x40f   : > { %v7057_v35 = vmax.f32 %v6993_v23, %v7025_v60  ;;  %v7026_v2 = vmul.f32 0.01, %v6994_v40 }
 0x410   : > { %v7055_v48 = vmax.f32 %v6991_v29, %v7023_v43  ;;  %v7024_v34 = vmul.f32 0.01, %v6992_v4  ;;  %v8377_v31 = vpop.f32.mrb[24].mxu1 }
 0x411   : > { %v7121_v22 = vadd.f32 %v7057_v35, %v10759_v52  ;;  %v7058_v14 = vmax.f32 %v6994_v40, %v7026_v2  ;;  %v8423_v45 = vadd.f32 %v8377_v31, %v10760_v49  ;;  %v6817_v20 = vpop.f32.mrb[25].mxu1 }
 0x412   : > { %v7119_v36 = vadd.f32 %v7055_v48, %v10761_v16  ;;  %v7056_v51 = vmax.f32 %v6992_v4, %v7024_v34  ;;  %v8424_v38 = vadd.f32 %v6817_v20, %v10762_v57  ;;  %v8378_v32 = vpop.f32.mrb[26].mxu1 }
 0x413   : > { %7154 = vst.msk [vmem:[%s10483_s26 + $0xd0] sm:$0xff] %vm7127_vm1, %v7121_v22  ;;  %v7122_v50 = vadd.f32 %v7058_v14, %v10763_v21  ;;  %v6997_v59 = vadd.f32 %v8423_v45, %v10474_v37  ;;  %v8425_v9 = vadd.f32 %v8378_v32, %v10764_v44  ;;  %v6820_v46 = vpop.f32.mrb[27].mxu1 }
 0x414   : > { %7152 = vst.msk [vmem:[%s10483_s26 + $0xc0] sm:$0xff] %vm7127_vm1, %v7119_v36  ;;  %v7120_v18 = vadd.f32 %v7056_v51, %v10765_v5  ;;  %v6995_v53 = vadd.f32 %v8424_v38, %v10474_v37  ;;  %v8426_v8 = vadd.f32 %v6820_v46, %v10766_v62 }
 0x415   : > { %7155 = vst.msk [vmem:[%s10483_s26 + $0xd8] sm:$0xff] %vm7127_vm1, %v7122_v50  ;;  %v7029_v15 = vmul.f32 0.01, %v6997_v59  ;;  %v6998_v61 = vadd.f32 %v8425_v9, %v10474_v37 }
 0x416   : > { %7153 = vst.msk [vmem:[%s10483_s26 + $0xc8] sm:$0xff] %vm7127_vm1, %v7120_v18  ;;  %v7027_v42 = vmul.f32 0.01, %v6995_v53  ;;  %v6996_v13 = vadd.f32 %v8426_v8, %v10474_v37 }
 0x417   : > { %v7061_v12 = vmax.f32 %v6997_v59, %v7029_v15  ;;  %v7030_v24 = vmul.f32 0.01, %v6998_v61 }
 0x418   : > { %v7059_v17 = vmax.f32 %v6995_v53, %v7027_v42  ;;  %v7028_v7 = vmul.f32 0.01, %v6996_v13 }
 0x419   : > { %v7125_v25 = vadd.f32 %v7061_v12, %v10767_v54  ;;  %v7062_v0 = vmax.f32 %v6998_v61, %v7030_v24 }
 0x41a   : > { %v7123_v56 = vadd.f32 %v7059_v17, %v10768_v11  ;;  %v7060_v33 = vmax.f32 %v6996_v13, %v7028_v7 }
 0x41b   : > { %7158 = vst.msk [vmem:[%s10483_s26 + $0xf0] sm:$0xff] %vm7127_vm1, %v7125_v25  ;;  %v7126_v37 = vadd.f32 %v7062_v0, %v10769_v63 }
 0x41c   : > { %7156 = vst.msk [vmem:[%s10483_s26 + $0xe0] sm:$0xff] %vm7127_vm1, %v7123_v56  ;;  %v7124_v47 = vadd.f32 %v7060_v33, %v10770_v26 }
 0x41d   : > { %7159 = vst.msk [vmem:[%s10483_s26 + $0xf8] sm:$0xff] %vm7127_vm1, %v7126_v37 }
 0x41e   : > { %7157 = vst.msk [vmem:[%s10483_s26 + $0xe8] sm:$0xff] %vm7127_vm1, %v7124_v47 }
 0x41f   : > { %9048 = shalt.err (!%p9045_p13)
}
 0x420   : > { %s9049_s12 = scalar_lea.hbm %s10631_s28, 4096  ;;  %s9053_s15 = scalar_lea.hbm %s10689_s5, 8192 }
 0x421   : > { %p9050_p9 = scmp.ne.s32.totalorder %s10631_s28, %s9049_s12  ;;  %p9054_p6 = scmp.lt.u32.totalorder %s10631_s28, %s10689_s5 }
 0x422   : > { %p9055_p4 = scmp.lt.u32.totalorder %s9053_s15, %s9049_s12  ;;  %p9057_p3 = scmp.lt.u32.totalorder %s9049_s12, %s10631_s28 }
 0x423   : > { %p9051_p0 = pnand %p9050_p9, %p9317_p10 }
 0x424   : > { %p9056_p8 = por %p9055_p4, %p9054_p6 }
 0x425   : > { %p9052_p11 = pneg %p9051_p0 }
 0x426   : > { %p9058_p5 = por %p9057_p3, %p9056_p8 }
 0x428   : > { %p9059_p7 = pnand %p9058_p5, %p9052_p11 }
 0x42a   : > { %9062 = shalt.err (!%p9059_p7)
}
 0x42b   : > { %s9120_s23 = smov 128   ;;  %s9121_s16 = smov 8  }
 0x42c   : > { %8670 = dma.vmem_to_hbm [thread:$0]  (%p9317_p10), %s10633_s27, 4096, %s10631_s28, %s7161_s22, %s9120_s23, %s9120_s23, %s9121_s16  }
 0x42d PF: > { %s7189_s6 = sand.u32 1, %s9097_s18   ;;  %p10771_p12 = scmp.ne.s32.totalorder %s10709_s25, 0 }
 0x42e   : > { %p10772_p1 = scmp.ge.s32.totalorder %s9109_s21, 2  ;;  %s7190_s17 = scalar_lea.sflag [#allocation7], %s7189_s6 }
 0x430   : > { %p8690_p2 = pnand %p10772_p1, %p10771_p12 }
 0x432   : > { %9092 = dma.done.wait (!%p8690_p2), %s7190_s17, 4096  }
 0x433   : > { %9094 = vsyncadd (!%p8690_p2), %s7190_s17, 4294963200  ;;  %p20_p13 = scmp.ge.s32.totalorder %s9307_s14, 4   ;;  %s10773_s18 = smov %s9101_s19 }
 0x434   : > { %s10774_s19 = smov %s9105_s20  ;;  %s10775_s20 = smov %s9323_s10 }
 0x435   : > { %s10776_s21 = smov %s9307_s14  ;;  %22 = sbr.rel (!%p20_p13) target bundleno = 7 (0x7), region = 112 }
 0x43c   :  { %7195 = vsyncpa [#allocation6], 1 }
 0x43d   :  { %7197 = vsyncpa [#allocation6 + $0x1], 1 }
 0x43e   :  { %7198 = vsyncpa [#allocation9], 1 }
 0x43f   :  { %7199 = vsyncpa [#allocation12], 1 }
 0x440   :  { %7200 = vsyncpa [#allocation7], 1 }
 0x441   :  { %7202 = vsyncpa [#allocation7 + $0x1], 1 }

</bundles_post_ra>
